<compile_context>
chip_gen: v7x
topology: tpu7x:2x2x1
jax: 0.10.0
libtpu: 0.0.40
codegen_flags: <defaults>
</compile_context>

<pallas_src>
import jax
import jax.numpy as jnp
from jax import lax
from jax.experimental import pallas as pl
from jax.experimental.pallas import tpu as pltpu

E = 128        # embed dim (fixed by the module)
H = 8          # heads
DH = E // H    # head dim = 16
EPS = 1e-5
B_BLK = 16     # batch elements folded per grid step -> R = B_BLK * L rows
NEG = -1e30


def _layernorm(v, g, b):
    mu = jnp.mean(v, axis=-1, keepdims=True)
    var = jnp.mean((v - mu) ** 2, axis=-1, keepdims=True)
    return (v - mu) * lax.rsqrt(var + EPS) * g + b


def encoder_kernel(x_ref,
                   ln1_g_ref, ln1_b_ref,
                   w_in_ref, b_in_ref,
                   w_out_ref, b_out_ref,
                   ln2_g_ref, ln2_b_ref,
                   w_mlp_ref, b_mlp_ref,
                   o_ref):
    L, B, _ = x_ref.shape          # block is (L, B_BLK, E)
    R = L * B

    # (L, B, E) -> (R, E); row r = l*B + b.  All row-wise ops are order
    # agnostic and attention batching is handled by the mask below, so no
    # transposes (host or in-kernel) are needed.
    x = x_ref[...].reshape(R, E)

    # ---- ln1 ----
    x1 = _layernorm(x, ln1_g_ref[...], ln1_b_ref[...])

    # ---- in_proj (q-scale already folded into weights host-side) ----
    qkv = jnp.dot(x1.astype(jnp.bfloat16), w_in_ref[...],
                  preferred_element_type=jnp.float32) + b_in_ref[...]
    q = qkv[:, 0:E].astype(jnp.bfloat16)          # (R, E)
    k = qkv[:, E:2 * E]                           # (R, E) f32
    v = qkv[:, 2 * E:3 * E].astype(jnp.bfloat16)  # (R, E)
    kT = jnp.transpose(k).astype(jnp.bfloat16)    # (E, R): one transpose, all heads

    # ---- additive block-diagonal mask: token (l, b) attends only to (m, b) ----
    ri = lax.broadcasted_iota(jnp.int32, (R, R), 0)
    ci = lax.broadcasted_iota(jnp.int32, (R, R), 1)
    if B & (B - 1) == 0:
        same_batch = ((ri - ci) & (B - 1)) == 0   # power-of-two: cheap bitwise AND
    else:
        same_batch = ((ri - ci) % B) == 0
    bias = jnp.where(same_batch, 0.0, NEG).astype(jnp.float32)

    # ---- attention: heads unrolled, out_proj fused into one (R, E) accumulator ----
    w_out = w_out_ref[...]                        # (E, E) bf16
    acc = jnp.zeros((R, E), jnp.float32)
    for h in range(H):
        lo, hi = h * DH, (h + 1) * DH
        qh = q[:, lo:hi]                          # (R, DH)  lane-slice read only
        khT = kT[lo:hi, :]                        # (DH, R)  sublane slice
        vh = v[:, lo:hi]                          # (R, DH)
        s = jnp.dot(qh, khT, preferred_element_type=jnp.float32) + bias   # (R, R)
        m = jnp.max(s, axis=-1, keepdims=True)
        e = jnp.exp(s - m)
        p = e * pl.reciprocal(jnp.sum(e, axis=-1, keepdims=True), approx=True)
        oh = jnp.dot(p.astype(jnp.bfloat16), vh,
                     preferred_element_type=jnp.float32)                   # (R, DH)
        acc = acc + jnp.dot(oh.astype(jnp.bfloat16), w_out[lo:hi, :],
                            preferred_element_type=jnp.float32)            # (R, E)

    x = acc + b_out_ref[...] + x                  # out_proj bias + residual

    # ---- ln2 -> mlp -> residual ----
    x1 = _layernorm(x, ln2_g_ref[...], ln2_b_ref[...])
    x1 = jnp.dot(x1.astype(jnp.bfloat16), w_mlp_ref[...],
                 preferred_element_type=jnp.float32) + b_mlp_ref[...]
    o_ref[...] = (x1 + x).reshape(L, B, E)


def mha_encoder(x, params, block_batch=B_BLK):
    """x: (L, N, 128) float32, PyTorch (seq, batch, embed) convention."""
    L, N, _ = x.shape
    (ln1_g, ln1_b, w_in_t, b_in, w_out_t, b_out,
     ln2_g, ln2_b, w_mlp_t, b_mlp) = params

    # Fold the 1/sqrt(head_dim) query scaling into the q columns of in_proj.
    scale = 1.0 / (DH ** 0.5)
    col_scale = jnp.concatenate(
        [jnp.full((1, E), scale, jnp.float32),
         jnp.ones((1, 2 * E), jnp.float32)], axis=1)
    w_in_s = (w_in_t * col_scale).astype(jnp.bfloat16)
    b_in_s = b_in * col_scale
    w_out_bf = w_out_t.astype(jnp.bfloat16)
    w_mlp_bf = w_mlp_t.astype(jnp.bfloat16)

    # Pad the batch dim to a multiple of block_batch (zero rows are inert and
    # never attended to by real rows thanks to the block-diagonal mask).
    n_pad = (-N) % block_batch
    xp = jnp.pad(x, ((0, 0), (0, n_pad), (0, 0))) if n_pad else x
    Np = N + n_pad

    full = lambda shape: pl.BlockSpec(shape, lambda b: (0, 0))

    out = pl.pallas_call(
        encoder_kernel,
        out_shape=jax.ShapeDtypeStruct((L, Np, E), jnp.float32),
        grid_spec=pltpu.PrefetchScalarGridSpec(
            num_scalar_prefetch=0,
            grid=(Np // block_batch,),
            in_specs=[
                pl.BlockSpec((L, block_batch, E), lambda b: (0, b, 0)),  # x
                full((1, E)), full((1, E)),                              # ln1
                full((E, 3 * E)), full((1, 3 * E)),                      # in_proj
                full((E, E)), full((1, E)),                              # out_proj
                full((1, E)), full((1, E)),                              # ln2
                full((E, E)), full((1, E)),                              # mlp
            ],
            out_specs=pl.BlockSpec((L, block_batch, E), lambda b: (0, b, 0)),
        ),
        compiler_params=pltpu.CompilerParams(
            dimension_semantics=("parallel",),
            vmem_limit_bytes=32 * 1024 * 1024),
    )(xp, ln1_g, ln1_b, w_in_s, b_in_s, w_out_bf, b_out,
      ln2_g, ln2_b, w_mlp_bf, b_mlp)

    return out[:, :N, :] if n_pad else out


def init_params(key):
    ks = jax.random.split(key, 3)
    std = 0.02
    # LayerNorm params (PyTorch default: weight=1, bias=0)
    ln1_g = jnp.ones((1, E), jnp.float32)
    ln1_b = jnp.zeros((1, E), jnp.float32)
    ln2_g = jnp.ones((1, E), jnp.float32)
    ln2_b = jnp.zeros((1, E), jnp.float32)
    # Attention in_proj: PyTorch weight is (3E, E) applied as x @ W.T -> store W.T
    w_in_t = jax.random.normal(ks[0], (E, 3 * E), jnp.float32) * std
    b_in = jnp.zeros((1, 3 * E), jnp.float32)
    # Attention out_proj: (E, E), stored transposed for x @ W.T
    w_out_t = jax.random.normal(ks[1], (E, E), jnp.float32) * std
    b_out = jnp.zeros((1, E), jnp.float32)
    # MLP Linear(128, 128), stored transposed
    w_mlp_t = jax.random.normal(ks[2], (E, E), jnp.float32) * std
    b_mlp = jnp.zeros((1, E), jnp.float32)
    return (ln1_g, ln1_b, w_in_t, b_in, w_out_t, b_out,
            ln2_g, ln2_b, w_mlp_t, b_mlp)


if __name__ == "__main__":
    key = jax.random.PRNGKey(0)
    kx, kp = jax.random.split(key)

    L, N = 8, 2                                    # seq=8, batch=2, embed=128
    x = jax.random.normal(kx, (L, N, E), jnp.float32)
    params = init_params(kp)

    y = mha_encoder(x, params)
    jax.block_until_ready(y)
    assert y.shape == (L, N, E)
    assert bool(jnp.all(jnp.isfinite(y)))
    print("KERNEL_OK")
</pallas_src>

<mosaic_0001>
module attributes {stable_mosaic.version = 11 : i64} {
  func.func @encoder_kernel(%arg0: i32, %arg1: memref<8x16x128xf32, #tpu.memory_space<vmem>>, %arg2: memref<1x128xf32, #tpu.memory_space<vmem>>, %arg3: memref<1x128xf32, #tpu.memory_space<vmem>>, %arg4: memref<128x384xbf16, #tpu.memory_space<vmem>>, %arg5: memref<1x384xf32, #tpu.memory_space<vmem>>, %arg6: memref<128x128xbf16, #tpu.memory_space<vmem>>, %arg7: memref<1x128xf32, #tpu.memory_space<vmem>>, %arg8: memref<1x128xf32, #tpu.memory_space<vmem>>, %arg9: memref<1x128xf32, #tpu.memory_space<vmem>>, %arg10: memref<128x128xbf16, #tpu.memory_space<vmem>>, %arg11: memref<1x128xf32, #tpu.memory_space<vmem>>, %arg12: memref<8x16x128xf32, #tpu.memory_space<vmem>>) attributes {dimension_semantics = [#tpu.dimension_semantics<parallel>], iteration_bounds = array<i64: 1>, scalar_prefetch = 0 : i64, scratch_operands = 0 : i64, tpu.core_type = #tpu.core_type<tc>, window_params = [{transform_indices = @transform_0, window_bounds = array<i64: 8, 16, 128>}, {pipeline_mode = #tpu.pipeline_mode<synchronous>, transform_indices = @transform_1, window_bounds = array<i64: 1, 128>}, {pipeline_mode = #tpu.pipeline_mode<synchronous>, transform_indices = @transform_2, window_bounds = array<i64: 1, 128>}, {pipeline_mode = #tpu.pipeline_mode<synchronous>, transform_indices = @transform_3, window_bounds = array<i64: 128, 384>}, {pipeline_mode = #tpu.pipeline_mode<synchronous>, transform_indices = @transform_4, window_bounds = array<i64: 1, 384>}, {pipeline_mode = #tpu.pipeline_mode<synchronous>, transform_indices = @transform_5, window_bounds = array<i64: 128, 128>}, {pipeline_mode = #tpu.pipeline_mode<synchronous>, transform_indices = @transform_6, window_bounds = array<i64: 1, 128>}, {pipeline_mode = #tpu.pipeline_mode<synchronous>, transform_indices = @transform_7, window_bounds = array<i64: 1, 128>}, {pipeline_mode = #tpu.pipeline_mode<synchronous>, transform_indices = @transform_8, window_bounds = array<i64: 1, 128>}, {pipeline_mode = #tpu.pipeline_mode<synchronous>, transform_indices = @transform_9, window_bounds = array<i64: 128, 128>}, {pipeline_mode = #tpu.pipeline_mode<synchronous>, transform_indices = @transform_10, window_bounds = array<i64: 1, 128>}, {transform_indices = @transform_11, window_bounds = array<i64: 8, 16, 128>}]} {
    %c0 = arith.constant 0 : index
    %c0_0 = arith.constant 0 : index
    %c0_1 = arith.constant 0 : index
    %0 = vector.load %arg1[%c0, %c0_0, %c0_1] : memref<8x16x128xf32, #tpu.memory_space<vmem>>, vector<8x16x128xf32>
    %1 = vector.shape_cast %0 : vector<8x16x128xf32> to vector<128x128xf32>
    %c0_2 = arith.constant 0 : index
    %c0_3 = arith.constant 0 : index
    %2 = vector.load %arg2[%c0_2, %c0_3] : memref<1x128xf32, #tpu.memory_space<vmem>>, vector<1x128xf32>
    %c0_4 = arith.constant 0 : index
    %c0_5 = arith.constant 0 : index
    %3 = vector.load %arg3[%c0_4, %c0_5] : memref<1x128xf32, #tpu.memory_space<vmem>>, vector<1x128xf32>
    %cst = arith.constant dense<0.000000e+00> : vector<128xf32>
    %4 = vector.multi_reduction <add>, %1, %cst [1] : vector<128x128xf32> to vector<128xf32>
    %5 = vector.shape_cast %4 : vector<128xf32> to vector<128x1xf32>
    %cst_6 = arith.constant 1.280000e+02 : f32
    %6 = vector.broadcast %cst_6 : f32 to vector<128x1xf32>
    %7 = arith.divf %5, %6 : vector<128x1xf32>
    %8 = vector.broadcast %7 : vector<128x1xf32> to vector<128x128xf32>
    %9 = arith.subf %1, %8 : vector<128x128xf32>
    %10 = arith.mulf %9, %9 : vector<128x128xf32>
    %cst_7 = arith.constant dense<0.000000e+00> : vector<128xf32>
    %11 = vector.multi_reduction <add>, %10, %cst_7 [1] : vector<128x128xf32> to vector<128xf32>
    %12 = vector.shape_cast %11 : vector<128xf32> to vector<128x1xf32>
    %cst_8 = arith.constant 1.280000e+02 : f32
    %13 = vector.broadcast %cst_8 : f32 to vector<128x1xf32>
    %14 = arith.divf %12, %13 : vector<128x1xf32>
    %15 = vector.broadcast %7 : vector<128x1xf32> to vector<128x128xf32>
    %16 = arith.subf %1, %15 : vector<128x128xf32>
    %cst_9 = arith.constant 9.99999974E-6 : f32
    %17 = vector.broadcast %cst_9 : f32 to vector<128x1xf32>
    %18 = arith.addf %14, %17 : vector<128x1xf32>
    %19 = math.rsqrt %18 : vector<128x1xf32>
    %20 = vector.broadcast %19 : vector<128x1xf32> to vector<128x128xf32>
    %21 = arith.mulf %16, %20 : vector<128x128xf32>
    %22 = vector.broadcast %2 : vector<1x128xf32> to vector<128x128xf32>
    %23 = arith.mulf %21, %22 : vector<128x128xf32>
    %24 = vector.broadcast %3 : vector<1x128xf32> to vector<128x128xf32>
    %25 = arith.addf %23, %24 : vector<128x128xf32>
    %26 = arith.truncf %25 : vector<128x128xf32> to vector<128x128xbf16>
    %c0_10 = arith.constant 0 : index
    %c0_11 = arith.constant 0 : index
    %27 = vector.load %arg4[%c0_10, %c0_11] : memref<128x384xbf16, #tpu.memory_space<vmem>>, vector<128x384xbf16>
    %cst_12 = arith.constant dense<0.000000e+00> : vector<128x384xf32>
    %28 = tpu.matmul %26, %27, %cst_12 {dimension_numbers = #tpu.dot_dimension_numbers<[1], [0], [0], [1], [0, 0, 1, 1], [], []>} : vector<128x128xbf16>, vector<128x384xbf16>, vector<128x384xf32> -> vector<128x384xf32>
    %c0_13 = arith.constant 0 : index
    %c0_14 = arith.constant 0 : index
    %29 = vector.load %arg5[%c0_13, %c0_14] : memref<1x384xf32, #tpu.memory_space<vmem>>, vector<1x384xf32>
    %30 = vector.broadcast %29 : vector<1x384xf32> to vector<128x384xf32>
    %31 = arith.addf %28, %30 : vector<128x384xf32>
    %32 = vector.extract_strided_slice %31 {offsets = [0, 0], sizes = [128, 128], strides = [1, 1]} : vector<128x384xf32> to vector<128x128xf32>
    %33 = arith.truncf %32 : vector<128x128xf32> to vector<128x128xbf16>
    %34 = vector.extract_strided_slice %31 {offsets = [0, 128], sizes = [128, 128], strides = [1, 1]} : vector<128x384xf32> to vector<128x128xf32>
    %35 = vector.extract_strided_slice %31 {offsets = [0, 256], sizes = [128, 128], strides = [1, 1]} : vector<128x384xf32> to vector<128x128xf32>
    %36 = arith.truncf %35 : vector<128x128xf32> to vector<128x128xbf16>
    %37 = tpu.transpose %34, [1, 0] : vector<128x128xf32> -> vector<128x128xf32>
    %38 = arith.truncf %37 : vector<128x128xf32> to vector<128x128xbf16>
    %39 = tpu.iota {dimensions = array<i32: 0>} : vector<128x128xi32>
    %40 = tpu.iota {dimensions = array<i32: 1>} : vector<128x128xi32>
    %41 = arith.subi %39, %40 : vector<128x128xi32>
    %c15_i32 = arith.constant 15 : i32
    %42 = vector.broadcast %c15_i32 : i32 to vector<128x128xi32>
    %43 = arith.andi %41, %42 : vector<128x128xi32>
    %c0_i32 = arith.constant 0 : i32
    %44 = vector.broadcast %c0_i32 : i32 to vector<128x128xi32>
    %45 = arith.cmpi eq, %43, %44 : vector<128x128xi32>
    %cst_15 = arith.constant 0.000000e+00 : f32
    %cst_16 = arith.constant -1.000000e+30 : f32
    %46 = vector.broadcast %cst_15 : f32 to vector<128x128xf32>
    %47 = vector.broadcast %cst_16 : f32 to vector<128x128xf32>
    %48 = arith.select %45, %46, %47 : vector<128x128xi1>, vector<128x128xf32>
    %c0_17 = arith.constant 0 : index
    %c0_18 = arith.constant 0 : index
    %49 = vector.load %arg6[%c0_17, %c0_18] : memref<128x128xbf16, #tpu.memory_space<vmem>>, vector<128x128xbf16>
    %cst_19 = arith.constant 0.000000e+00 : f32
    %50 = vector.broadcast %cst_19 : f32 to vector<128x128xf32>
    %51 = vector.extract_strided_slice %33 {offsets = [0, 0], sizes = [128, 16], strides = [1, 1]} : vector<128x128xbf16> to vector<128x16xbf16>
    %52 = vector.extract_strided_slice %38 {offsets = [0, 0], sizes = [16, 128], strides = [1, 1]} : vector<128x128xbf16> to vector<16x128xbf16>
    %53 = vector.extract_strided_slice %36 {offsets = [0, 0], sizes = [128, 16], strides = [1, 1]} : vector<128x128xbf16> to vector<128x16xbf16>
    %cst_20 = arith.constant dense<0.000000e+00> : vector<128x128xf32>
    %54 = tpu.matmul %51, %52, %cst_20 {dimension_numbers = #tpu.dot_dimension_numbers<[1], [0], [0], [1], [0, 0, 1, 1], [], []>} : vector<128x16xbf16>, vector<16x128xbf16>, vector<128x128xf32> -> vector<128x128xf32>
    %55 = arith.addf %54, %48 : vector<128x128xf32>
    %cst_21 = arith.constant dense<0xFF800000> : vector<128xf32>
    %56 = vector.multi_reduction <maximumf>, %55, %cst_21 [1] : vector<128x128xf32> to vector<128xf32>
    %57 = vector.shape_cast %56 : vector<128xf32> to vector<128x1xf32>
    %58 = vector.broadcast %57 : vector<128x1xf32> to vector<128x128xf32>
    %59 = arith.subf %55, %58 : vector<128x128xf32>
    %60 = math.exp %59 : vector<128x128xf32>
    %cst_22 = arith.constant dense<0.000000e+00> : vector<128xf32>
    %61 = vector.multi_reduction <add>, %60, %cst_22 [1] : vector<128x128xf32> to vector<128xf32>
    %62 = vector.shape_cast %61 : vector<128xf32> to vector<128x1xf32>
    %63 = tpu.reciprocal %62 {approx = true} : vector<128x1xf32> -> vector<128x1xf32>
    %64 = vector.broadcast %63 : vector<128x1xf32> to vector<128x128xf32>
    %65 = arith.mulf %60, %64 : vector<128x128xf32>
    %66 = arith.truncf %65 : vector<128x128xf32> to vector<128x128xbf16>
    %cst_23 = arith.constant dense<0.000000e+00> : vector<128x16xf32>
    %67 = tpu.matmul %66, %53, %cst_23 {dimension_numbers = #tpu.dot_dimension_numbers<[1], [0], [0], [1], [0, 0, 1, 1], [], []>} : vector<128x128xbf16>, vector<128x16xbf16>, vector<128x16xf32> -> vector<128x16xf32>
    %68 = arith.truncf %67 : vector<128x16xf32> to vector<128x16xbf16>
    %69 = vector.extract_strided_slice %49 {offsets = [0, 0], sizes = [16, 128], strides = [1, 1]} : vector<128x128xbf16> to vector<16x128xbf16>
    %cst_24 = arith.constant dense<0.000000e+00> : vector<128x128xf32>
    %70 = tpu.matmul %68, %69, %cst_24 {dimension_numbers = #tpu.dot_dimension_numbers<[1], [0], [0], [1], [0, 0, 1, 1], [], []>} : vector<128x16xbf16>, vector<16x128xbf16>, vector<128x128xf32> -> vector<128x128xf32>
    %71 = arith.addf %50, %70 : vector<128x128xf32>
    %72 = vector.extract_strided_slice %33 {offsets = [0, 16], sizes = [128, 16], strides = [1, 1]} : vector<128x128xbf16> to vector<128x16xbf16>
    %73 = vector.extract_strided_slice %38 {offsets = [16, 0], sizes = [16, 128], strides = [1, 1]} : vector<128x128xbf16> to vector<16x128xbf16>
    %74 = vector.extract_strided_slice %36 {offsets = [0, 16], sizes = [128, 16], strides = [1, 1]} : vector<128x128xbf16> to vector<128x16xbf16>
    %cst_25 = arith.constant dense<0.000000e+00> : vector<128x128xf32>
    %75 = tpu.matmul %72, %73, %cst_25 {dimension_numbers = #tpu.dot_dimension_numbers<[1], [0], [0], [1], [0, 0, 1, 1], [], []>} : vector<128x16xbf16>, vector<16x128xbf16>, vector<128x128xf32> -> vector<128x128xf32>
    %76 = arith.addf %75, %48 : vector<128x128xf32>
    %cst_26 = arith.constant dense<0xFF800000> : vector<128xf32>
    %77 = vector.multi_reduction <maximumf>, %76, %cst_26 [1] : vector<128x128xf32> to vector<128xf32>
    %78 = vector.shape_cast %77 : vector<128xf32> to vector<128x1xf32>
    %79 = vector.broadcast %78 : vector<128x1xf32> to vector<128x128xf32>
    %80 = arith.subf %76, %79 : vector<128x128xf32>
    %81 = math.exp %80 : vector<128x128xf32>
    %cst_27 = arith.constant dense<0.000000e+00> : vector<128xf32>
    %82 = vector.multi_reduction <add>, %81, %cst_27 [1] : vector<128x128xf32> to vector<128xf32>
    %83 = vector.shape_cast %82 : vector<128xf32> to vector<128x1xf32>
    %84 = tpu.reciprocal %83 {approx = true} : vector<128x1xf32> -> vector<128x1xf32>
    %85 = vector.broadcast %84 : vector<128x1xf32> to vector<128x128xf32>
    %86 = arith.mulf %81, %85 : vector<128x128xf32>
    %87 = arith.truncf %86 : vector<128x128xf32> to vector<128x128xbf16>
    %cst_28 = arith.constant dense<0.000000e+00> : vector<128x16xf32>
    %88 = tpu.matmul %87, %74, %cst_28 {dimension_numbers = #tpu.dot_dimension_numbers<[1], [0], [0], [1], [0, 0, 1, 1], [], []>} : vector<128x128xbf16>, vector<128x16xbf16>, vector<128x16xf32> -> vector<128x16xf32>
    %89 = arith.truncf %88 : vector<128x16xf32> to vector<128x16xbf16>
    %90 = vector.extract_strided_slice %49 {offsets = [16, 0], sizes = [16, 128], strides = [1, 1]} : vector<128x128xbf16> to vector<16x128xbf16>
    %cst_29 = arith.constant dense<0.000000e+00> : vector<128x128xf32>
    %91 = tpu.matmul %89, %90, %cst_29 {dimension_numbers = #tpu.dot_dimension_numbers<[1], [0], [0], [1], [0, 0, 1, 1], [], []>} : vector<128x16xbf16>, vector<16x128xbf16>, vector<128x128xf32> -> vector<128x128xf32>
    %92 = arith.addf %71, %91 : vector<128x128xf32>
    %93 = vector.extract_strided_slice %33 {offsets = [0, 32], sizes = [128, 16], strides = [1, 1]} : vector<128x128xbf16> to vector<128x16xbf16>
    %94 = vector.extract_strided_slice %38 {offsets = [32, 0], sizes = [16, 128], strides = [1, 1]} : vector<128x128xbf16> to vector<16x128xbf16>
    %95 = vector.extract_strided_slice %36 {offsets = [0, 32], sizes = [128, 16], strides = [1, 1]} : vector<128x128xbf16> to vector<128x16xbf16>
    %cst_30 = arith.constant dense<0.000000e+00> : vector<128x128xf32>
    %96 = tpu.matmul %93, %94, %cst_30 {dimension_numbers = #tpu.dot_dimension_numbers<[1], [0], [0], [1], [0, 0, 1, 1], [], []>} : vector<128x16xbf16>, vector<16x128xbf16>, vector<128x128xf32> -> vector<128x128xf32>
    %97 = arith.addf %96, %48 : vector<128x128xf32>
    %cst_31 = arith.constant dense<0xFF800000> : vector<128xf32>
    %98 = vector.multi_reduction <maximumf>, %97, %cst_31 [1] : vector<128x128xf32> to vector<128xf32>
    %99 = vector.shape_cast %98 : vector<128xf32> to vector<128x1xf32>
    %100 = vector.broadcast %99 : vector<128x1xf32> to vector<128x128xf32>
    %101 = arith.subf %97, %100 : vector<128x128xf32>
    %102 = math.exp %101 : vector<128x128xf32>
    %cst_32 = arith.constant dense<0.000000e+00> : vector<128xf32>
    %103 = vector.multi_reduction <add>, %102, %cst_32 [1] : vector<128x128xf32> to vector<128xf32>
    %104 = vector.shape_cast %103 : vector<128xf32> to vector<128x1xf32>
    %105 = tpu.reciprocal %104 {approx = true} : vector<128x1xf32> -> vector<128x1xf32>
    %106 = vector.broadcast %105 : vector<128x1xf32> to vector<128x128xf32>
    %107 = arith.mulf %102, %106 : vector<128x128xf32>
    %108 = arith.truncf %107 : vector<128x128xf32> to vector<128x128xbf16>
    %cst_33 = arith.constant dense<0.000000e+00> : vector<128x16xf32>
    %109 = tpu.matmul %108, %95, %cst_33 {dimension_numbers = #tpu.dot_dimension_numbers<[1], [0], [0], [1], [0, 0, 1, 1], [], []>} : vector<128x128xbf16>, vector<128x16xbf16>, vector<128x16xf32> -> vector<128x16xf32>
    %110 = arith.truncf %109 : vector<128x16xf32> to vector<128x16xbf16>
    %111 = vector.extract_strided_slice %49 {offsets = [32, 0], sizes = [16, 128], strides = [1, 1]} : vector<128x128xbf16> to vector<16x128xbf16>
    %cst_34 = arith.constant dense<0.000000e+00> : vector<128x128xf32>
    %112 = tpu.matmul %110, %111, %cst_34 {dimension_numbers = #tpu.dot_dimension_numbers<[1], [0], [0], [1], [0, 0, 1, 1], [], []>} : vector<128x16xbf16>, vector<16x128xbf16>, vector<128x128xf32> -> vector<128x128xf32>
    %113 = arith.addf %92, %112 : vector<128x128xf32>
    %114 = vector.extract_strided_slice %33 {offsets = [0, 48], sizes = [128, 16], strides = [1, 1]} : vector<128x128xbf16> to vector<128x16xbf16>
    %115 = vector.extract_strided_slice %38 {offsets = [48, 0], sizes = [16, 128], strides = [1, 1]} : vector<128x128xbf16> to vector<16x128xbf16>
    %116 = vector.extract_strided_slice %36 {offsets = [0, 48], sizes = [128, 16], strides = [1, 1]} : vector<128x128xbf16> to vector<128x16xbf16>
    %cst_35 = arith.constant dense<0.000000e+00> : vector<128x128xf32>
    %117 = tpu.matmul %114, %115, %cst_35 {dimension_numbers = #tpu.dot_dimension_numbers<[1], [0], [0], [1], [0, 0, 1, 1], [], []>} : vector<128x16xbf16>, vector<16x128xbf16>, vector<128x128xf32> -> vector<128x128xf32>
    %118 = arith.addf %117, %48 : vector<128x128xf32>
    %cst_36 = arith.constant dense<0xFF800000> : vector<128xf32>
    %119 = vector.multi_reduction <maximumf>, %118, %cst_36 [1] : vector<128x128xf32> to vector<128xf32>
    %120 = vector.shape_cast %119 : vector<128xf32> to vector<128x1xf32>
    %121 = vector.broadcast %120 : vector<128x1xf32> to vector<128x128xf32>
    %122 = arith.subf %118, %121 : vector<128x128xf32>
    %123 = math.exp %122 : vector<128x128xf32>
    %cst_37 = arith.constant dense<0.000000e+00> : vector<128xf32>
    %124 = vector.multi_reduction <add>, %123, %cst_37 [1] : vector<128x128xf32> to vector<128xf32>
    %125 = vector.shape_cast %124 : vector<128xf32> to vector<128x1xf32>
    %126 = tpu.reciprocal %125 {approx = true} : vector<128x1xf32> -> vector<128x1xf32>
    %127 = vector.broadcast %126 : vector<128x1xf32> to vector<128x128xf32>
    %128 = arith.mulf %123, %127 : vector<128x128xf32>
    %129 = arith.truncf %128 : vector<128x128xf32> to vector<128x128xbf16>
    %cst_38 = arith.constant dense<0.000000e+00> : vector<128x16xf32>
    %130 = tpu.matmul %129, %116, %cst_38 {dimension_numbers = #tpu.dot_dimension_numbers<[1], [0], [0], [1], [0, 0, 1, 1], [], []>} : vector<128x128xbf16>, vector<128x16xbf16>, vector<128x16xf32> -> vector<128x16xf32>
    %131 = arith.truncf %130 : vector<128x16xf32> to vector<128x16xbf16>
    %132 = vector.extract_strided_slice %49 {offsets = [48, 0], sizes = [16, 128], strides = [1, 1]} : vector<128x128xbf16> to vector<16x128xbf16>
    %cst_39 = arith.constant dense<0.000000e+00> : vector<128x128xf32>
    %133 = tpu.matmul %131, %132, %cst_39 {dimension_numbers = #tpu.dot_dimension_numbers<[1], [0], [0], [1], [0, 0, 1, 1], [], []>} : vector<128x16xbf16>, vector<16x128xbf16>, vector<128x128xf32> -> vector<128x128xf32>
    %134 = arith.addf %113, %133 : vector<128x128xf32>
    %135 = vector.extract_strided_slice %33 {offsets = [0, 64], sizes = [128, 16], strides = [1, 1]} : vector<128x128xbf16> to vector<128x16xbf16>
    %136 = vector.extract_strided_slice %38 {offsets = [64, 0], sizes = [16, 128], strides = [1, 1]} : vector<128x128xbf16> to vector<16x128xbf16>
    %137 = vector.extract_strided_slice %36 {offsets = [0, 64], sizes = [128, 16], strides = [1, 1]} : vector<128x128xbf16> to vector<128x16xbf16>
    %cst_40 = arith.constant dense<0.000000e+00> : vector<128x128xf32>
    %138 = tpu.matmul %135, %136, %cst_40 {dimension_numbers = #tpu.dot_dimension_numbers<[1], [0], [0], [1], [0, 0, 1, 1], [], []>} : vector<128x16xbf16>, vector<16x128xbf16>, vector<128x128xf32> -> vector<128x128xf32>
    %139 = arith.addf %138, %48 : vector<128x128xf32>
    %cst_41 = arith.constant dense<0xFF800000> : vector<128xf32>
    %140 = vector.multi_reduction <maximumf>, %139, %cst_41 [1] : vector<128x128xf32> to vector<128xf32>
    %141 = vector.shape_cast %140 : vector<128xf32> to vector<128x1xf32>
    %142 = vector.broadcast %141 : vector<128x1xf32> to vector<128x128xf32>
    %143 = arith.subf %139, %142 : vector<128x128xf32>
    %144 = math.exp %143 : vector<128x128xf32>
    %cst_42 = arith.constant dense<0.000000e+00> : vector<128xf32>
    %145 = vector.multi_reduction <add>, %144, %cst_42 [1] : vector<128x128xf32> to vector<128xf32>
    %146 = vector.shape_cast %145 : vector<128xf32> to vector<128x1xf32>
    %147 = tpu.reciprocal %146 {approx = true} : vector<128x1xf32> -> vector<128x1xf32>
    %148 = vector.broadcast %147 : vector<128x1xf32> to vector<128x128xf32>
    %149 = arith.mulf %144, %148 : vector<128x128xf32>
    %150 = arith.truncf %149 : vector<128x128xf32> to vector<128x128xbf16>
    %cst_43 = arith.constant dense<0.000000e+00> : vector<128x16xf32>
    %151 = tpu.matmul %150, %137, %cst_43 {dimension_numbers = #tpu.dot_dimension_numbers<[1], [0], [0], [1], [0, 0, 1, 1], [], []>} : vector<128x128xbf16>, vector<128x16xbf16>, vector<128x16xf32> -> vector<128x16xf32>
    %152 = arith.truncf %151 : vector<128x16xf32> to vector<128x16xbf16>
    %153 = vector.extract_strided_slice %49 {offsets = [64, 0], sizes = [16, 128], strides = [1, 1]} : vector<128x128xbf16> to vector<16x128xbf16>
    %cst_44 = arith.constant dense<0.000000e+00> : vector<128x128xf32>
    %154 = tpu.matmul %152, %153, %cst_44 {dimension_numbers = #tpu.dot_dimension_numbers<[1], [0], [0], [1], [0, 0, 1, 1], [], []>} : vector<128x16xbf16>, vector<16x128xbf16>, vector<128x128xf32> -> vector<128x128xf32>
    %155 = arith.addf %134, %154 : vector<128x128xf32>
    %156 = vector.extract_strided_slice %33 {offsets = [0, 80], sizes = [128, 16], strides = [1, 1]} : vector<128x128xbf16> to vector<128x16xbf16>
    %157 = vector.extract_strided_slice %38 {offsets = [80, 0], sizes = [16, 128], strides = [1, 1]} : vector<128x128xbf16> to vector<16x128xbf16>
    %158 = vector.extract_strided_slice %36 {offsets = [0, 80], sizes = [128, 16], strides = [1, 1]} : vector<128x128xbf16> to vector<128x16xbf16>
    %cst_45 = arith.constant dense<0.000000e+00> : vector<128x128xf32>
    %159 = tpu.matmul %156, %157, %cst_45 {dimension_numbers = #tpu.dot_dimension_numbers<[1], [0], [0], [1], [0, 0, 1, 1], [], []>} : vector<128x16xbf16>, vector<16x128xbf16>, vector<128x128xf32> -> vector<128x128xf32>
    %160 = arith.addf %159, %48 : vector<128x128xf32>
    %cst_46 = arith.constant dense<0xFF800000> : vector<128xf32>
    %161 = vector.multi_reduction <maximumf>, %160, %cst_46 [1] : vector<128x128xf32> to vector<128xf32>
    %162 = vector.shape_cast %161 : vector<128xf32> to vector<128x1xf32>
    %163 = vector.broadcast %162 : vector<128x1xf32> to vector<128x128xf32>
    %164 = arith.subf %160, %163 : vector<128x128xf32>
    %165 = math.exp %164 : vector<128x128xf32>
    %cst_47 = arith.constant dense<0.000000e+00> : vector<128xf32>
    %166 = vector.multi_reduction <add>, %165, %cst_47 [1] : vector<128x128xf32> to vector<128xf32>
    %167 = vector.shape_cast %166 : vector<128xf32> to vector<128x1xf32>
    %168 = tpu.reciprocal %167 {approx = true} : vector<128x1xf32> -> vector<128x1xf32>
    %169 = vector.broadcast %168 : vector<128x1xf32> to vector<128x128xf32>
    %170 = arith.mulf %165, %169 : vector<128x128xf32>
    %171 = arith.truncf %170 : vector<128x128xf32> to vector<128x128xbf16>
    %cst_48 = arith.constant dense<0.000000e+00> : vector<128x16xf32>
    %172 = tpu.matmul %171, %158, %cst_48 {dimension_numbers = #tpu.dot_dimension_numbers<[1], [0], [0], [1], [0, 0, 1, 1], [], []>} : vector<128x128xbf16>, vector<128x16xbf16>, vector<128x16xf32> -> vector<128x16xf32>
    %173 = arith.truncf %172 : vector<128x16xf32> to vector<128x16xbf16>
    %174 = vector.extract_strided_slice %49 {offsets = [80, 0], sizes = [16, 128], strides = [1, 1]} : vector<128x128xbf16> to vector<16x128xbf16>
    %cst_49 = arith.constant dense<0.000000e+00> : vector<128x128xf32>
    %175 = tpu.matmul %173, %174, %cst_49 {dimension_numbers = #tpu.dot_dimension_numbers<[1], [0], [0], [1], [0, 0, 1, 1], [], []>} : vector<128x16xbf16>, vector<16x128xbf16>, vector<128x128xf32> -> vector<128x128xf32>
    %176 = arith.addf %155, %175 : vector<128x128xf32>
    %177 = vector.extract_strided_slice %33 {offsets = [0, 96], sizes = [128, 16], strides = [1, 1]} : vector<128x128xbf16> to vector<128x16xbf16>
    %178 = vector.extract_strided_slice %38 {offsets = [96, 0], sizes = [16, 128], strides = [1, 1]} : vector<128x128xbf16> to vector<16x128xbf16>
    %179 = vector.extract_strided_slice %36 {offsets = [0, 96], sizes = [128, 16], strides = [1, 1]} : vector<128x128xbf16> to vector<128x16xbf16>
    %cst_50 = arith.constant dense<0.000000e+00> : vector<128x128xf32>
    %180 = tpu.matmul %177, %178, %cst_50 {dimension_numbers = #tpu.dot_dimension_numbers<[1], [0], [0], [1], [0, 0, 1, 1], [], []>} : vector<128x16xbf16>, vector<16x128xbf16>, vector<128x128xf32> -> vector<128x128xf32>
    %181 = arith.addf %180, %48 : vector<128x128xf32>
    %cst_51 = arith.constant dense<0xFF800000> : vector<128xf32>
    %182 = vector.multi_reduction <maximumf>, %181, %cst_51 [1] : vector<128x128xf32> to vector<128xf32>
    %183 = vector.shape_cast %182 : vector<128xf32> to vector<128x1xf32>
    %184 = vector.broadcast %183 : vector<128x1xf32> to vector<128x128xf32>
    %185 = arith.subf %181, %184 : vector<128x128xf32>
    %186 = math.exp %185 : vector<128x128xf32>
    %cst_52 = arith.constant dense<0.000000e+00> : vector<128xf32>
    %187 = vector.multi_reduction <add>, %186, %cst_52 [1] : vector<128x128xf32> to vector<128xf32>
    %188 = vector.shape_cast %187 : vector<128xf32> to vector<128x1xf32>
    %189 = tpu.reciprocal %188 {approx = true} : vector<128x1xf32> -> vector<128x1xf32>
    %190 = vector.broadcast %189 : vector<128x1xf32> to vector<128x128xf32>
    %191 = arith.mulf %186, %190 : vector<128x128xf32>
    %192 = arith.truncf %191 : vector<128x128xf32> to vector<128x128xbf16>
    %cst_53 = arith.constant dense<0.000000e+00> : vector<128x16xf32>
    %193 = tpu.matmul %192, %179, %cst_53 {dimension_numbers = #tpu.dot_dimension_numbers<[1], [0], [0], [1], [0, 0, 1, 1], [], []>} : vector<128x128xbf16>, vector<128x16xbf16>, vector<128x16xf32> -> vector<128x16xf32>
    %194 = arith.truncf %193 : vector<128x16xf32> to vector<128x16xbf16>
    %195 = vector.extract_strided_slice %49 {offsets = [96, 0], sizes = [16, 128], strides = [1, 1]} : vector<128x128xbf16> to vector<16x128xbf16>
    %cst_54 = arith.constant dense<0.000000e+00> : vector<128x128xf32>
    %196 = tpu.matmul %194, %195, %cst_54 {dimension_numbers = #tpu.dot_dimension_numbers<[1], [0], [0], [1], [0, 0, 1, 1], [], []>} : vector<128x16xbf16>, vector<16x128xbf16>, vector<128x128xf32> -> vector<128x128xf32>
    %197 = arith.addf %176, %196 : vector<128x128xf32>
    %198 = vector.extract_strided_slice %33 {offsets = [0, 112], sizes = [128, 16], strides = [1, 1]} : vector<128x128xbf16> to vector<128x16xbf16>
    %199 = vector.extract_strided_slice %38 {offsets = [112, 0], sizes = [16, 128], strides = [1, 1]} : vector<128x128xbf16> to vector<16x128xbf16>
    %200 = vector.extract_strided_slice %36 {offsets = [0, 112], sizes = [128, 16], strides = [1, 1]} : vector<128x128xbf16> to vector<128x16xbf16>
    %cst_55 = arith.constant dense<0.000000e+00> : vector<128x128xf32>
    %201 = tpu.matmul %198, %199, %cst_55 {dimension_numbers = #tpu.dot_dimension_numbers<[1], [0], [0], [1], [0, 0, 1, 1], [], []>} : vector<128x16xbf16>, vector<16x128xbf16>, vector<128x128xf32> -> vector<128x128xf32>
    %202 = arith.addf %201, %48 : vector<128x128xf32>
    %cst_56 = arith.constant dense<0xFF800000> : vector<128xf32>
    %203 = vector.multi_reduction <maximumf>, %202, %cst_56 [1] : vector<128x128xf32> to vector<128xf32>
    %204 = vector.shape_cast %203 : vector<128xf32> to vector<128x1xf32>
    %205 = vector.broadcast %204 : vector<128x1xf32> to vector<128x128xf32>
    %206 = arith.subf %202, %205 : vector<128x128xf32>
    %207 = math.exp %206 : vector<128x128xf32>
    %cst_57 = arith.constant dense<0.000000e+00> : vector<128xf32>
    %208 = vector.multi_reduction <add>, %207, %cst_57 [1] : vector<128x128xf32> to vector<128xf32>
    %209 = vector.shape_cast %208 : vector<128xf32> to vector<128x1xf32>
    %210 = tpu.reciprocal %209 {approx = true} : vector<128x1xf32> -> vector<128x1xf32>
    %211 = vector.broadcast %210 : vector<128x1xf32> to vector<128x128xf32>
    %212 = arith.mulf %207, %211 : vector<128x128xf32>
    %213 = arith.truncf %212 : vector<128x128xf32> to vector<128x128xbf16>
    %cst_58 = arith.constant dense<0.000000e+00> : vector<128x16xf32>
    %214 = tpu.matmul %213, %200, %cst_58 {dimension_numbers = #tpu.dot_dimension_numbers<[1], [0], [0], [1], [0, 0, 1, 1], [], []>} : vector<128x128xbf16>, vector<128x16xbf16>, vector<128x16xf32> -> vector<128x16xf32>
    %215 = arith.truncf %214 : vector<128x16xf32> to vector<128x16xbf16>
    %216 = vector.extract_strided_slice %49 {offsets = [112, 0], sizes = [16, 128], strides = [1, 1]} : vector<128x128xbf16> to vector<16x128xbf16>
    %cst_59 = arith.constant dense<0.000000e+00> : vector<128x128xf32>
    %217 = tpu.matmul %215, %216, %cst_59 {dimension_numbers = #tpu.dot_dimension_numbers<[1], [0], [0], [1], [0, 0, 1, 1], [], []>} : vector<128x16xbf16>, vector<16x128xbf16>, vector<128x128xf32> -> vector<128x128xf32>
    %218 = arith.addf %197, %217 : vector<128x128xf32>
    %c0_60 = arith.constant 0 : index
    %c0_61 = arith.constant 0 : index
    %219 = vector.load %arg7[%c0_60, %c0_61] : memref<1x128xf32, #tpu.memory_space<vmem>>, vector<1x128xf32>
    %220 = vector.broadcast %219 : vector<1x128xf32> to vector<128x128xf32>
    %221 = arith.addf %218, %220 : vector<128x128xf32>
    %222 = arith.addf %221, %1 : vector<128x128xf32>
    %c0_62 = arith.constant 0 : index
    %c0_63 = arith.constant 0 : index
    %223 = vector.load %arg8[%c0_62, %c0_63] : memref<1x128xf32, #tpu.memory_space<vmem>>, vector<1x128xf32>
    %c0_64 = arith.constant 0 : index
    %c0_65 = arith.constant 0 : index
    %224 = vector.load %arg9[%c0_64, %c0_65] : memref<1x128xf32, #tpu.memory_space<vmem>>, vector<1x128xf32>
    %cst_66 = arith.constant dense<0.000000e+00> : vector<128xf32>
    %225 = vector.multi_reduction <add>, %222, %cst_66 [1] : vector<128x128xf32> to vector<128xf32>
    %226 = vector.shape_cast %225 : vector<128xf32> to vector<128x1xf32>
    %cst_67 = arith.constant 1.280000e+02 : f32
    %227 = vector.broadcast %cst_67 : f32 to vector<128x1xf32>
    %228 = arith.divf %226, %227 : vector<128x1xf32>
    %229 = vector.broadcast %228 : vector<128x1xf32> to vector<128x128xf32>
    %230 = arith.subf %222, %229 : vector<128x128xf32>
    %231 = arith.mulf %230, %230 : vector<128x128xf32>
    %cst_68 = arith.constant dense<0.000000e+00> : vector<128xf32>
    %232 = vector.multi_reduction <add>, %231, %cst_68 [1] : vector<128x128xf32> to vector<128xf32>
    %233 = vector.shape_cast %232 : vector<128xf32> to vector<128x1xf32>
    %cst_69 = arith.constant 1.280000e+02 : f32
    %234 = vector.broadcast %cst_69 : f32 to vector<128x1xf32>
    %235 = arith.divf %233, %234 : vector<128x1xf32>
    %236 = vector.broadcast %228 : vector<128x1xf32> to vector<128x128xf32>
    %237 = arith.subf %222, %236 : vector<128x128xf32>
    %cst_70 = arith.constant 9.99999974E-6 : f32
    %238 = vector.broadcast %cst_70 : f32 to vector<128x1xf32>
    %239 = arith.addf %235, %238 : vector<128x1xf32>
    %240 = math.rsqrt %239 : vector<128x1xf32>
    %241 = vector.broadcast %240 : vector<128x1xf32> to vector<128x128xf32>
    %242 = arith.mulf %237, %241 : vector<128x128xf32>
    %243 = vector.broadcast %223 : vector<1x128xf32> to vector<128x128xf32>
    %244 = arith.mulf %242, %243 : vector<128x128xf32>
    %245 = vector.broadcast %224 : vector<1x128xf32> to vector<128x128xf32>
    %246 = arith.addf %244, %245 : vector<128x128xf32>
    %247 = arith.truncf %246 : vector<128x128xf32> to vector<128x128xbf16>
    %c0_71 = arith.constant 0 : index
    %c0_72 = arith.constant 0 : index
    %248 = vector.load %arg10[%c0_71, %c0_72] : memref<128x128xbf16, #tpu.memory_space<vmem>>, vector<128x128xbf16>
    %cst_73 = arith.constant dense<0.000000e+00> : vector<128x128xf32>
    %249 = tpu.matmul %247, %248, %cst_73 {dimension_numbers = #tpu.dot_dimension_numbers<[1], [0], [0], [1], [0, 0, 1, 1], [], []>} : vector<128x128xbf16>, vector<128x128xbf16>, vector<128x128xf32> -> vector<128x128xf32>
    %c0_74 = arith.constant 0 : index
    %c0_75 = arith.constant 0 : index
    %250 = vector.load %arg11[%c0_74, %c0_75] : memref<1x128xf32, #tpu.memory_space<vmem>>, vector<1x128xf32>
    %251 = vector.broadcast %250 : vector<1x128xf32> to vector<128x128xf32>
    %252 = arith.addf %249, %251 : vector<128x128xf32>
    %253 = arith.addf %252, %222 : vector<128x128xf32>
    %254 = vector.shape_cast %253 : vector<128x128xf32> to vector<8x16x128xf32>
    %c0_76 = arith.constant 0 : index
    %c0_77 = arith.constant 0 : index
    %c0_78 = arith.constant 0 : index
    %255 = vector.load %arg12[%c0_76, %c0_77, %c0_78] : memref<8x16x128xf32, #tpu.memory_space<vmem>>, vector<8x16x128xf32>
    tpu.vector_store %arg12[%c0_76, %c0_77, %c0_78], %254 {strides = array<i32>} : memref<8x16x128xf32, #tpu.memory_space<vmem>>, vector<8x16x128xf32>,
    return
  }
  func.func @transform_0(%arg0: i32) -> (i32, i32, i32) {
    %c0_i32 = arith.constant 0 : i32
    %c0_i32_0 = arith.constant 0 : i32
    %c0_i32_1 = arith.constant 0 : i32
    return %c0_i32, %arg0, %c0_i32_0 : i32, i32, i32
  }
  func.func @transform_1(%arg0: i32) -> (i32, i32) {
    %c0_i32 = arith.constant 0 : i32
    %c0_i32_0 = arith.constant 0 : i32
    %c0_i32_1 = arith.constant 0 : i32
    return %c0_i32, %c0_i32_0 : i32, i32
  }
  func.func @transform_2(%arg0: i32) -> (i32, i32) {
    %c0_i32 = arith.constant 0 : i32
    %c0_i32_0 = arith.constant 0 : i32
    %c0_i32_1 = arith.constant 0 : i32
    return %c0_i32, %c0_i32_0 : i32, i32
  }
  func.func @transform_3(%arg0: i32) -> (i32, i32) {
    %c0_i32 = arith.constant 0 : i32
    %c0_i32_0 = arith.constant 0 : i32
    %c0_i32_1 = arith.constant 0 : i32
    return %c0_i32, %c0_i32_0 : i32, i32
  }
  func.func @transform_4(%arg0: i32) -> (i32, i32) {
    %c0_i32 = arith.constant 0 : i32
    %c0_i32_0 = arith.constant 0 : i32
    %c0_i32_1 = arith.constant 0 : i32
    return %c0_i32, %c0_i32_0 : i32, i32
  }
  func.func @transform_5(%arg0: i32) -> (i32, i32) {
    %c0_i32 = arith.constant 0 : i32
    %c0_i32_0 = arith.constant 0 : i32
    %c0_i32_1 = arith.constant 0 : i32
    return %c0_i32, %c0_i32_0 : i32, i32
  }
  func.func @transform_6(%arg0: i32) -> (i32, i32) {
    %c0_i32 = arith.constant 0 : i32
    %c0_i32_0 = arith.constant 0 : i32
    %c0_i32_1 = arith.constant 0 : i32
    return %c0_i32, %c0_i32_0 : i32, i32
  }
  func.func @transform_7(%arg0: i32) -> (i32, i32) {
    %c0_i32 = arith.constant 0 : i32
    %c0_i32_0 = arith.constant 0 : i32
    %c0_i32_1 = arith.constant 0 : i32
    return %c0_i32, %c0_i32_0 : i32, i32
  }
  func.func @transform_8(%arg0: i32) -> (i32, i32) {
    %c0_i32 = arith.constant 0 : i32
    %c0_i32_0 = arith.constant 0 : i32
    %c0_i32_1 = arith.constant 0 : i32
    return %c0_i32, %c0_i32_0 : i32, i32
  }
  func.func @transform_9(%arg0: i32) -> (i32, i32) {
    %c0_i32 = arith.constant 0 : i32
    %c0_i32_0 = arith.constant 0 : i32
    %c0_i32_1 = arith.constant 0 : i32
    return %c0_i32, %c0_i32_0 : i32, i32
  }
  func.func @transform_10(%arg0: i32) -> (i32, i32) {
    %c0_i32 = arith.constant 0 : i32
    %c0_i32_0 = arith.constant 0 : i32
    %c0_i32_1 = arith.constant 0 : i32
    return %c0_i32, %c0_i32_0 : i32, i32
  }
  func.func @transform_11(%arg0: i32) -> (i32, i32, i32) {
    %c0_i32 = arith.constant 0 : i32
    %c0_i32_0 = arith.constant 0 : i32
    %c0_i32_1 = arith.constant 0 : i32
    return %c0_i32, %arg0, %c0_i32_0 : i32, i32, i32
  }
}

</mosaic_0001>

<bundles_post_ra>
// kernel: tpu_custom_call.1
= control target key start
LH: loop header
LB: loop body
LE: loop exit
PB: predicated region body
PF: predicated region fallthrough
CT: control target
= control target key end

     0   :  { %16 = vsyncpa [#allocation3], 0  ;;  %s10501_s0 = inlined_call_operand.hbm [shape: f32[8,16,128], index: 0, kind: input, shape index: {}]   ;;  %s10502_s1 = inlined_call_operand.vmem [shape: f32[1,128], index: 1, kind: input, shape index: {}]   ;;  %s10503_s2 = inlined_call_operand.vmem [shape: f32[1,128], index: 2, kind: input, shape index: {}]   ;;  %s10504_s3 = inlined_call_operand.hbm [shape: bf16[128,384], index: 3, kind: input, shape index: {}]   ;;  %s10505_s4 = inlined_call_operand.vmem [shape: f32[1,384], index: 4, kind: input, shape index: {}]   ;;  %s10506_s5 = inlined_call_operand.hbm [shape: bf16[128,128], index: 5, kind: input, shape index: {}]   ;;  %s10507_s6 = inlined_call_operand.vmem [shape: f32[1,128], index: 6, kind: input, shape index: {}]   ;;  %s10508_s7 = inlined_call_operand.vmem [shape: f32[1,128], index: 7, kind: input, shape index: {}]   ;;  %s10509_s8 = inlined_call_operand.vmem [shape: f32[1,128], index: 8, kind: input, shape index: {}]   ;;  %s10510_s9 = inlined_call_operand.hbm [shape: bf16[128,128], index: 9, kind: input, shape index: {}]   ;;  %s10511_s10 = inlined_call_operand.vmem [shape: f32[1,128], index: 10, kind: input, shape index: {}]   ;;  %s10512_s11 = inlined_call_operand.hbm [shape: f32[8,16,128], index: 11, kind: output, shape index: {}]  }
   0x1   :  { %17 = vsyncpa [#allocation6], 0 }
   0x2   :  { %18 = vsyncpa [#allocation9], 0 }
   0x3   :  { %19 = vsyncpa [#allocation4], 0  ;;  %s7780_s17 = smov [#allocation5]   ;;  %s7662_s21 = scalar_lea.hbm %s10504_s3, 3072 }
   0x4   :  { %s41_s18 = sshll.u32 %s7780_s17, 4  ;;  %p7663_p0 = scmp.ne.s32.totalorder %s10504_s3, %s7662_s21  ;;  %s42_s18 = int_to_ptr.vmem [resolvable:$true] %s41_s18 }
   0x5   :  { %p7666_p1 = scmp.lt.u32.totalorder %s7662_s21, %s10504_s3 }
   0x7   :  { %p7668_p2 = pnand %p7666_p1, %p7663_p0 }
   0x9   :  { %7671 = shalt.err (!%p7668_p2)
}
   0xa   :  { %s7672_s26 = scalar_lea.vmem %s42_s18, 3072  ;;  %p7677_p4 = scmp.lt.s32.totalorder %s42_s18, %s42_s18 }
   0xb   :  { %p7673_p3 = scmp.ne.s32.totalorder %s42_s18, %s7672_s26  ;;  %p7678_p5 = scmp.lt.s32.totalorder %s7672_s26, %s7672_s26 }
   0xd   :  { %p7679_p6 = por %p7678_p5, %p7677_p4 }
   0xf   :  { %p7680_p7 = pnand %p7679_p6, %p7673_p3 }
  0x11   :  { %7683 = shalt.err (!%p7680_p7)
}
  0x12   :  { %s7781_s27 = smov 192   ;;  %s7782_s28 = smov 12  }
  0x13   :  { %47 = dma.hbm_to_vmem [thread:$0]  %s10504_s3, 3072, %s42_s18, [#allocation6], %s7781_s27, %s7781_s27, %s7782_s28  }
  0x14   :  { %s7783_s12 = smov [#allocation2]   ;;  %s7684_s16 = scalar_lea.hbm %s10501_s0, 2048 }
  0x15   :  { %s25_s13 = sshll.u32 %s7783_s12, 4  ;;  %p7685_p8 = scmp.ne.s32.totalorder %s10501_s0, %s7684_s16  ;;  %s26_s13 = int_to_ptr.vmem [resolvable:$true] %s25_s13 }
  0x16   :  { %p7688_p9 = scmp.lt.u32.totalorder %s7684_s16, %s10501_s0 }
  0x18   :  { %p7690_p10 = pnand %p7688_p9, %p7685_p8 }
  0x1a   :  { %7693 = shalt.err (!%p7690_p10)
}
  0x1b   :  { %s7694_s22 = scalar_lea.vmem %s26_s13, 2048  ;;  %p7699_p12 = scmp.lt.s32.totalorder %s26_s13, %s26_s13 }
  0x1c   :  { %p7695_p11 = scmp.ne.s32.totalorder %s26_s13, %s7694_s22  ;;  %p7700_p13 = scmp.lt.s32.totalorder %s7694_s22, %s7694_s22 }
  0x1e   :  { %p7701_p0 = por %p7700_p13, %p7699_p12 }
  0x20   :  { %p7702_p1 = pnand %p7701_p0, %p7695_p11 }
  0x22   :  { %7705 = shalt.err (!%p7702_p1)
}
  0x23   :  { %s7784_s3 = smov 128   ;;  %s7785_s18 = smov 8  }
  0x24   :  { %31 = dma.hbm_to_vmem [thread:$0]  %s10501_s0, 2048, %s26_s13, [#allocation3], %s7784_s3, %s7784_s3, %s7785_s18  }
  0x25   :  { %s7786_s25 = smov [#allocation7]   ;;  %s7706_s29 = scalar_lea.hbm %s10506_s5, 1024 }
  0x26   :  { %s55_s26 = sshll.u32 %s7786_s25, 4  ;;  %p7707_p2 = scmp.ne.s32.totalorder %s10506_s5, %s7706_s29  ;;  %s56_s26 = int_to_ptr.vmem [resolvable:$true] %s55_s26 }
  0x27   :  { %p7710_p3 = scmp.lt.u32.totalorder %s7706_s29, %s10506_s5 }
  0x29   :  { %p7712_p4 = pnand %p7710_p3, %p7707_p2 }
  0x2b   :  { %7715 = shalt.err (!%p7712_p4)
}
  0x2c   :  { %s7716_s16 = scalar_lea.vmem %s56_s26, 1024  ;;  %p7721_p6 = scmp.lt.s32.totalorder %s56_s26, %s56_s26 }
  0x2d   :  { %p7717_p5 = scmp.ne.s32.totalorder %s56_s26, %s7716_s16  ;;  %p7722_p7 = scmp.lt.s32.totalorder %s7716_s16, %s7716_s16 }
  0x2f   :  { %p7723_p8 = por %p7722_p7, %p7721_p6 }
  0x31   :  { %p7724_p9 = pnand %p7723_p8, %p7717_p5 }
  0x33   :  { %7727 = shalt.err (!%p7724_p9)
}
  0x34   :  { %s7787_s0 = smov 64   ;;  %s7788_s13 = smov 4  }
  0x35   :  { %61 = dma.hbm_to_vmem [thread:$0]  %s10506_s5, 1024, %s56_s26, [#allocation6], %s7787_s0, %s7787_s0, %s7788_s13  }
  0x36   :  { %s7789_s20 = smov [#allocation8]   ;;  %s7728_s24 = scalar_lea.hbm %s10510_s9, 1024 }
  0x37   :  { %s73_s21 = sshll.u32 %s7789_s20, 4  ;;  %p7729_p10 = scmp.ne.s32.totalorder %s10510_s9, %s7728_s24  ;;  %s74_s21 = int_to_ptr.vmem [resolvable:$true] %s73_s21 }
  0x38   :  { %p7732_p11 = scmp.lt.u32.totalorder %s7728_s24, %s10510_s9 }
  0x3a   :  { %p7734_p12 = pnand %p7732_p11, %p7729_p10 }
  0x3c   :  { %7737 = shalt.err (!%p7734_p12)
}
  0x3d   :  { %s7738_s30 = scalar_lea.vmem %s74_s21, 1024  ;;  %p7743_p0 = scmp.lt.s32.totalorder %s74_s21, %s74_s21 }
  0x3e   :  { %p7739_p13 = scmp.ne.s32.totalorder %s74_s21, %s7738_s30  ;;  %p7744_p1 = scmp.lt.s32.totalorder %s7738_s30, %s7738_s30 }
  0x40   :  { %p7745_p2 = por %p7744_p1, %p7743_p0 }
  0x42   :  { %p7746_p3 = pnand %p7745_p2, %p7739_p13 }
  0x44   :  { %7749 = shalt.err (!%p7746_p3)
}
  0x45   :  { %79 = dma.hbm_to_vmem [thread:$0]  %s10510_s9, 1024, %s74_s21, [#allocation9], %s7787_s0, %s7787_s0, %s7788_s13  }
  0x46   :  { %7772 = dma.done.wait [#allocation3], 2048  }
  0x47   :  { %7773 = vsyncadd [#allocation3], 4294965248 }
  0x48   :  { %7774 = dma.done.wait [#allocation6], 4096  }
  0x49   :  { %7775 = vsyncadd [#allocation6], 4294963200 }
  0x4a   :  { %7776 = dma.done.wait [#allocation9], 1024  }
  0x4b   :  { %7777 = vsyncadd [#allocation9], 4294966272  ;;  %v95_v0 = vld [vmem:[#allocation2] sm:$0xff]  ;;  %v97_v1 = vld [vmem:[#allocation2 + $0x10] sm:$0xff]  ;;  %vm884_vm0 = vcmask 130048   ;;  %s7793_s16 = smov 96  }
  0x4c   :  { %113 = vadd.xlane.f32.xlu0 %v95_v0  ;;  %117 = vadd.xlane.f32.xlu1 %v97_v1  ;;  %v96_v2 = vld [vmem:[#allocation2 + $0x8] sm:$0xff]  ;;  %v98_v3 = vld [vmem:[#allocation2 + $0x18] sm:$0xff]  ;;  %v99_v4 = vld [vmem:[#allocation2 + $0x20] sm:$0xff]  ;;  %s7794_s13 = smov 80   ;;  %s7795_s17 = smov 48  }
  0x4d   :  { %v100_v5 = vld [vmem:[#allocation2 + $0x28] sm:$0xff]  ;;  %v7914_v6 = vld [vmem:[#allocation2 + $0x30] sm:$0xff]  ;;  %v7916_v7 = vld [vmem:[#allocation2 + $0x38] sm:$0xff]  ;;  %s7796_s19 = smov 32  }
  0x4e   :  { %v7918_v8 = vld [vmem:[#allocation2 + $0x40] sm:$0xff]  ;;  %v7920_v9 = vld [vmem:[#allocation2 + $0x48] sm:$0xff]  ;;  %v7924_v10 = vld [vmem:[#allocation2 + $0x50] sm:$0xff] }
  0x4f   :  { %v7926_v11 = vld [vmem:[#allocation2 + $0x58] sm:$0xff]  ;;  %v7930_v12 = vld [vmem:[#allocation2 + $0x60] sm:$0xff]  ;;  %v7932_v13 = vld [vmem:[#allocation2 + $0x68] sm:$0xff] }
  0x50   :  { %115 = vadd.xlane.f32.xlu0 %v96_v2  ;;  %119 = vadd.xlane.f32.xlu1 %v98_v3  ;;  %v7936_v14 = vld [vmem:[#allocation2 + $0x70] sm:$0xff]  ;;  %v7940_v15 = vld [vmem:[#allocation2 + $0x78] sm:$0xff]  ;;  %v7024_v17 = vld [vmem:[#allocation5] ss:$12 sps:$4 sm:$0xff]  }
  0x51   :  { %v7022_v16 = vld [vmem:[#allocation5 + $0x4] ss:$12 sps:$4 sm:$0xff]   ;;  %v7025_v18 = vld [vmem:[#allocation5 + $0x1c] ss:$12 sps:$4 sm:$0xff]  }
  0x52   :  { %v7027_v19 = vld [vmem:[#allocation5 + $0x8] ss:$12 sps:$4 sm:$0xff]   ;;  %519 = vmatprep.subr.bf16.mxu0 %v7022_v16  ;;  %v7028_v58 = vld [vmem:[#allocation5 + $0x18] ss:$12 sps:$4 sm:$0xff]  }
  0x53   :  { %520 = vmatpush1.bf16.msra.mxu0 %v7024_v17  ;;  %6283 = vmatprep.subr.bf16.mxu1 %v7027_v19 }
  0x54   :  { %121 = vadd.xlane.f32.xlu0 %v99_v4  ;;  %123 = vadd.xlane.f32.xlu1 %v100_v5 }
  0x55   :  { %521 = vmatprep.subr.bf16.mxu0 %v7025_v18  ;;  %6284 = vmatpush3.bf16.msra.mxu1 %v7027_v19  ;;  %v7033_v18 = vld [vmem:[#allocation5 + $0x4c] ss:$12 sps:$4 sm:$0xff]  }
  0x56   :  { %v7035_v19 = vld [vmem:[#allocation5 + $0x38] ss:$12 sps:$4 sm:$0xff]  }
  0x57   :  { %522 = vmatpush1.bf16.msra.mxu0 %v7028_v58 }
  0x58   :  { %125 = vadd.xlane.f32.xlu0 %v7914_v6  ;;  %127 = vadd.xlane.f32.xlu1 %v7916_v7 }
  0x5c   :  { %129 = vadd.xlane.f32.xlu0 %v7918_v8  ;;  %131 = vadd.xlane.f32.xlu1 %v7920_v9 }
  0x60   :  { %133 = vadd.xlane.f32.xlu0 %v7924_v10  ;;  %135 = vadd.xlane.f32.xlu1 %v7926_v11 }
  0x64   :  { %137 = vadd.xlane.f32.xlu0 %v7930_v12  ;;  %139 = vadd.xlane.f32.xlu1 %v7932_v13 }
  0x68   :  { %141 = vadd.xlane.f32.xlu0 %v7936_v14  ;;  %143 = vadd.xlane.f32.xlu1 %v7940_v15 }
  0xd9   :  { %v114_v20 = vpop.xlane.xlu0 %113  ;;  %v118_v21 = vpop.xlane.xlu1 %117 }
  0xda   :  { %v146_v22 = vmul.f32 0.0078125, %v114_v20  ;;  %v148_v23 = vmul.f32 0.0078125, %v118_v21 }
  0xdc   :  { %v7944_v24 = vsub.f32 %v95_v0, %v146_v22  ;;  %v7946_v25 = vsub.f32 %v97_v1, %v148_v23  ;;  %v7029_v0 = vld [vmem:[#allocation5 + $0x34] ss:$12 sps:$4 sm:$0xff]  }
  0xdd   :  { %v116_v26 = vpop.xlane.xlu0 %115  ;;  %v120_v27 = vpop.xlane.xlu1 %119  ;;  %v7031_v1 = vld [vmem:[#allocation5 + $0x20] ss:$12 sps:$4 sm:$0xff]   ;;  %523 = vmatprep.subr.bf16.mxu0 %v7029_v0  ;;  %v7036_v22 = vld [vmem:[#allocation5 + $0x48] ss:$12 sps:$4 sm:$0xff]  }
  0xde   :  { %v147_v28 = vmul.f32 0.0078125, %v116_v26  ;;  %v178_v29 = vmul.f32 %v7944_v24, %v7944_v24  ;;  %v149_v30 = vmul.f32 0.0078125, %v120_v27  ;;  %v180_v31 = vmul.f32 %v7946_v25, %v7946_v25  ;;  %6285 = vmatprep.subr.bf16.mxu1 %v7031_v1 }
  0xdf   :  { %6286 = vmatpush3.bf16.msra.mxu1 %v7031_v1 }
  0xe0   :  { %194 = vadd.xlane.f32.xlu0 %v178_v29  ;;  %v7952_v32 = vsub.f32 %v96_v2, %v147_v28  ;;  %v7954_v33 = vsub.f32 %v98_v3, %v149_v30  ;;  %6287 = vmatprep.subr.bf16.mxu1 %v7035_v19  ;;  %v7037_v29 = vld [vmem:[#allocation5 + $0x64] ss:$12 sps:$4 sm:$0xff]  }
  0xe1   :  { %v122_v34 = vpop.xlane.xlu0 %121  ;;  %v124_v35 = vpop.xlane.xlu1 %123  ;;  %v7039_v30 = vld [vmem:[#allocation5 + $0x50] ss:$12 sps:$4 sm:$0xff]  }
  0xe2   :  { %v150_v36 = vmul.f32 0.0078125, %v122_v34  ;;  %v179_v37 = vmul.f32 %v7952_v32, %v7952_v32  ;;  %v151_v38 = vmul.f32 0.0078125, %v124_v35  ;;  %v181_v39 = vmul.f32 %v7954_v33, %v7954_v33 }
  0xe3   :  { %6288 = vmatpush3.bf16.msra.mxu1 %v7035_v19 }
  0xe4   :  { %198 = vadd.xlane.f32.xlu0 %v180_v31  ;;  %196 = vadd.xlane.f32.xlu1 %v179_v37  ;;  %v7960_v40 = vsub.f32 %v99_v4, %v150_v36  ;;  %v7962_v41 = vsub.f32 %v100_v5, %v151_v38  ;;  %v7040_v31 = vld [vmem:[#allocation5 + $0x60] ss:$12 sps:$4 sm:$0xff]   ;;  %v7043_v36 = vld [vmem:[#allocation5 + $0x68] ss:$12 sps:$4 sm:$0xff]   ;;  %v7044_v37 = vld [vmem:[#allocation5 + $0x78] ss:$12 sps:$4 sm:$0xff]  }
  0xe5   :  { %v126_v42 = vpop.xlane.xlu0 %125  ;;  %v128_v43 = vpop.xlane.xlu1 %127  ;;  %6289 = vmatprep.subr.bf16.mxu1 %v7039_v30  ;;  %v7047_v38 = vld [vmem:[#allocation5 + $0x80] ss:$12 sps:$4 sm:$0xff]  }
  0xe6   :  { %v152_v44 = vmul.f32 0.0078125, %v126_v42  ;;  %v182_v45 = vmul.f32 %v7960_v40, %v7960_v40  ;;  %v153_v46 = vmul.f32 0.0078125, %v128_v43  ;;  %v183_v47 = vmul.f32 %v7962_v41, %v7962_v41  ;;  %v7049_v42 = vld [vmem:[#allocation5 + $0xac] ss:$12 sps:$4 sm:$0xff]  }
  0xe7   :  { %6290 = vmatpush3.bf16.msra.mxu1 %v7039_v30  ;;  %v7051_v43 = vld [vmem:[#allocation5 + $0x98] ss:$12 sps:$4 sm:$0xff]  }
  0xe8   :  { %200 = vadd.xlane.f32.xlu1 %v181_v39  ;;  %202 = vadd.xlane.f32.xlu0 %v182_v45  ;;  %v7969_v48 = vsub.f32 %v7914_v6, %v152_v44  ;;  %v7972_v49 = vsub.f32 %v7916_v7, %v153_v46  ;;  %v7032_v7 = vld [vmem:[#allocation5 + $0x30] ss:$12 sps:$4 sm:$0xff]   ;;  %v7052_v44 = vld [vmem:[#allocation5 + $0xa8] ss:$12 sps:$4 sm:$0xff]   ;;  %v7790_v46 = vmov 0  }
  0xe9   :  { %v130_v50 = vpop.xlane.xlu0 %129  ;;  %v132_v51 = vpop.xlane.xlu1 %131  ;;  %524 = vmatpush1.bf16.msra.mxu0 %v7032_v7  ;;  %6291 = vmatprep.subr.bf16.mxu1 %v7043_v36  ;;  %v7048_v39 = vld [vmem:[#allocation5 + $0x90] ss:$12 sps:$4 sm:$0xff]  }
  0xea   :  { %v154_v52 = vmul.f32 0.0078125, %v130_v50  ;;  %v184_v53 = vmul.f32 %v7969_v48, %v7969_v48  ;;  %v155_v54 = vmul.f32 0.0078125, %v132_v51  ;;  %v185_v55 = vmul.f32 %v7972_v49, %v7972_v49  ;;  %525 = vmatprep.subr.bf16.mxu0 %v7033_v18  ;;  %v7053_v45 = vld [vmem:[#allocation5 + $0xb0] ss:$12 sps:$4 sm:$0xff]   ;;  %551 = vmatprep.mubr.bf16.mxu0 %v7790_v46 }
  0xeb   :  { %6292 = vmatpush3.bf16.msra.mxu1 %v7043_v36 }
  0xec   :  { %204 = vadd.xlane.f32.xlu1 %v183_v47  ;;  %206 = vadd.xlane.f32.xlu0 %v184_v53  ;;  %v7979_v56 = vsub.f32 %v7918_v8, %v154_v52  ;;  %v7982_v57 = vsub.f32 %v7920_v9, %v155_v54 }
  0xed   :  { %v134_v59 = vpop.xlane.xlu0 %133  ;;  %v136_v60 = vpop.xlane.xlu1 %135  ;;  %526 = vmatpush1.bf16.msra.mxu0 %v7036_v22  ;;  %6293 = vmatprep.subr.bf16.mxu1 %v7047_v38  ;;  %v8023_v22 = vld [vmem:[%s10502_s1] ss:$0 sm:$0xff] }
  0xee   :  { %v156_v61 = vmul.f32 0.0078125, %v134_v59  ;;  %v186_v62 = vmul.f32 %v7979_v56, %v7979_v56  ;;  %v157_v63 = vmul.f32 0.0078125, %v136_v60  ;;  %v187_v2 = vmul.f32 %v7982_v57, %v7982_v57  ;;  %527 = vmatprep.subr.bf16.mxu0 %v7037_v29 }
  0xef   :  { %6294 = vmatpush3.bf16.msra.mxu1 %v7047_v38 }
  0xf0   :  { %208 = vadd.xlane.f32.xlu1 %v185_v55  ;;  %210 = vadd.xlane.f32.xlu0 %v186_v62  ;;  %v7989_v3 = vsub.f32 %v7924_v10, %v156_v61  ;;  %v7992_v4 = vsub.f32 %v7926_v11, %v157_v63 }
  0xf1   :  { %v138_v5 = vpop.xlane.xlu0 %137  ;;  %v140_v6 = vpop.xlane.xlu1 %139  ;;  %528 = vmatpush1.bf16.msra.mxu0 %v7040_v31  ;;  %6295 = vmatprep.subr.bf16.mxu1 %v7051_v43 }
  0xf2   :  { %v158_v8 = vmul.f32 0.0078125, %v138_v5  ;;  %v188_v9 = vmul.f32 %v7989_v3, %v7989_v3  ;;  %v159_v16 = vmul.f32 0.0078125, %v140_v6  ;;  %v189_v10 = vmul.f32 %v7992_v4, %v7992_v4 }
  0xf3   :  { %6296 = vmatpush3.bf16.msra.mxu1 %v7051_v43 }
  0xf4   :  { %212 = vadd.xlane.f32.xlu1 %v187_v2  ;;  %214 = vadd.xlane.f32.xlu0 %v188_v9  ;;  %v7999_v11 = vsub.f32 %v7930_v12, %v158_v8  ;;  %v8002_v17 = vsub.f32 %v7932_v13, %v159_v16 }
  0xf5   :  { %v142_v20 = vpop.xlane.xlu0 %141  ;;  %v144_v21 = vpop.xlane.xlu1 %143  ;;  %6297 = vmatprep.subr.bf16.mxu1 %v7053_v45 }
  0xf6   :  { %v160_v23 = vmul.f32 0.0078125, %v142_v20  ;;  %v190_v26 = vmul.f32 %v7999_v11, %v7999_v11  ;;  %v161_v27 = vmul.f32 0.0078125, %v144_v21  ;;  %v191_v12 = vmul.f32 %v8002_v17, %v8002_v17 }
  0xf7   :  { %6298 = vmatpush3.bf16.msra.mxu1 %v7053_v45 }
  0xf8   :  { %216 = vadd.xlane.f32.xlu1 %v189_v10  ;;  %218 = vadd.xlane.f32.xlu0 %v190_v26  ;;  %v8009_v13 = vsub.f32 %v7936_v14, %v160_v23  ;;  %v8012_v28 = vsub.f32 %v7940_v15, %v161_v27  ;;  %v7041_v14 = vld [vmem:[#allocation5 + $0x7c] ss:$12 sps:$4 sm:$0xff]   ;;  %v7045_v15 = vld [vmem:[#allocation5 + $0x94] ss:$12 sps:$4 sm:$0xff]  }
  0xf9   :  { %529 = vmatprep.subr.bf16.mxu0 %v7041_v14  ;;  %v8030_v14 = vld [vmem:[%s10503_s2] ss:$0 sm:$0xff] }
  0xfa   :  { %v192_v34 = vmul.f32 %v8009_v13, %v8009_v13  ;;  %v193_v35 = vmul.f32 %v8012_v28, %v8012_v28  ;;  %530 = vmatpush1.bf16.msra.mxu0 %v7044_v37 }
  0xfb   :  { %531 = vmatprep.subr.bf16.mxu0 %v7045_v15 }
  0xfc   :  { %220 = vadd.xlane.f32.xlu1 %v191_v12  ;;  %222 = vadd.xlane.f32.xlu0 %v192_v34 }
  0xfe   :  { %532 = vmatpush1.bf16.msra.mxu0 %v7048_v39 }
  0xff   :  { %533 = vmatprep.subr.bf16.mxu0 %v7049_v42 }
 0x100   :  { %224 = vadd.xlane.f32.xlu1 %v193_v35 }
 0x102   :  { %534 = vmatpush1.bf16.msra.mxu0 %v7052_v44 }
 0x16d   :  { %v195_v47 = vpop.xlane.xlu0 %194 }
 0x16e   :  { %v226_v50 = vmul.f32 0.0078125, %v195_v47 }
 0x170   :  { %v242_v51 = vadd.f32 1e-05, %v226_v50 }
 0x171   :  { %v197_v52 = vpop.xlane.xlu1 %196  ;;  %v199_v53 = vpop.xlane.xlu0 %198 }
 0x172   :  { %7070 = vrsqrt.f32 %v242_v51  ;;  %v227_v54 = vmul.f32 0.0078125, %v197_v52  ;;  %v228_v55 = vmul.f32 0.0078125, %v199_v53 }
 0x174   :  { %v243_v58 = vadd.f32 1e-05, %v227_v54  ;;  %v244_v59 = vadd.f32 1e-05, %v228_v55 }
 0x175   :  { %v201_v60 = vpop.xlane.xlu1 %200  ;;  %v203_v61 = vpop.xlane.xlu0 %202 }
 0x176   :  { %7072 = vrsqrt.f32 %v243_v58  ;;  %v229_v62 = vmul.f32 0.0078125, %v201_v60  ;;  %v230_v63 = vmul.f32 0.0078125, %v203_v61 }
 0x177   :  { %7074 = vrsqrt.f32 %v244_v59 }
 0x178   :  { %v245_v0 = vadd.f32 1e-05, %v229_v62  ;;  %v246_v1 = vadd.f32 1e-05, %v230_v63 }
 0x179   :  { %v205_v2 = vpop.xlane.xlu1 %204  ;;  %v207_v5 = vpop.xlane.xlu0 %206 }
 0x17a   :  { %7076 = vrsqrt.f32 %v245_v0  ;;  %v231_v6 = vmul.f32 0.0078125, %v205_v2  ;;  %v232_v7 = vmul.f32 0.0078125, %v207_v5 }
 0x17b   :  { %7078 = vrsqrt.f32 %v246_v1 }
 0x17c   :  { %v7071_v8 = vpop.eup %7070  ;;  %v247_v9 = vadd.f32 1e-05, %v231_v6  ;;  %v248_v16 = vadd.f32 1e-05, %v232_v7 }
 0x17d   :  { %v209_v10 = vpop.xlane.xlu1 %208  ;;  %v211_v18 = vpop.xlane.xlu0 %210  ;;  %v274_v19 = vmul.f32 %v7071_v8, %v7944_v24 }
 0x17e   :  { %7080 = vrsqrt.f32 %v247_v9  ;;  %v233_v20 = vmul.f32 0.0078125, %v209_v10  ;;  %v234_v21 = vmul.f32 0.0078125, %v211_v18 }
 0x17f   :  { %7082 = vrsqrt.f32 %v248_v16  ;;  %v296_v34 = vmul.f32 %v8023_v22, %v274_v19 }
 0x180   :  { %v7073_v23 = vpop.eup %7072  ;;  %v249_v26 = vadd.f32 1e-05, %v233_v20  ;;  %v250_v27 = vadd.f32 1e-05, %v234_v21 }
 0x181   :  { %v7075_v12 = vpop.eup %7074  ;;  %v213_v29 = vpop.xlane.xlu1 %212  ;;  %v275_v31 = vmul.f32 %v7073_v23, %v7952_v32  ;;  %v318_v45 = vadd.f32 %v8030_v14, %v296_v34 }
 0x182   :  { %v215_v30 = vpop.xlane.xlu0 %214  ;;  %7084 = vrsqrt.f32 %v249_v26  ;;  %v235_v24 = vmul.f32 0.0078125, %v213_v29  ;;  %v276_v36 = vmul.f32 %v7075_v12, %v7946_v25 }
 0x183   :  { %v236_v35 = vmul.f32 0.0078125, %v215_v30  ;;  %7086 = vrsqrt.f32 %v250_v27  ;;  %v297_v37 = vmul.f32 %v8023_v22, %v275_v31 }
 0x184   :  { %v7077_v15 = vpop.eup %7076  ;;  %v251_v38 = vadd.f32 1e-05, %v235_v24  ;;  %v298_v32 = vmul.f32 %v8023_v22, %v276_v36 }
 0x185   :  { %v252_v39 = vadd.f32 1e-05, %v236_v35  ;;  %v7079_v42 = vpop.eup %7078  ;;  %v217_v43 = vpop.xlane.xlu1 %216  ;;  %v319_v47 = vadd.f32 %v8030_v14, %v297_v37  ;;  %v277_v50 = vmul.f32 %v7077_v15, %v7954_v33 }
 0x186   :  { %v219_v44 = vpop.xlane.xlu0 %218  ;;  %7088 = vrsqrt.f32 %v251_v38  ;;  %v237_v51 = vmul.f32 0.0078125, %v217_v43  ;;  %v278_v54 = vmul.f32 %v7079_v42, %v7960_v40  ;;  %v320_v60 = vadd.f32 %v8030_v14, %v298_v32 }
 0x187   :  { %v238_v25 = vmul.f32 0.0078125, %v219_v44  ;;  %7090 = vrsqrt.f32 %v252_v39  ;;  %v334_v52 = vpack.c.bf16 %v319_v47, %v318_v45  ;;  %v299_v53 = vmul.f32 %v8023_v22, %v277_v50 }
 0x188   :  { %v7081_v55 = vpop.eup %7080  ;;  %v253_v58 = vadd.f32 1e-05, %v237_v51  ;;  %v300_v1 = vmul.f32 %v8023_v22, %v278_v54 }
 0x189   :  { %v254_v59 = vadd.f32 1e-05, %v238_v25  ;;  %v7083_v61 = vpop.eup %7082  ;;  %v221_v62 = vpop.xlane.xlu1 %220  ;;  %552 = vmatmul.mubr.bf16.vlgmr.msra.gmra.mrb[0].mxu0 %v334_v52  ;;  %6299 = vmatprep.mubr.bf16.mxu1 %v334_v52  ;;  %v321_v33 = vadd.f32 %v8030_v14, %v299_v53  ;;  %v279_v0 = vmul.f32 %v7081_v55, %v7962_v41 }
 0x18a   :  { %v223_v63 = vpop.xlane.xlu0 %222  ;;  %7092 = vrsqrt.f32 %v253_v58  ;;  %v239_v2 = vmul.f32 0.0078125, %v221_v62  ;;  %561 = vmatprep.mubr.bf16.mxu0 %v7790_v46  ;;  %v280_v40 = vmul.f32 %v7083_v61, %v7969_v48  ;;  %v322_v19 = vadd.f32 %v8030_v14, %v300_v1 }
 0x18b   :  { %v240_v5 = vmul.f32 0.0078125, %v223_v63  ;;  %7094 = vrsqrt.f32 %v254_v59  ;;  %v335_v6 = vpack.c.bf16 %v321_v33, %v320_v60  ;;  %v301_v7 = vmul.f32 %v8023_v22, %v279_v0  ;;  %v374_v63 = vld [vmem:[%s10505_s4] sm:$0x7]  ;;  %s7791_s4 = smov 112  }
 0x18c   :  { %v7085_v8 = vpop.eup %7084  ;;  %v255_v9 = vadd.f32 1e-05, %v239_v2  ;;  %v302_v10 = vmul.f32 %v8023_v22, %v280_v40 }
 0x18d   :  { %v256_v16 = vadd.f32 1e-05, %v240_v5  ;;  %v7087_v18 = vpop.eup %7086  ;;  %v225_v41 = vpop.xlane.xlu1 %224  ;;  %6300 = vmatmul.mubr.bf16.vlgmr.msra.gmra.mrb[0].mxu1 %v335_v6  ;;  %v323_v20 = vadd.f32 %v8030_v14, %v301_v7  ;;  %v281_v21 = vmul.f32 %v7085_v8, %v7972_v49 }
 0x18e   :  { %7096 = vrsqrt.f32 %v255_v9  ;;  %v241_v48 = vmul.f32 0.0078125, %v225_v41  ;;  %v282_v23 = vmul.f32 %v7087_v18, %v7979_v56  ;;  %v324_v30 = vadd.f32 %v8030_v14, %v302_v10 }
 0x18f   :  { %7098 = vrsqrt.f32 %v256_v16  ;;  %v336_v26 = vpack.c.bf16 %v323_v20, %v322_v19  ;;  %v303_v27 = vmul.f32 %v8023_v22, %v281_v21 }
 0x190   :  { %v7089_v12 = vpop.eup %7088  ;;  %v257_v29 = vadd.f32 1e-05, %v241_v48  ;;  %v304_v49 = vmul.f32 %v8023_v22, %v282_v23 }
 0x191   :  { %v7091_v31 = vpop.eup %7090  ;;  %562 = vmatmul.mubr.bf16.gmra.mrb[4].mxu0 %v335_v6  ;;  %6303 = vmatprep.mubr.bf16.mxu1 %v336_v26  ;;  %v325_v34 = vadd.f32 %v8030_v14, %v303_v27  ;;  %v283_v24 = vmul.f32 %v7089_v12, %v7982_v57 }
 0x192   :  { %7100 = vrsqrt.f32 %v257_v29  ;;  %571 = vmatprep.mubr.bf16.mxu0 %v7790_v46  ;;  %v284_v56 = vmul.f32 %v7091_v31, %v7989_v3  ;;  %v326_v39 = vadd.f32 %v8030_v14, %v304_v49 }
 0x193   :  { %v337_v35 = vpack.c.bf16 %v325_v34, %v324_v30  ;;  %v305_v36 = vmul.f32 %v8023_v22, %v283_v24 }
 0x194   :  { %v7093_v37 = vpop.eup %7092  ;;  %v306_v15 = vmul.f32 %v8023_v22, %v284_v56 }
 0x195   :  { %v7095_v38 = vpop.eup %7094  ;;  %6304 = vmatmul.mubr.bf16.gmra.mrb[4].mxu1 %v337_v35  ;;  %v327_v32 = vadd.f32 %v8030_v14, %v305_v36  ;;  %v285_v57 = vmul.f32 %v7093_v37, %v7992_v4 }
 0x196   :  { %v286_v42 = vmul.f32 %v7095_v38, %v7999_v11  ;;  %v328_v45 = vadd.f32 %v8030_v14, %v306_v15 }
 0x197   :  { %v338_v43 = vpack.c.bf16 %v327_v32, %v326_v39  ;;  %v307_v44 = vmul.f32 %v8023_v22, %v285_v57 }
 0x198   :  { %v7097_v3 = vpop.eup %7096  ;;  %v308_v25 = vmul.f32 %v8023_v22, %v286_v42 }
 0x199   :  { %v7099_v47 = vpop.eup %7098  ;;  %572 = vmatmul.mubr.bf16.gmra.mrb[8].mxu0 %v336_v26  ;;  %6307 = vmatprep.mubr.bf16.mxu1 %v338_v43  ;;  %v329_v50 = vadd.f32 %v8030_v14, %v307_v44  ;;  %v287_v51 = vmul.f32 %v7097_v3, %v8002_v17 }
 0x19a   :  { %581 = vmatprep.mubr.bf16.mxu0 %v7790_v46  ;;  %v288_v4 = vmul.f32 %v7099_v47, %v8009_v13  ;;  %v330_v54 = vadd.f32 %v8030_v14, %v308_v25 }
 0x19b   :  { %v339_v11 = vpack.c.bf16 %v329_v50, %v328_v45  ;;  %v309_v52 = vmul.f32 %v8023_v22, %v287_v51 }
 0x19c   :  { %v7101_v53 = vpop.eup %7100  ;;  %v310_v59 = vmul.f32 %v8023_v22, %v288_v4 }
 0x19d   :  { %6308 = vmatmul.mubr.bf16.gmra.mrb[8].mxu1 %v339_v11  ;;  %v331_v55 = vadd.f32 %v8030_v14, %v309_v52  ;;  %v289_v58 = vmul.f32 %v7101_v53, %v8012_v28  ;;  %v376_v28 = vlaneseq }
 0x19e   :  { %v332_v13 = vadd.f32 %v8030_v14, %v310_v59 }
 0x19f   :  { %v340_v17 = vpack.c.bf16 %v331_v55, %v330_v54  ;;  %v311_v60 = vmul.f32 %v8023_v22, %v289_v58  ;;  %v8085_v22 = vshrl.u32 %v376_v28, 7 }
 0x1a1   :  { %582 = vmatmul.mubr.bf16.gmra.mrb[12].mxu0 %v337_v35  ;;  %6311 = vmatprep.mubr.bf16.mxu1 %v340_v17  ;;  %v333_v61 = vadd.f32 %v8030_v14, %v311_v60  ;;  %v382_v14 = vsub.s32 1, %v8085_v22  ;;  %v378_v33 = vsub.s32 0, %v8085_v22  ;;  %v386_v2 = vsub.s32 2, %v8085_v22 }
 0x1a2   :  { %591 = vmatprep.mubr.bf16.mxu0 %v7790_v46 }
 0x1a3   :  { %v341_v62 = vpack.c.bf16 %v333_v61, %v332_v13  ;;  %v8092_v0 = vrot.slane %v374_v63, %v382_v14  ;;  %v8094_v1 = vrot.slane %v374_v63, %v378_v33  ;;  %v8100_v16 = vrot.slane %v374_v63, %v386_v2 }
 0x1a5   :  { %6312 = vmatmul.mubr.bf16.gmra.mrb[12].mxu1 %v341_v62 }
 0x1a9   :  { %592 = vmatmul.mubr.bf16.gmra.mrb[16].mxu0 %v338_v43 }
 0x1aa   :  { %601 = vmatprep.mubr.bf16.mxu0 %v7790_v46 }
 0x1b1   :  { %602 = vmatmul.mubr.bf16.gmra.mrb[20].mxu0 %v339_v11 }
 0x1b2   :  { %611 = vmatprep.mubr.bf16.mxu0 %v7790_v46 }
 0x1b9   :  { %612 = vmatmul.mubr.bf16.gmra.mrb[24].mxu0 %v340_v17 }
 0x1ba   :  { %621 = vmatprep.mubr.bf16.mxu0 %v7790_v46 }
 0x1c1   :  { %622 = vmatmul.mubr.bf16.gmra.mrb[28].mxu0 %v341_v62 }
 0x25c   :  { %v553_v46 = vpop.f32.mrb[0].mxu0 }
 0x25d   :  { %v555_v5 = vpop.f32.mrb[1].mxu0  ;;  %v554_v7 = vadd.f32 %v553_v46, %v8094_v1 }
 0x25e   :  { %v556_v40 = vadd.f32 %v555_v5, %v8092_v0  ;;  %v557_v6 = vpop.f32.mrb[2].mxu0 }
 0x25f   :  { %v558_v8 = vadd.f32 %v557_v6, %v8094_v1  ;;  %v559_v9 = vpop.f32.mrb[3].mxu0 }
 0x260   :  { %745 = vxpose.xlu0.b32.start [1/16] %v556_v40, 128  ;;  %v6301_v10 = vpop.f32.mrb[0].mxu1  ;;  %v560_v19 = vadd.f32 %v559_v9, %v8092_v0 }
 0x261   :  { %v8102_v18 = vpack.c.bf16 %v558_v8, %v554_v7  ;;  %v666_v41 = vpop.f32.mrb[1].mxu1  ;;  %v675_v21 = vadd.f32 %v6301_v10, %v8100_v16 }
 0x262   :  { %v6302_v20 = vpop.f32.mrb[2].mxu1  ;;  %v667_v26 = vadd.f32 %v666_v41, %v8100_v16 }
 0x263   :  { %10614 = vst [vmem:[#allocation15_spill] sm:$0xff] %v8102_v18  ;;  %v678_v48 = vadd.f32 %v6302_v20, %v8100_v16  ;;  %1271 = vrot.lane.b32.xlu1 %v8102_v18, %s7791_s4  ;;  %v669_v23 = vpop.f32.mrb[3].mxu1  ;;  %6317 = vmatprep.mubr.msk.bf16.mxu1 %vm884_vm0, %v8102_v18 }
 0x264   :  { %v670_v27 = vadd.f32 %v669_v23, %v8100_v16  ;;  %746 = vxpose.xlu0.b32.cont [2/16] %v560_v19, 128  ;;  %v563_v12 = vpop.f32.mrb[4].mxu0 }
 0x265   :  { %v8113_v29 = vpack.c.bf16 %v678_v48, %v675_v21  ;;  %v565_v30 = vpop.f32.mrb[5].mxu0  ;;  %v564_v49 = vadd.f32 %v563_v12, %v8094_v1 }
 0x266   :  { %v8115_v31 = vpack.c.bf16 %v670_v27, %v667_v26  ;;  %v566_v34 = vadd.f32 %v565_v30, %v8092_v0  ;;  %v567_v24 = vpop.f32.mrb[6].mxu0 }
 0x267   :  { %10615 = vst [vmem:[#allocation16_spill] sm:$0xff] %v8113_v29  ;;  %v568_v56 = vadd.f32 %v567_v24, %v8094_v1  ;;  %v569_v35 = vpop.f32.mrb[7].mxu0 }
 0x268   :  { %10616 = vst [vmem:[#allocation17_spill] sm:$0xff] %v8115_v31  ;;  %6333 = vmatprep.subr.bf16.mxu0 %v8115_v31  ;;  %747 = vxpose.xlu0.b32.cont [3/16] %v566_v34, 128  ;;  %v6305_v36 = vpop.f32.mrb[4].mxu1  ;;  %v570_v38 = vadd.f32 %v569_v35, %v8092_v0 }
 0x269   :  { %v8121_v37 = vpack.c.bf16 %v568_v56, %v564_v49  ;;  %v682_v15 = vpop.f32.mrb[5].mxu1  ;;  %6334 = vmatpush3.bf16.msra.mxu0 %v8115_v31  ;;  %v691_v32 = vadd.f32 %v6305_v36, %v8100_v16 }
 0x26a   :  { %v6306_v39 = vpop.f32.mrb[6].mxu1  ;;  %6335 = vmatprep.subr.bf16.mxu0 %v8113_v29  ;;  %v683_v43 = vadd.f32 %v682_v15, %v8100_v16 }
 0x26b   :  { %10617 = vst [vmem:[#allocation18_spill] sm:$0xff] %v8121_v37  ;;  %v694_v57 = vadd.f32 %v6306_v39, %v8100_v16  ;;  %1273 = vrot.lane.b32.xlu1 %v8121_v37, %s7791_s4  ;;  %v685_v42 = vpop.f32.mrb[7].mxu1 }
 0x26c   :  { %v686_v44 = vadd.f32 %v685_v42, %v8100_v16  ;;  %748 = vxpose.xlu0.b32.cont [4/16] %v570_v38, 128  ;;  %v573_v3 = vpop.f32.mrb[8].mxu0 }
 0x26d   :  { %v8132_v45 = vpack.c.bf16 %v694_v57, %v691_v32  ;;  %v575_v47 = vpop.f32.mrb[9].mxu0  ;;  %6336 = vmatpush3.bf16.msra.mxu0 %v8113_v29  ;;  %v574_v4 = vadd.f32 %v573_v3, %v8094_v1 }
 0x26e   :  { %v8135_v50 = vpack.c.bf16 %v686_v44, %v683_v43  ;;  %v576_v51 = vadd.f32 %v575_v47, %v8092_v0  ;;  %v577_v25 = vpop.f32.mrb[10].mxu0 }
 0x26f   :  { %10618 = vst [vmem:[#allocation19_spill] sm:$0xff] %v8132_v45  ;;  %v578_v11 = vadd.f32 %v577_v25, %v8094_v1  ;;  %v579_v52 = vpop.f32.mrb[11].mxu0 }
 0x270   :  { %10619 = vst [vmem:[#allocation20_spill] sm:$0xff] %v8135_v50  ;;  %749 = vxpose.xlu0.b32.cont [5/16] %v576_v51, 128  ;;  %v6309_v53 = vpop.f32.mrb[8].mxu1  ;;  %6337 = vmatprep.subr.bf16.mxu0 %v8135_v50  ;;  %v580_v58 = vadd.f32 %v579_v52, %v8092_v0 }
 0x271   :  { %v8141_v54 = vpack.c.bf16 %v578_v11, %v574_v4  ;;  %v698_v55 = vpop.f32.mrb[9].mxu1  ;;  %6338 = vmatpush3.bf16.msra.mxu0 %v8135_v50  ;;  %v707_v17 = vadd.f32 %v6309_v53, %v8100_v16 }
 0x272   :  { %v6310_v59 = vpop.f32.mrb[10].mxu1  ;;  %6339 = vmatprep.subr.bf16.mxu0 %v8132_v45  ;;  %v699_v61 = vadd.f32 %v698_v55, %v8100_v16 }
 0x273   :  { %10620 = vst [vmem:[#allocation21_spill] sm:$0xff] %v8141_v54  ;;  %v710_v60 = vadd.f32 %v6310_v59, %v8100_v16  ;;  %1275 = vrot.lane.b32.xlu1 %v8141_v54, %s7791_s4  ;;  %v701_v13 = vpop.f32.mrb[11].mxu1 }
 0x274   :  { %v702_v62 = vadd.f32 %v701_v13, %v8100_v16  ;;  %750 = vxpose.xlu0.b32.cont [6/16] %v580_v58, 128  ;;  %v583_v14 = vpop.f32.mrb[12].mxu0 }
 0x275   :  { %v8152_v63 = vpack.c.bf16 %v710_v60, %v707_v17  ;;  %v585_v33 = vpop.f32.mrb[13].mxu0  ;;  %6340 = vmatpush3.bf16.msra.mxu0 %v8132_v45  ;;  %v584_v40 = vadd.f32 %v583_v14, %v8094_v1 }
 0x276   :  { %v8155_v2 = vpack.c.bf16 %v702_v62, %v699_v61  ;;  %v586_v46 = vadd.f32 %v585_v33, %v8092_v0  ;;  %v587_v5 = vpop.f32.mrb[14].mxu0 }
 0x277   :  { %10621 = vst [vmem:[#allocation22_spill] sm:$0xff] %v8152_v63  ;;  %v588_v6 = vadd.f32 %v587_v5, %v8094_v1  ;;  %v589_v7 = vpop.f32.mrb[15].mxu0 }
 0x278   :  { %10622 = vst [vmem:[#allocation23_spill] sm:$0xff] %v8155_v2  ;;  %751 = vxpose.xlu0.b32.cont [7/16] %v586_v46, 128  ;;  %v6313_v8 = vpop.f32.mrb[12].mxu1  ;;  %6341 = vmatprep.subr.bf16.mxu0 %v8155_v2  ;;  %v590_v41 = vadd.f32 %v589_v7, %v8092_v0 }
 0x279   :  { %v8161_v9 = vpack.c.bf16 %v588_v6, %v584_v40  ;;  %v714_v10 = vpop.f32.mrb[13].mxu1  ;;  %6342 = vmatpush3.bf16.msra.mxu0 %v8155_v2  ;;  %v723_v20 = vadd.f32 %v6313_v8, %v8100_v16 }
 0x27a   :  { %v6314_v19 = vpop.f32.mrb[14].mxu1  ;;  %6343 = vmatprep.subr.bf16.mxu0 %v8152_v63  ;;  %v715_v23 = vadd.f32 %v714_v10, %v8100_v16 }
 0x27b   :  { %10623 = vst [vmem:[#allocation24_spill] sm:$0xff] %v8161_v9  ;;  %v726_v21 = vadd.f32 %v6314_v19, %v8100_v16  ;;  %1277 = vrot.lane.b32.xlu1 %v8161_v9, %s7791_s4  ;;  %v717_v48 = vpop.f32.mrb[15].mxu1 }
 0x27c   :  { %v718_v26 = vadd.f32 %v717_v48, %v8100_v16  ;;  %752 = vxpose.xlu0.b32.cont [8/16] %v590_v41, 128  ;;  %v593_v27 = vpop.f32.mrb[16].mxu0 }
 0x27d   :  { %v8172_v12 = vpack.c.bf16 %v726_v21, %v723_v20  ;;  %v595_v30 = vpop.f32.mrb[17].mxu0  ;;  %6344 = vmatpush3.bf16.msra.mxu0 %v8152_v63  ;;  %v594_v56 = vadd.f32 %v593_v27, %v8094_v1 }
 0x27e   :  { %v8175_v34 = vpack.c.bf16 %v718_v26, %v715_v23  ;;  %v596_v24 = vadd.f32 %v595_v30, %v8092_v0  ;;  %v597_v49 = vpop.f32.mrb[18].mxu0 }
 0x27f   :  { %10624 = vst [vmem:[#allocation25_spill] sm:$0xff] %v8172_v12  ;;  %v598_v35 = vadd.f32 %v597_v49, %v8094_v1  ;;  %v599_v36 = vpop.f32.mrb[19].mxu0 }
 0x280   :  { %10625 = vst [vmem:[#allocation26_spill] sm:$0xff] %v8175_v34  ;;  %753 = vxpose.xlu0.b32.cont [9/16] %v596_v24, 128  ;;  %6345 = vmatprep.subr.bf16.mxu0 %v8175_v34  ;;  %v600_v15 = vadd.f32 %v599_v36, %v8092_v0 }
 0x281   :  { %v8181_v16 = vpack.c.bf16 %v598_v35, %v594_v56  ;;  %6346 = vmatpush3.bf16.msra.mxu0 %v8175_v34 }
 0x282   :  { %6347 = vmatprep.subr.bf16.mxu0 %v8172_v12 }
 0x283   :  { %10626 = vst [vmem:[#allocation27_spill] sm:$0xff] %v8181_v16  ;;  %1279 = vrot.lane.b32.xlu1 %v8181_v16, %s7791_s4 }
 0x284   :  { %754 = vxpose.xlu0.b32.cont [10/16] %v600_v15, 128  ;;  %v603_v38 = vpop.f32.mrb[20].mxu0 }
 0x285   :  { %v605_v39 = vpop.f32.mrb[21].mxu0  ;;  %6348 = vmatpush3.bf16.msra.mxu0 %v8172_v12  ;;  %v604_v42 = vadd.f32 %v603_v38, %v8094_v1 }
 0x286   :  { %v606_v32 = vadd.f32 %v605_v39, %v8092_v0  ;;  %v607_v57 = vpop.f32.mrb[22].mxu0 }
 0x287   :  { %v608_v43 = vadd.f32 %v607_v57, %v8094_v1  ;;  %v609_v44 = vpop.f32.mrb[23].mxu0 }
 0x288   :  { %755 = vxpose.xlu0.b32.cont [11/16] %v606_v32, 128  ;;  %v610_v47 = vadd.f32 %v609_v44, %v8092_v0  ;;  %v8276_v44 = vand.u32 127, %v376_v28  ;;  %v7792_v28 = vmov -1e+30  }
 0x289   :  { %v8192_v3 = vpack.c.bf16 %v608_v43, %v604_v42  ;;  %v788_v43 = vadd.s32 16, %v8085_v22 }
 0x28b   :  { %10627 = vst [vmem:[#allocation28_spill] sm:$0xff] %v8192_v3  ;;  %1281 = vrot.lane.b32.xlu1 %v8192_v3, %s7791_s4 }
 0x28c   :  { %756 = vxpose.xlu0.b32.cont [12/16] %v610_v47, 128  ;;  %v613_v51 = vpop.f32.mrb[24].mxu0  ;;  %v806_v47 = vsub.s32 %v788_v43, %v8276_v44 }
 0x28d   :  { %v615_v25 = vpop.f32.mrb[25].mxu0  ;;  %v614_v52 = vadd.f32 %v613_v51, %v8094_v1 }
 0x28e   :  { %v616_v4 = vadd.f32 %v615_v25, %v8092_v0  ;;  %v617_v11 = vpop.f32.mrb[26].mxu0  ;;  %v822_v51 = vand.u32 15, %v806_v47  ;;  %v804_v25 = vsub.s32 %v8085_v22, %v8276_v44 }
 0x28f   :  { %v618_v53 = vadd.f32 %v617_v11, %v8094_v1  ;;  %v619_v55 = vpop.f32.mrb[27].mxu0  ;;  %v793_v11 = vadd.s32 56, %v8085_v22 }
 0x290   :  { %757 = vxpose.xlu0.b32.cont [13/16] %v616_v4, 128  ;;  %v620_v59 = vadd.f32 %v619_v55, %v8092_v0  ;;  %v789_v4 = vadd.s32 24, %v8085_v22  ;;  %vm838_vm1 = vcmp.eq.s32.totalorder %v822_v51, 0  ;;  %v787_v55 = vadd.s32 8, %v8085_v22 }
 0x291   :  { %v8200_v58 = vpack.c.bf16 %v618_v53, %v614_v52  ;;  %v820_v52 = vand.u32 15, %v804_v25 }
 0x292   :  { %v807_v53 = vsub.s32 %v789_v4, %v8276_v44 }
 0x293   :  { %10628 = vst [vmem:[#allocation29_spill] sm:$0xff] %v8200_v58  ;;  %1283 = vrot.lane.b32.xlu1 %v8200_v58, %s7791_s4  ;;  %vm836_vm2 = vcmp.eq.s32.totalorder %v820_v52, 0 }
 0x294   :  { %758 = vxpose.xlu0.b32.cont [14/16] %v620_v59, 128  ;;  %v623_v17 = vpop.f32.mrb[28].mxu0  ;;  %v811_v59 = vsub.s32 %v793_v11, %v8276_v44 }
 0x295   :  { %v625_v60 = vpop.f32.mrb[29].mxu0  ;;  %v624_v62 = vadd.f32 %v623_v17, %v8094_v1  ;;  %v8287_v17 = vsel %vm838_vm1, 0.0, %v7792_v28 }
 0x296   :  { %v626_v13 = vadd.f32 %v625_v60, %v8092_v0  ;;  %v627_v61 = vpop.f32.mrb[30].mxu0  ;;  %10642 = vst [vmem:[#allocation43_spill] sm:$0xff] %v8287_v17  ;;  %v823_v60 = vand.u32 15, %v807_v53  ;;  %v796_v53 = vadd.s32 80, %v8085_v22 }
 0x297   :  { %v628_v14 = vadd.f32 %v627_v61, %v8094_v1  ;;  %v629_v33 = vpop.f32.mrb[31].mxu0  ;;  %v792_v61 = vadd.s32 48, %v8085_v22 }
 0x298   :  { %759 = vxpose.xlu0.b32.cont [15/16] %v626_v13, 128  ;;  %v630_v5 = vadd.f32 %v629_v33, %v8092_v0  ;;  %v805_v13 = vsub.s32 %v787_v55, %v8276_v44  ;;  %vm839_vm3 = vcmp.eq.s32.totalorder %v823_v60, 0 }
 0x299   :  { %v8208_v46 = vpack.c.bf16 %v628_v14, %v624_v62 }
 0x29b   :  { %10629 = vst [vmem:[#allocation30_spill] sm:$0xff] %v8208_v46  ;;  %1285 = vrot.lane.b32.xlu1 %v8208_v46, %s7791_s4 }
 0x29c   :  { %760 = vxpose.xlu0.b32.end [16/16] %v630_v5, 128  ;;  %v827_v5 = vand.u32 15, %v811_v59 }
 0x29e   :  { %vm843_vm4 = vcmp.eq.s32.totalorder %v827_v5, 0 }
 0x29f   :  { %1570 = vrot.lane.b32.xlu1 %v8113_v29, %s7791_s4 }
 0x2a3   :  { %1576 = vrot.lane.b32.xlu1 %v8155_v2, %s7791_s4 }
 0x2a7   :  { %1578 = vrot.lane.b32.xlu1 %v8152_v63, %s7791_s4 }
 0x2c5   :  { %1568 = vrot.lane.b32.xlu0 %v8115_v31, %s7791_s4 }
 0x2c9   :  { %1572 = vrot.lane.b32.xlu0 %v8135_v50, %s7791_s4 }
 0x2cd   :  { %1574 = vrot.lane.b32.xlu0 %v8132_v45, %s7791_s4 }
 0x2d5   :  { %v1272_v21 = vpop.permute.xlu1 %1271 }
 0x2dd   :  { %v1274_v48 = vpop.permute.xlu1 %1273 }
 0x2e0   :  { %v761_v0 = vpop.trf.xlu0 }
 0x2e4   :  { %v762_v1 = vpop.trf.xlu0 }
 0x2e5   :  { %v777_v40 = vpack.c.bf16 %v762_v1, %v761_v0  ;;  %v1276_v26 = vpop.permute.xlu1 %1275  ;;  %v8295_v0 = vsel %vm836_vm2, 0.0, %v7792_v28 }
 0x2e6   :  { %10643 = vst [vmem:[#allocation44_spill] sm:$0xff] %v8295_v0 }
 0x2e7   :  { %6315 = vmatprep.subr.bf16.mxu1 %v777_v40 }
 0x2e8   :  { %6316 = vmatpush3.bf16.msra.mxu1 %v777_v40  ;;  %v763_v6 = vpop.trf.xlu0  ;;  %v790_v40 = vadd.s32 32, %v8085_v22 }
 0x2eb   :  { %6318 = vmatmul.mubr.msk.bf16.vlgmr.msra.gmra.mrb[16].mxu1 %vm884_vm0, %v8121_v37 }
 0x2ec   :  { %6321 = vmatprep.mubr.msk.bf16.mxu1 %vm884_vm0, %v8141_v54  ;;  %v764_v7 = vpop.trf.xlu0 }
 0x2ed   :  { %v778_v8 = vpack.c.bf16 %v764_v7, %v763_v6  ;;  %v1278_v30 = vpop.permute.xlu1 %1277  ;;  %v821_v6 = vand.u32 15, %v805_v13  ;;  %v814_v13 = vsub.s32 %v796_v53, %v8276_v44 }
 0x2ef   :  { %6365 = vmatprep.subr.bf16.mxu1 %v778_v8  ;;  %vm837_vm5 = vcmp.eq.s32.totalorder %v821_v6, 0  ;;  %v830_v6 = vand.u32 15, %v814_v13 }
 0x2f0   :  { %v8229_v10 = vpop.trf.xlu0  ;;  %6366 = vmatpush3.bf16.msra.mxu1 %v778_v8  ;;  %v810_v8 = vsub.s32 %v792_v61, %v8276_v44  ;;  %v8316_v47 = vsel %vm837_vm5, 0.0, %v7792_v28  ;;  %v794_v61 = vadd.s32 64, %v8085_v22 }
 0x2f1   :  { %10630 = vst [vmem:[#allocation31_spill] sm:$0xff] %v8229_v10  ;;  %10646 = vst [vmem:[#allocation47_spill] sm:$0xff] %v8316_v47  ;;  %vm846_vm9 = vcmp.eq.s32.totalorder %v830_v6, 0 }
 0x2f2   :  { %v8356_v13 = vsel %vm846_vm9, 0.0, %v7792_v28 }
 0x2f3   :  { %6322 = vmatmul.mubr.msk.bf16.gmra.mrb[20].mxu1 %vm884_vm0, %v8161_v9  ;;  %10650 = vst [vmem:[#allocation51_spill] sm:$0xff] %v8356_v13 }
 0x2f4   :  { %6325 = vmatprep.mubr.msk.bf16.mxu1 %vm884_vm0, %v8181_v16  ;;  %v8235_v41 = vpop.trf.xlu0 }
 0x2f5   :  { %10631 = vst [vmem:[#allocation32_spill] sm:$0xff] %v8235_v41  ;;  %v1280_v24 = vpop.permute.xlu1 %1279 }
 0x2f8   :  { %v8239_v19 = vpop.trf.xlu0 }
 0x2f9   :  { %10632 = vst [vmem:[#allocation33_spill] sm:$0xff] %v8239_v19 }
 0x2fb   :  { %6326 = vmatmul.mubr.msk.bf16.gmra.mrb[24].mxu1 %vm884_vm0, %v8192_v3 }
 0x2fc   :  { %6329 = vmatprep.mubr.msk.bf16.mxu1 %vm884_vm0, %v8200_v58  ;;  %v8243_v20 = vpop.trf.xlu0 }
 0x2fd   :  { %10633 = vst [vmem:[#allocation34_spill] sm:$0xff] %v8243_v20  ;;  %v1282_v56 = vpop.permute.xlu1 %1281 }
 0x300   :  { %v8248_v23 = vpop.trf.xlu0 }
 0x301   :  { %10634 = vst [vmem:[#allocation35_spill] sm:$0xff] %v8248_v23 }
 0x303   :  { %6330 = vmatmul.mubr.msk.bf16.gmra.mrb[28].mxu1 %vm884_vm0, %v8208_v46 }
 0x304   :  { %6367 = vmatprep.mubr.msk.bf16.mxu1 %vm884_vm0, %v1272_v21  ;;  %v8252_v27 = vpop.trf.xlu0 }
 0x305   :  { %10635 = vst [vmem:[#allocation36_spill] sm:$0xff] %v8252_v27  ;;  %v1284_v36 = vpop.permute.xlu1 %1283 }
 0x308   :  { %v8255_v49 = vpop.trf.xlu0 }
 0x309   :  { %10636 = vst [vmem:[#allocation37_spill] sm:$0xff] %v8255_v49 }
 0x30b   :  { %6368 = vmatmul.mubr.msk.bf16.vlgmr.msra.gmra.mrb[32].mxu1 %vm884_vm0, %v1274_v48  ;;  %v8304_v48 = vsel %vm839_vm3, 0.0, %v7792_v28 }
 0x30c   :  { %6371 = vmatprep.mubr.msk.bf16.mxu1 %vm884_vm0, %v1276_v26  ;;  %v8258_v35 = vpop.trf.xlu0  ;;  %10644 = vst [vmem:[#allocation45_spill] sm:$0xff] %v8304_v48  ;;  %v808_v26 = vsub.s32 %v790_v40, %v8276_v44 }
 0x30d   :  { %10637 = vst [vmem:[#allocation38_spill] sm:$0xff] %v8258_v35  ;;  %v1286_v38 = vpop.permute.xlu1 %1285 }
 0x30e   :  { %v824_v51 = vand.u32 15, %v808_v26 }
 0x310   :  { %v8262_v15 = vpop.trf.xlu0  ;;  %vm840_vm7 = vcmp.eq.s32.totalorder %v824_v51, 0 }
 0x311   :  { %10638 = vst [vmem:[#allocation39_spill] sm:$0xff] %v8262_v15 }
 0x313   :  { %6372 = vmatmul.mubr.msk.bf16.gmra.mrb[36].mxu1 %vm884_vm0, %v1278_v30  ;;  %v826_v30 = vand.u32 15, %v810_v8  ;;  %v797_v8 = vadd.s32 88, %v8085_v22 }
 0x314   :  { %6375 = vmatprep.mubr.msk.bf16.mxu1 %vm884_vm0, %v1280_v24  ;;  %v8265_v39 = vpop.trf.xlu0  ;;  %v791_v24 = vadd.s32 40, %v8085_v22 }
 0x315   :  { %10639 = vst [vmem:[#allocation40_spill] sm:$0xff] %v8265_v39  ;;  %vm842_vm6 = vcmp.eq.s32.totalorder %v826_v30, 0  ;;  %v815_v51 = vsub.s32 %v797_v8, %v8276_v44 }
 0x316   :  { %v809_v11 = vsub.s32 %v791_v24, %v8276_v44  ;;  %v8329_v59 = vsel %vm842_vm6, 0.0, %v7792_v28 }
 0x317   :  { %10647 = vst [vmem:[#allocation48_spill] sm:$0xff] %v8329_v59 }
 0x318   :  { %v8267_v32 = vpop.trf.xlu0  ;;  %v825_v60 = vand.u32 15, %v809_v11 }
 0x319   :  { %10640 = vst [vmem:[#allocation41_spill] sm:$0xff] %v8267_v32 }
 0x31a   :  { %vm841_vm8 = vcmp.eq.s32.totalorder %v825_v60, 0 }
 0x31b   :  { %6376 = vmatmul.mubr.msk.bf16.gmra.mrb[40].mxu1 %vm884_vm0, %v1282_v56  ;;  %v8347_v24 = vsel %vm841_vm8, 0.0, %v7792_v28 }
 0x31c   :  { %6379 = vmatprep.mubr.msk.bf16.mxu1 %vm884_vm0, %v1284_v36  ;;  %v8269_v57 = vpop.trf.xlu0  ;;  %v8310_v36 = vsel %vm843_vm4, 0.0, %v7792_v28  ;;  %10649 = vst [vmem:[#allocation50_spill] sm:$0xff] %v8347_v24 }
 0x31d   :  { %10641 = vst [vmem:[#allocation42_spill] sm:$0xff] %v8269_v57  ;;  %10645 = vst [vmem:[#allocation46_spill] sm:$0xff] %v8310_v36 }
 0x323   :  { %6380 = vmatmul.mubr.msk.bf16.gmra.mrb[44].mxu1 %vm884_vm0, %v1286_v38 }
 0x337   :  { %v8271_v42 = vpop.permute.xlu0 %1568 }
 0x338   :  { %6383 = vmatprep.subr.bf16.mxu0 %v8271_v42 }
 0x3be   :  { %v6319_v62 = vpop.f32.mrb[16].mxu1 }
 0x3bf   :  { %v8292_v14 = vadd.f32 %v6319_v62, %v8287_v17  ;;  %v943_v33 = vpop.f32.mrb[17].mxu1 }
 0x3c0   :  { %v6320_v1 = vpop.f32.mrb[18].mxu1  ;;  %v8301_v21 = vadd.f32 %v943_v33, %v8295_v0 }
 0x3c1   :  { %v946_v7 = vpop.f32.mrb[19].mxu1  ;;  %1010 = vmax.xlane.f32.xlu1 %v8292_v14  ;;  %v8313_v38 = vadd.f32 %v6320_v1, %v8304_v48  ;;  %v8338_v1 = vsel %vm840_vm7, 0.0, %v7792_v28 }
 0x3c2   :  { %v8325_v55 = vadd.f32 %v946_v7, %v8316_v47  ;;  %10648 = vst [vmem:[#allocation49_spill] sm:$0xff] %v8338_v1  ;;  %v812_v7 = vsub.s32 %v794_v61, %v8276_v44  ;;  %v831_v61 = vand.u32 15, %v815_v51 }
 0x3c4   :  { %vm847_vm11 = vcmp.eq.s32.totalorder %v831_v61, 0 }
 0x3c5   :  { %1006 = vmax.xlane.f32.xlu1 %v8301_v21  ;;  %v8374_v35 = vsel %vm847_vm11, 0.0, %v7792_v28 }
 0x3c6   :  { %v6323_v56 = vpop.f32.mrb[20].mxu1  ;;  %10652 = vst [vmem:[#allocation53_spill] sm:$0xff] %v8374_v35 }
 0x3c7   :  { %v959_v43 = vpop.f32.mrb[21].mxu1  ;;  %v8335_v33 = vadd.f32 %v6323_v56, %v8329_v59  ;;  %v828_v56 = vand.u32 15, %v812_v7  ;;  %v800_v7 = vadd.s32 112, %v8085_v22 }
 0x3c8   :  { %v6324_v25 = vpop.f32.mrb[22].mxu1  ;;  %v8344_v30 = vadd.f32 %v959_v43, %v8338_v1 }
 0x3c9   :  { %v8319_v4 = vadd.f32 %v6324_v25, %v8310_v36  ;;  %v962_v52 = vpop.f32.mrb[23].mxu1  ;;  %1012 = vmax.xlane.f32.xlu1 %v8313_v38  ;;  %v795_v25 = vadd.s32 72, %v8085_v22  ;;  %vm844_vm10 = vcmp.eq.s32.totalorder %v828_v56, 0  ;;  %v818_v39 = vsub.s32 %v800_v7, %v8276_v44 }
 0x3ca   :  { %v8353_v53 = vadd.f32 %v962_v52, %v8347_v24  ;;  %v8365_v52 = vsel %vm844_vm10, 0.0, %v7792_v28  ;;  %v798_v56 = vadd.s32 96, %v8085_v22 }
 0x3cb   :  { %1020 = vmax.xlane.f32.xlu0 %v8319_v4  ;;  %v813_v6 = vsub.s32 %v795_v25, %v8276_v44  ;;  %10651 = vst [vmem:[#allocation52_spill] sm:$0xff] %v8365_v52  ;;  %v834_v49 = vand.u32 15, %v818_v39 }
 0x3cc   :  { %v816_v61 = vsub.s32 %v798_v56, %v8276_v44 }
 0x3cd   :  { %1008 = vmax.xlane.f32.xlu1 %v8325_v55  ;;  %v829_v32 = vand.u32 15, %v813_v6  ;;  %v801_v6 = vadd.s32 120, %v8085_v22  ;;  %vm850_vm13 = vcmp.eq.s32.totalorder %v834_v49, 0 }
 0x3ce   :  { %v6327_v62 = vpop.f32.mrb[24].mxu1  ;;  %v832_v23 = vand.u32 15, %v816_v61  ;;  %v8395_v63 = vsel %vm850_vm13, 0.0, %v7792_v28 }
 0x3cf   :  { %v975_v5 = vpop.f32.mrb[25].mxu1  ;;  %v8362_v57 = vadd.f32 %v6327_v62, %v8356_v13  ;;  %vm845_vm12 = vcmp.eq.s32.totalorder %v829_v32, 0  ;;  %v819_v20 = vsub.s32 %v801_v6, %v8276_v44  ;;  %v799_v32 = vadd.s32 104, %v8085_v22  ;;  %10654 = vst [vmem:[#allocation55_spill] sm:$0xff] %v8395_v63 }
 0x3d0   :  { %v6328_v40 = vpop.f32.mrb[26].mxu1  ;;  %v8371_v25 = vadd.f32 %v975_v5, %v8365_v52  ;;  %v8383_v5 = vsel %vm845_vm12, 0.0, %v7792_v28  ;;  %vm848_vm14 = vcmp.eq.s32.totalorder %v832_v23, 0 }
 0x3d1   :  { %v978_v26 = vpop.f32.mrb[27].mxu1  ;;  %1018 = vmax.xlane.f32.xlu1 %v8335_v33  ;;  %v8380_v27 = vadd.f32 %v6328_v40, %v8374_v35  ;;  %10653 = vst [vmem:[#allocation54_spill] sm:$0xff] %v8383_v5  ;;  %v835_v49 = vand.u32 15, %v819_v20  ;;  %v817_v61 = vsub.s32 %v799_v32, %v8276_v44 }
 0x3d2   :  { %v8389_v56 = vadd.f32 %v978_v26, %v8383_v5 }
 0x3d3   :  { %vm851_vm15 = vcmp.eq.s32.totalorder %v835_v49, 0  ;;  %v833_v50 = vand.u32 15, %v817_v61 }
 0x3d4   :  { %v8418_v32 = vsel %vm851_vm15, 0.0, %v7792_v28 }
 0x3d5   :  { %1014 = vmax.xlane.f32.xlu1 %v8344_v30  ;;  %10656 = vst [vmem:[#allocation57_spill] sm:$0xff] %v8418_v32  ;;  %vm849_vm1 = vcmp.eq.s32.totalorder %v833_v50, 0 }
 0x3d6   :  { %v6331_v11 = vpop.f32.mrb[28].mxu1  ;;  %v8429_v61 = vsel %vm849_vm1, 0.0, %v7792_v28 }
 0x3d7   :  { %v991_v60 = vpop.f32.mrb[29].mxu1  ;;  %v8401_v26 = vadd.f32 %v6331_v11, %v8395_v63  ;;  %10657 = vst [vmem:[#allocation58_spill] sm:$0xff] %v8429_v61 }
 0x3d8   :  { %v6332_v43 = vpop.f32.mrb[30].mxu1 }
 0x3d9   :  { %1016 = vmax.xlane.f32.xlu1 %v8353_v53  ;;  %v994_v8 = vpop.f32.mrb[31].mxu1  ;;  %v8423_v49 = vadd.f32 %v6332_v43, %v8418_v32 }
 0x3da   :  { %v8434_v50 = vadd.f32 %v994_v8, %v8429_v61 }
 0x3dd   :  { %1026 = vmax.xlane.f32.xlu1 %v8362_v57 }
 0x3de   :  { %v6369_v51 = vpop.f32.mrb[32].mxu1 }
 0x3df   :  { %v1345_v15 = vpop.f32.mrb[33].mxu1 }
 0x3e0   :  { %v6370_v62 = vpop.f32.mrb[34].mxu1  ;;  %v8450_v8 = vadd.f32 %v1345_v15, %v8295_v0 }
 0x3e1   :  { %1022 = vmax.xlane.f32.xlu1 %v8371_v25  ;;  %v1348_v7 = vpop.f32.mrb[35].mxu1 }
 0x3e5   :  { %1028 = vmax.xlane.f32.xlu1 %v8380_v27 }
 0x3e6   :  { %v6373_v39 = vpop.f32.mrb[36].mxu1 }
 0x3e7   :  { %v8392_v19 = vadd.f32 %v6373_v39, %v8329_v59  ;;  %v1361_v40 = vpop.f32.mrb[37].mxu1  ;;  %v8407_v39 = vsel %vm848_vm14, 0.0, %v7792_v28  ;;  %v8442_v28 = vadd.f32 %v6369_v51, %v8287_v17  ;;  %v8458_v51 = vadd.f32 %v1348_v7, %v8316_v47 }
 0x3e8   :  { %v6374_v45 = vpop.f32.mrb[38].mxu1  ;;  %v8404_v6 = vadd.f32 %v1361_v40, %v8338_v1  ;;  %10655 = vst [vmem:[#allocation56_spill] sm:$0xff] %v8407_v39  ;;  %v8412_v23 = vadd.f32 %v991_v60, %v8407_v39 }
 0x3e9   :  { %1024 = vmax.xlane.f32.xlu1 %v8389_v56  ;;  %1420 = vmax.xlane.f32.xlu0 %v8392_v19  ;;  %v1364_v22 = vpop.f32.mrb[39].mxu1 }
 0x3ea   :  { %v8466_v15 = vadd.f32 %v1364_v22, %v8347_v24 }
 0x3ed   :  { %1034 = vmax.xlane.f32.xlu1 %v8401_v26  ;;  %1416 = vmax.xlane.f32.xlu0 %v8404_v6 }
 0x3ee   :  { %v6377_v20 = vpop.f32.mrb[40].mxu1 }
 0x3ef   :  { %v8415_v44 = vadd.f32 %v6377_v20, %v8356_v13  ;;  %v1377_v11 = vpop.f32.mrb[41].mxu1 }
 0x3f0   :  { %v6378_v40 = vpop.f32.mrb[42].mxu1  ;;  %v8426_v60 = vadd.f32 %v1377_v11, %v8365_v52 }
 0x3f1   :  { %v1380_v2 = vpop.f32.mrb[43].mxu1  ;;  %1428 = vmax.xlane.f32.xlu0 %v8415_v44  ;;  %1030 = vmax.xlane.f32.xlu1 %v8412_v23 }
 0x3f2   :  { %v8474_v7 = vadd.f32 %v1380_v2, %v8383_v5  ;;  %v8491_v2 = vpop.permute.xlu0 %1572 }
 0x3f5   :  { %1424 = vmax.xlane.f32.xlu0 %v8426_v60  ;;  %1036 = vmax.xlane.f32.xlu1 %v8423_v49 }
 0x3f6   :  { %v6381_v20 = vpop.f32.mrb[44].mxu1 }
 0x3f7   :  { %v8437_v13 = vadd.f32 %v6381_v20, %v8395_v63  ;;  %v1393_v1 = vpop.f32.mrb[45].mxu1  ;;  %v8454_v20 = vadd.f32 %v6370_v62, %v8304_v48  ;;  %v8470_v62 = vadd.f32 %v6378_v40, %v8374_v35 }
 0x3f8   :  { %v6382_v43 = vpop.f32.mrb[46].mxu1  ;;  %v8445_v11 = vadd.f32 %v1393_v1, %v8407_v39  ;;  %v8462_v1 = vadd.f32 %v6374_v45, %v8310_v36  ;;  %v8485_v39 = vpop.permute.xlu1 %1570 }
 0x3f9   :  { %v1396_v59 = vpop.f32.mrb[47].mxu1  ;;  %1436 = vmax.xlane.f32.xlu0 %v8437_v13  ;;  %1032 = vmax.xlane.f32.xlu1 %v8434_v50  ;;  %v8478_v45 = vadd.f32 %v6382_v43, %v8418_v32 }
 0x3fa   :  { %v8482_v22 = vadd.f32 %v1396_v59, %v8429_v61  ;;  %v8495_v59 = vpop.permute.xlu0 %1574 }
 0x3fc   :  { %v8487_v40 = vpop.permute.xlu1 %1576 }
 0x3fd   :  { %1432 = vmax.xlane.f32.xlu0 %v8445_v11  ;;  %1412 = vmax.xlane.f32.xlu1 %v8442_v28 }
 0x400   :  { %v8489_v63 = vpop.permute.xlu1 %1578 }
 0x401   :  { %1408 = vmax.xlane.f32.xlu1 %v8450_v8 }
 0x405   :  { %1414 = vmax.xlane.f32.xlu1 %v8454_v20 }
 0x409   :  { %1410 = vmax.xlane.f32.xlu1 %v8458_v51 }
 0x40d   :  { %1422 = vmax.xlane.f32.xlu1 %v8462_v1 }
 0x411   :  { %1418 = vmax.xlane.f32.xlu1 %v8466_v15 }
 0x415   :  { %1430 = vmax.xlane.f32.xlu1 %v8470_v62 }
 0x419   :  { %1426 = vmax.xlane.f32.xlu1 %v8474_v7 }
 0x41d   :  { %1438 = vmax.xlane.f32.xlu1 %v8478_v45 }
 0x421   :  { %1434 = vmax.xlane.f32.xlu1 %v8482_v22 }
 0x44e   :  { %v1011_v5 = vpop.xlane.xlu1 %1010 }
 0x44f   :  { %v1040_v52 = vsub.f32 %v8292_v14, %v1011_v5 }
 0x451   :  { %v1058_v43 = vmul.f32 1.442695, %v1040_v52 }
 0x452   :  { %v1007_v32 = vpop.xlane.xlu1 %1006 }
 0x453   :  { %7102 = vpow2.f32 %v1058_v43  ;;  %v1038_v35 = vsub.f32 %v8301_v21, %v1007_v32 }
 0x455   :  { %v1054_v61 = vmul.f32 1.442695, %v1038_v35 }
 0x456   :  { %v1013_v24 = vpop.xlane.xlu1 %1012 }
 0x457   :  { %7104 = vpow2.f32 %v1054_v61  ;;  %v1041_v36 = vsub.f32 %v8313_v38, %v1013_v24 }
 0x458   :  { %v1021_v48 = vpop.xlane.xlu0 %1020 }
 0x459   :  { %v1060_v47 = vmul.f32 1.442695, %v1041_v36  ;;  %v1045_v0 = vsub.f32 %v8319_v4, %v1021_v48 }
 0x45a   :  { %v1009_v17 = vpop.xlane.xlu1 %1008 }
 0x45b   :  { %7106 = vpow2.f32 %v1060_v47  ;;  %v1039_v14 = vsub.f32 %v8325_v55, %v1009_v17  ;;  %v1068_v43 = vmul.f32 1.442695, %v1045_v0 }
 0x45d   :  { %v8500_v52 = vpop.eup %7102  ;;  %v1056_v5 = vmul.f32 1.442695, %v1039_v14 }
 0x45e   :  { %v1019_v21 = vpop.xlane.xlu1 %1018  ;;  %1090 = vadd.xlane.f32.xlu0 %v8500_v52 }
 0x45f   :  { %7108 = vpow2.f32 %v1056_v5  ;;  %v1044_v35 = vsub.f32 %v8335_v33, %v1019_v21 }
 0x460   :  { %7110 = vpow2.f32 %v1068_v43 }
 0x461   :  { %v8504_v32 = vpop.eup %7104  ;;  %v1066_v38 = vmul.f32 1.442695, %v1044_v35 }
 0x462   :  { %v1015_v36 = vpop.xlane.xlu1 %1014  ;;  %1086 = vadd.xlane.f32.xlu0 %v8504_v32 }
 0x463   :  { %7112 = vpow2.f32 %v1066_v38  ;;  %v1042_v17 = vsub.f32 %v8344_v30, %v1015_v36 }
 0x465   :  { %v8508_v48 = vpop.eup %7106  ;;  %v1062_v47 = vmul.f32 1.442695, %v1042_v17 }
 0x466   :  { %v1017_v0 = vpop.xlane.xlu1 %1016  ;;  %1092 = vadd.xlane.f32.xlu1 %v8508_v48 }
 0x467   :  { %7114 = vpow2.f32 %v1062_v47  ;;  %v1043_v4 = vsub.f32 %v8353_v53, %v1017_v0 }
 0x469   :  { %v8512_v55 = vpop.eup %7108  ;;  %v1064_v33 = vmul.f32 1.442695, %v1043_v4 }
 0x46a   :  { %v1027_v24 = vpop.xlane.xlu1 %1026  ;;  %1088 = vadd.xlane.f32.xlu1 %v8512_v55  ;;  %v8516_v14 = vpop.eup %7110 }
 0x46b   :  { %7116 = vpow2.f32 %v1064_v33  ;;  %v1048_v61 = vsub.f32 %v8362_v57, %v1027_v24 }
 0x46d   :  { %v8518_v30 = vpop.eup %7112  ;;  %v1074_v5 = vmul.f32 1.442695, %v1048_v61 }
 0x46e   :  { %v1023_v43 = vpop.xlane.xlu1 %1022  ;;  %1098 = vadd.xlane.f32.xlu0 %v8518_v30  ;;  %1100 = vadd.xlane.f32.xlu1 %v8516_v14 }
 0x46f   :  { %7118 = vpow2.f32 %v1074_v5  ;;  %v1046_v53 = vsub.f32 %v8371_v25, %v1023_v43 }
 0x471   :  { %v8523_v21 = vpop.eup %7114  ;;  %v1070_v35 = vmul.f32 1.442695, %v1046_v53 }
 0x472   :  { %v1029_v38 = vpop.xlane.xlu1 %1028  ;;  %1094 = vadd.xlane.f32.xlu0 %v8523_v21 }
 0x473   :  { %7120 = vpow2.f32 %v1070_v35  ;;  %v1049_v57 = vsub.f32 %v8380_v27, %v1029_v38 }
 0x475   :  { %v8527_v36 = vpop.eup %7116  ;;  %v1076_v17 = vmul.f32 1.442695, %v1049_v57 }
 0x476   :  { %v1025_v47 = vpop.xlane.xlu1 %1024  ;;  %1096 = vadd.xlane.f32.xlu1 %v8527_v36 }
 0x477   :  { %7122 = vpow2.f32 %v1076_v17  ;;  %v1047_v0 = vsub.f32 %v8389_v56, %v1025_v47 }
 0x479   :  { %v8531_v4 = vpop.eup %7118  ;;  %v1072_v25 = vmul.f32 1.442695, %v1047_v0 }
 0x47a   :  { %v1035_v33 = vpop.xlane.xlu1 %1034  ;;  %1106 = vadd.xlane.f32.xlu0 %v8531_v4 }
 0x47b   :  { %7124 = vpow2.f32 %v1072_v25  ;;  %v1052_v24 = vsub.f32 %v8401_v26, %v1035_v33  ;;  %v1421_v25 = vpop.xlane.xlu0 %1420 }
 0x47d   :  { %v8535_v61 = vpop.eup %7120  ;;  %v1082_v27 = vmul.f32 1.442695, %v1052_v24 }
 0x47e   :  { %1102 = vadd.xlane.f32.xlu0 %v8535_v61  ;;  %v1031_v5 = vpop.xlane.xlu1 %1030 }
 0x47f   :  { %7126 = vpow2.f32 %v1082_v27  ;;  %v1050_v43 = vsub.f32 %v8412_v23, %v1031_v5 }
 0x481   :  { %v8539_v53 = vpop.eup %7122  ;;  %v1078_v56 = vmul.f32 1.442695, %v1050_v43 }
 0x482   :  { %1108 = vadd.xlane.f32.xlu1 %v8539_v53  ;;  %v1037_v35 = vpop.xlane.xlu1 %1036 }
 0x483   :  { %v1053_v38 = vsub.f32 %v8423_v49, %v1037_v35  ;;  %7128 = vpow2.f32 %v1078_v56 }
 0x485   :  { %v8543_v57 = vpop.eup %7124  ;;  %v1084_v26 = vmul.f32 1.442695, %v1053_v38 }
 0x486   :  { %1104 = vadd.xlane.f32.xlu1 %v8543_v57  ;;  %v1033_v17 = vpop.xlane.xlu1 %1032 }
 0x487   :  { %v1051_v47 = vsub.f32 %v8434_v50, %v1033_v17  ;;  %7130 = vpow2.f32 %v1084_v26  ;;  %v1417_v50 = vpop.xlane.xlu0 %1416 }
 0x489   :  { %v8547_v0 = vpop.eup %7126  ;;  %v1080_v23 = vmul.f32 1.442695, %v1051_v47 }
 0x48a   :  { %1114 = vadd.xlane.f32.xlu0 %v8547_v0  ;;  %v1413_v33 = vpop.xlane.xlu1 %1412 }
 0x48b   :  { %v1442_v24 = vsub.f32 %v8442_v28, %v1413_v33  ;;  %7132 = vpow2.f32 %v1080_v23  ;;  %v1429_v47 = vpop.xlane.xlu0 %1428 }
 0x48d   :  { %v1460_v49 = vmul.f32 1.442695, %v1442_v24  ;;  %v8551_v27 = vpop.eup %7128 }
 0x48e   :  { %v1409_v5 = vpop.xlane.xlu1 %1408  ;;  %1110 = vadd.xlane.f32.xlu0 %v8551_v27 }
 0x48f   :  { %v1440_v43 = vsub.f32 %v8450_v8, %v1409_v5  ;;  %7134 = vpow2.f32 %v1460_v49  ;;  %v1425_v5 = vpop.xlane.xlu0 %1424 }
 0x491   :  { %v1456_v56 = vmul.f32 1.442695, %v1440_v43  ;;  %v8555_v35 = vpop.eup %7130 }
 0x492   :  { %v1415_v38 = vpop.xlane.xlu1 %1414  ;;  %1116 = vadd.xlane.f32.xlu1 %v8555_v35 }
 0x493   :  { %7136 = vpow2.f32 %v1456_v56  ;;  %v1443_v28 = vsub.f32 %v8454_v20, %v1415_v38 }
 0x495   :  { %v1462_v26 = vmul.f32 1.442695, %v1443_v28  ;;  %v8559_v17 = vpop.eup %7132 }
 0x496   :  { %v1411_v23 = vpop.xlane.xlu1 %1410  ;;  %1112 = vadd.xlane.f32.xlu1 %v8559_v17 }
 0x497   :  { %7138 = vpow2.f32 %v1462_v26  ;;  %v1441_v8 = vsub.f32 %v8458_v51, %v1411_v23  ;;  %v1437_v26 = vpop.xlane.xlu0 %1436 }
 0x499   :  { %v1458_v33 = vmul.f32 1.442695, %v1441_v8  ;;  %v8563_v24 = vpop.eup %7134 }
 0x49a   :  { %10658 = vst [vmem:[#allocation59_spill] sm:$0xff] %v8563_v24  ;;  %v1423_v49 = vpop.xlane.xlu1 %1422  ;;  %1492 = vadd.xlane.f32.xlu1 %v8563_v24 }
 0x49b   :  { %7140 = vpow2.f32 %v1458_v33  ;;  %v1454_v33 = vsub.f32 %v8437_v13, %v1437_v26 }
 0x49d   :  { %v8566_v43 = vpop.eup %7136 }
 0x49e   :  { %v1419_v20 = vpop.xlane.xlu1 %1418  ;;  %1488 = vadd.xlane.f32.xlu1 %v8566_v43 }
 0x49f   :  { %v1445_v56 = vsub.f32 %v8466_v15, %v1419_v20  ;;  %v1433_v20 = vpop.xlane.xlu0 %1432 }
 0x4a0   :  { %v1452_v41 = vsub.f32 %v8445_v11, %v1433_v20 }
 0x4a1   :  { %v8570_v38 = vpop.eup %7138  ;;  %v1466_v28 = vmul.f32 1.442695, %v1445_v56  ;;  %v1484_v56 = vmul.f32 1.442695, %v1454_v33 }
 0x4a2   :  { %v1431_v51 = vpop.xlane.xlu1 %1430  ;;  %1494 = vadd.xlane.f32.xlu1 %v8570_v38  ;;  %v1480_v10 = vmul.f32 1.442695, %v1452_v41 }
 0x4a3   :  { %7142 = vpow2.f32 %v1466_v28 }
 0x4a4   :  { %1580 = vrot.lane.b32.xlu0 %v8175_v34, %s7791_s4  ;;  %v1446_v34 = vsub.f32 %v8392_v19, %v1421_v25 }
 0x4a5   :  { %v8573_v23 = vpop.eup %7140 }
 0x4a6   :  { %v1427_v8 = vpop.xlane.xlu1 %1426  ;;  %1490 = vadd.xlane.f32.xlu1 %v8573_v23  ;;  %v1468_v26 = vmul.f32 1.442695, %v1446_v34 }
 0x4a7   :  { %v1449_v15 = vsub.f32 %v8474_v7, %v1427_v8  ;;  %v1444_v7 = vsub.f32 %v8404_v6, %v1417_v50  ;;  %v1448_v6 = vsub.f32 %v8426_v60, %v1425_v5  ;;  %v1451_v50 = vsub.f32 %v8470_v62, %v1431_v51 }
 0x4a9   :  { %v1474_v24 = vmul.f32 1.442695, %v1449_v15  ;;  %v1464_v11 = vmul.f32 1.442695, %v1444_v7 }
 0x4aa   :  { %v1439_v34 = vpop.xlane.xlu1 %1438 }
 0x4ab   :  { %7144 = vpow2.f32 %v1474_v24  ;;  %v1447_v24 = vsub.f32 %v8462_v1, %v1423_v49  ;;  %v1472_v1 = vmul.f32 1.442695, %v1448_v6  ;;  %v1455_v60 = vsub.f32 %v8478_v45, %v1439_v34 }
 0x4ac   :  { %7146 = vpow2.f32 %v1484_v56 }
 0x4ad   :  { %v8581_v28 = vpop.eup %7142  ;;  %7148 = vpow2.f32 %v1480_v10  ;;  %v1450_v10 = vsub.f32 %v8415_v44, %v1429_v47  ;;  %v1470_v41 = vmul.f32 1.442695, %v1447_v24  ;;  %v1478_v44 = vmul.f32 1.442695, %v1451_v50 }
 0x4ae   :  { %1498 = vadd.xlane.f32.xlu1 %v8581_v28  ;;  %7150 = vpow2.f32 %v1468_v26  ;;  %v1435_v49 = vpop.xlane.xlu1 %1434  ;;  %v1486_v62 = vmul.f32 1.442695, %v1455_v60 }
 0x4af   :  { %7152 = vpow2.f32 %v1464_v11  ;;  %v1476_v19 = vmul.f32 1.442695, %v1450_v10  ;;  %v1453_v47 = vsub.f32 %v8482_v22, %v1435_v49 }
 0x4b0   :  { %7154 = vpow2.f32 %v1470_v41 }
 0x4b1   :  { %7156 = vpow2.f32 %v1476_v19  ;;  %v1482_v5 = vmul.f32 1.442695, %v1453_v47 }
 0x4b2   :  { %7158 = vpow2.f32 %v1472_v1 }
 0x4b3   :  { %7160 = vpow2.f32 %v1478_v44 }
 0x4b4   :  { %7162 = vpow2.f32 %v1482_v5 }
 0x4b5   :  { %v8585_v13 = vpop.eup %7144  ;;  %7164 = vpow2.f32 %v1486_v62 }
 0x4b6   :  { %1506 = vadd.xlane.f32.xlu1 %v8585_v13  ;;  %v8589_v8 = vpop.eup %7146 }
 0x4b7   :  { %v8593_v33 = vpop.eup %7148 }
 0x4b8   :  { %v8598_v25 = vpop.eup %7150 }
 0x4b9   :  { %v8602_v15 = vpop.eup %7152 }
 0x4ba   :  { %1516 = vadd.xlane.f32.xlu1 %v8589_v8  ;;  %v8606_v20 = vpop.eup %7154 }
 0x4bb   :  { %v8610_v56 = vpop.eup %7156 }
 0x4bc   :  { %v8615_v51 = vpop.eup %7158 }
 0x4bd   :  { %v8620_v45 = vpop.eup %7160 }
 0x4be   :  { %1512 = vadd.xlane.f32.xlu1 %v8593_v33  ;;  %v8625_v22 = vpop.eup %7162 }
 0x4bf   :  { %v8630_v26 = vpop.eup %7164 }
 0x4c3   :  { %1500 = vadd.xlane.f32.xlu0 %v8598_v25 }
 0x4c7   :  { %1496 = vadd.xlane.f32.xlu0 %v8602_v15 }
 0x4cb   :  { %1502 = vadd.xlane.f32.xlu0 %v8606_v20 }
 0x4cf   :  { %1582 = vrot.lane.b32.xlu1 %v8172_v12, %s7791_s4  ;;  %1508 = vadd.xlane.f32.xlu0 %v8610_v56 }
 0x4d3   :  { %1953 = vrot.lane.b32.xlu1 %v8121_v37, %s7793_s16  ;;  %1504 = vadd.xlane.f32.xlu0 %v8615_v51 }
 0x4d7   :  { %1955 = vrot.lane.b32.xlu1 %v8141_v54, %s7793_s16  ;;  %1510 = vadd.xlane.f32.xlu0 %v8620_v45 }
 0x4db   :  { %1959 = vrot.lane.b32.xlu1 %v8181_v16, %s7793_s16  ;;  %1514 = vadd.xlane.f32.xlu0 %v8625_v22 }
 0x4df   :  { %1963 = vrot.lane.b32.xlu1 %v8200_v58, %s7793_s16  ;;  %1518 = vadd.xlane.f32.xlu0 %v8630_v26 }
 0x4e3   :  { %2242 = vrot.lane.b32.xlu1 %v8113_v29, %s7793_s16 }
 0x4eb   :  { %v1091_v7 = vpop.xlane.xlu0 %1090 }
 0x4ef   :  { %v1087_v11 = vpop.xlane.xlu0 %1086 }
 0x4f3   :  { %v1093_v24 = vpop.xlane.xlu1 %1092 }
 0x4f4   :  { %7166 = vrcp.f32 %v1093_v24 }
 0x4f5   :  { %7168 = vrcp.f32 %v1087_v11  ;;  %1951 = vrot.lane.b32.xlu0 %v8102_v18, %s7793_s16 }
 0x4f6   :  { %7170 = vrcp.f32 %v1091_v7 }
 0x4f7   :  { %v1089_v10 = vpop.xlane.xlu1 %1088 }
 0x4f8   :  { %7172 = vrcp.f32 %v1089_v10 }
 0x4f9   :  { %1957 = vrot.lane.b32.xlu0 %v8161_v9, %s7793_s16 }
 0x4fb   :  { %v1099_v41 = vpop.xlane.xlu0 %1098  ;;  %v1101_v34 = vpop.xlane.xlu1 %1100 }
 0x4fc   :  { %7174 = vrcp.f32 %v1099_v41 }
 0x4fd   :  { %1961 = vrot.lane.b32.xlu0 %v8192_v3, %s7793_s16  ;;  %7176 = vrcp.f32 %v1101_v34 }
 0x4fe   :  { %v7167_v19 = vpop.eup %7166 }
 0x4ff   :  { %v1095_v6 = vpop.xlane.xlu0 %1094  ;;  %v7169_v1 = vpop.eup %7168  ;;  %v1137_v44 = vmul.f32 %v7167_v19, %v8508_v48 }
 0x500   :  { %v7171_v50 = vpop.eup %7170  ;;  %7178 = vrcp.f32 %v1095_v6  ;;  %v1134_v60 = vmul.f32 %v7169_v1, %v8504_v32 }
 0x501   :  { %1965 = vrot.lane.b32.xlu0 %v8208_v46, %s7793_s16  ;;  %v1136_v62 = vmul.f32 %v7171_v50, %v8500_v52 }
 0x502   :  { %v7173_v49 = vpop.eup %7172 }
 0x503   :  { %v1097_v47 = vpop.xlane.xlu1 %1096  ;;  %v1135_v5 = vmul.f32 %v7173_v49, %v8512_v55  ;;  %v1151_v11 = vpack.c.bf16 %v1137_v44, %v1136_v62 }
 0x504   :  { %7180 = vrcp.f32 %v1097_v47 }
 0x505   :  { %v1150_v7 = vpack.c.bf16 %v1135_v5, %v1134_v60  ;;  %2240 = vrot.lane.b32.xlu0 %v8115_v31, %s7793_s16 }
 0x506   :  { %v7175_v24 = vpop.eup %7174 }
 0x507   :  { %6349 = vmatprep.mubr.bf16.mxu0 %v1150_v7  ;;  %v1107_v48 = vpop.xlane.xlu0 %1106  ;;  %v7177_v10 = vpop.eup %7176  ;;  %v1140_v52 = vmul.f32 %v7175_v24, %v8518_v30 }
 0x508   :  { %6350 = vmatmul.mubr.bf16.vlgmr.msra.gmra.mrb[32].mxu0 %v1151_v11  ;;  %v1141_v41 = vmul.f32 %v7177_v10, %v8516_v14 }
 0x509   :  { %6384 = vmatpush3.bf16.msra.mxu0 %v8271_v42 }
 0x50a   :  { %6385 = vmatprep.subr.bf16.mxu0 %v8485_v39  ;;  %v7179_v32 = vpop.eup %7178 }
 0x50b   :  { %v1103_v34 = vpop.xlane.xlu0 %1102  ;;  %v1138_v6 = vmul.f32 %v7179_v32, %v8523_v21 }
 0x50d   :  { %6386 = vmatpush3.bf16.msra.mxu0 %v8485_v39  ;;  %v1153_v39 = vpack.c.bf16 %v1141_v41, %v1140_v52 }
 0x50e   :  { %v7181_v55 = vpop.eup %7180  ;;  %6387 = vmatprep.subr.bf16.mxu0 %v8491_v2 }
 0x50f   :  { %v1109_v19 = vpop.xlane.xlu1 %1108  ;;  %v1139_v42 = vmul.f32 %v7181_v55, %v8527_v36 }
 0x510   :  { %7182 = vrcp.f32 %v1109_v19 }
 0x511   :  { %6388 = vmatpush3.bf16.msra.mxu0 %v8491_v2  ;;  %v1152_v1 = vpack.c.bf16 %v1139_v42, %v1138_v6  ;;  %7184 = vrcp.f32 %v1103_v34 }
 0x512   :  { %6389 = vmatprep.subr.bf16.mxu0 %v8495_v59  ;;  %7186 = vrcp.f32 %v1107_v48 }
 0x513   :  { %6353 = vmatprep.mubr.bf16.mxu0 %v1152_v1  ;;  %v1105_v50 = vpop.xlane.xlu1 %1104 }
 0x514   :  { %7188 = vrcp.f32 %v1105_v50  ;;  %6354 = vmatmul.mubr.bf16.gmra.mrb[36].mxu0 %v1153_v39 }
 0x515   :  { %6390 = vmatpush3.bf16.msra.mxu0 %v8495_v59 }
 0x516   :  { %6391 = vmatprep.subr.bf16.mxu0 %v8487_v40 }
 0x517   :  { %v1115_v14 = vpop.xlane.xlu0 %1114 }
 0x519   :  { %6392 = vmatpush3.bf16.msra.mxu0 %v8487_v40 }
 0x51a   :  { %6393 = vmatprep.subr.bf16.mxu0 %v8489_v63  ;;  %v7183_v2 = vpop.eup %7182 }
 0x51b   :  { %v7185_v30 = vpop.eup %7184  ;;  %v1111_v21 = vpop.xlane.xlu0 %1110  ;;  %v1145_v44 = vmul.f32 %v7183_v2, %v8539_v53 }
 0x51c   :  { %v7187_v36 = vpop.eup %7186  ;;  %v1142_v47 = vmul.f32 %v7185_v30, %v8535_v61 }
 0x51d   :  { %6394 = vmatpush3.bf16.msra.mxu0 %v8489_v63  ;;  %v1144_v62 = vmul.f32 %v7187_v36, %v8531_v4  ;;  %v10659_v36 = vld [vmem:[#allocation31_spill] sm:$0xff] }
 0x51e   :  { %v7189_v49 = vpop.eup %7188 }
 0x51f   :  { %v1143_v59 = vmul.f32 %v7189_v49, %v8543_v57  ;;  %v1581_v60 = vpop.permute.xlu0 %1580  ;;  %v1117_v5 = vpop.xlane.xlu1 %1116  ;;  %v1155_v7 = vpack.c.bf16 %v1145_v44, %v1144_v62  ;;  %v10660_v49 = vld [vmem:[#allocation32_spill] sm:$0xff] }
 0x520   :  { %6395 = vmatprep.subr.bf16.mxu0 %v1581_v60  ;;  %7190 = vrcp.f32 %v1117_v5  ;;  %v779_v44 = vpack.c.bf16 %v10660_v49, %v10659_v36 }
 0x521   :  { %v1154_v40 = vpack.c.bf16 %v1143_v59, %v1142_v47  ;;  %6396 = vmatpush3.bf16.msra.mxu0 %v1581_v60  ;;  %7192 = vrcp.f32 %v1111_v21  ;;  %v10661_v47 = vld [vmem:[#allocation59_spill] sm:$0xff] }
 0x522   :  { %7194 = vrcp.f32 %v1115_v14 }
 0x523   :  { %6357 = vmatprep.mubr.bf16.mxu0 %v1154_v40  ;;  %v1113_v63 = vpop.xlane.xlu1 %1112 }
 0x524   :  { %6358 = vmatmul.mubr.bf16.gmra.mrb[40].mxu0 %v1155_v7  ;;  %7196 = vrcp.f32 %v1113_v63 }
 0x527   :  { %v1493_v53 = vpop.xlane.xlu1 %1492 }
 0x52a   :  { %v7191_v11 = vpop.eup %7190 }
 0x52b   :  { %v1489_v61 = vpop.xlane.xlu1 %1488  ;;  %v7193_v48 = vpop.eup %7192  ;;  %v1149_v10 = vmul.f32 %v7191_v11, %v8555_v35 }
 0x52c   :  { %v7195_v57 = vpop.eup %7194  ;;  %v1146_v32 = vmul.f32 %v7193_v48, %v8551_v27  ;;  %7198 = vrcp.f32 %v1489_v61 }
 0x52d   :  { %v1148_v52 = vmul.f32 %v7195_v57, %v8547_v0 }
 0x52e   :  { %v7197_v24 = vpop.eup %7196 }
 0x52f   :  { %v1495_v4 = vpop.xlane.xlu1 %1494  ;;  %v1147_v55 = vmul.f32 %v7197_v24, %v8559_v17  ;;  %v1157_v34 = vpack.c.bf16 %v1149_v10, %v1148_v52 }
 0x531   :  { %v1156_v41 = vpack.c.bf16 %v1147_v55, %v1146_v32 }
 0x533   :  { %6361 = vmatprep.mubr.bf16.mxu0 %v1156_v41  ;;  %v1491_v19 = vpop.xlane.xlu1 %1490 }
 0x534   :  { %7200 = vrcp.f32 %v1491_v19  ;;  %6362 = vmatmul.mubr.bf16.gmra.mrb[44].mxu0 %v1157_v34 }
 0x535   :  { %7202 = vrcp.f32 %v1495_v4 }
 0x536   :  { %v7199_v6 = vpop.eup %7198  ;;  %7204 = vrcp.f32 %v1493_v53 }
 0x537   :  { %v1536_v39 = vmul.f32 %v7199_v6, %v8566_v43 }
 0x53b   :  { %v1499_v1 = vpop.xlane.xlu1 %1498 }
 0x53c   :  { %7206 = vrcp.f32 %v1499_v1 }
 0x53e   :  { %v7201_v42 = vpop.eup %7200 }
 0x53f   :  { %v1537_v35 = vmul.f32 %v7201_v42, %v8573_v23  ;;  %v7203_v50 = vpop.eup %7202 }
 0x540   :  { %v7205_v2 = vpop.eup %7204  ;;  %v1539_v30 = vmul.f32 %v7203_v50, %v8570_v38 }
 0x541   :  { %v1552_v27 = vpack.c.bf16 %v1537_v35, %v1536_v39  ;;  %v1538_v59 = vmul.f32 %v7205_v2, %v10661_v47 }
 0x543   :  { %v1507_v17 = vpop.xlane.xlu1 %1506  ;;  %6399 = vmatprep.mubr.bf16.mxu0 %v1552_v27  ;;  %v1553_v23 = vpack.c.bf16 %v1539_v30, %v1538_v59 }
 0x546   :  { %v7207_v62 = vpop.eup %7206 }
 0x547   :  { %v1517_v0 = vpop.xlane.xlu1 %1516  ;;  %v1541_v53 = vmul.f32 %v7207_v62, %v8581_v28 }
 0x54b   :  { %v1513_v14 = vpop.xlane.xlu1 %1512 }
 0x54f   :  { %v1583_v21 = vpop.permute.xlu1 %1582 }
 0x550   :  { %6397 = vmatprep.subr.bf16.mxu0 %v1583_v21  ;;  %v1501_v43 = vpop.xlane.xlu0 %1500 }
 0x551   :  { %6398 = vmatpush3.bf16.msra.mxu0 %v1583_v21 }
 0x552   :  { %6451 = vmatprep.subr.bf16.mxu0 %v779_v44 }
 0x553   :  { %v1954_v19 = vpop.permute.xlu1 %1953 }
 0x554   :  { %6400 = vmatmul.mubr.bf16.vlgmr.msra.gmra.mrb[48].mxu0 %v1553_v23  ;;  %v1497_v60 = vpop.xlane.xlu0 %1496 }
 0x555   :  { %6452 = vmatpush3.bf16.msra.mxu0 %v779_v44  ;;  %7208 = vrcp.f32 %v1497_v60 }
 0x556   :  { %7210 = vrcp.f32 %v1501_v43 }
 0x558   :  { %v1503_v5 = vpop.xlane.xlu0 %1502 }
 0x559   :  { %7212 = vrcp.f32 %v1503_v5 }
 0x55a   :  { %7214 = vrcp.f32 %v1507_v17  ;;  %v1956_v17 = vpop.permute.xlu1 %1955 }
 0x55c   :  { %v1509_v38 = vpop.xlane.xlu0 %1508 }
 0x55f   :  { %v7209_v40 = vpop.eup %7208 }
 0x560   :  { %v1505_v7 = vpop.xlane.xlu0 %1504  ;;  %v1540_v63 = vmul.f32 %v7209_v40, %v8602_v15  ;;  %v7211_v11 = vpop.eup %7210 }
 0x561   :  { %7216 = vrcp.f32 %v1505_v7  ;;  %v1542_v24 = vmul.f32 %v7211_v11, %v8598_v25 }
 0x562   :  { %v1554_v61 = vpack.c.bf16 %v1541_v53, %v1540_v63  ;;  %7218 = vrcp.f32 %v1509_v38 }
 0x563   :  { %v7213_v48 = vpop.eup %7212 }
 0x564   :  { %v1511_v57 = vpop.xlane.xlu0 %1510  ;;  %6403 = vmatprep.mubr.bf16.mxu0 %v1554_v61  ;;  %v1543_v10 = vmul.f32 %v7213_v48, %v8606_v20  ;;  %v7215_v55 = vpop.eup %7214 }
 0x565   :  { %7220 = vrcp.f32 %v1511_v57  ;;  %v1545_v41 = vmul.f32 %v7215_v55, %v8585_v13 }
 0x566   :  { %v1555_v4 = vpack.c.bf16 %v1543_v10, %v1542_v24  ;;  %7222 = vrcp.f32 %v1513_v14 }
 0x568   :  { %v1515_v32 = vpop.xlane.xlu0 %1514  ;;  %6404 = vmatmul.mubr.bf16.gmra.mrb[52].mxu0 %v1555_v4 }
 0x569   :  { %7224 = vrcp.f32 %v1515_v32 }
 0x56a   :  { %7226 = vrcp.f32 %v1517_v0 }
 0x56b   :  { %v7217_v15 = vpop.eup %7216 }
 0x56c   :  { %v1519_v28 = vpop.xlane.xlu0 %1518  ;;  %v1544_v52 = vmul.f32 %v7217_v15, %v8615_v51  ;;  %v7219_v34 = vpop.eup %7218 }
 0x56d   :  { %7228 = vrcp.f32 %v1519_v28  ;;  %v1546_v42 = vmul.f32 %v7219_v34, %v8610_v56 }
 0x56e   :  { %v1556_v25 = vpack.c.bf16 %v1545_v41, %v1544_v52 }
 0x56f   :  { %v7221_v6 = vpop.eup %7220 }
 0x570   :  { %v1952_v20 = vpop.permute.xlu0 %1951  ;;  %6407 = vmatprep.mubr.bf16.mxu0 %v1556_v25  ;;  %v1547_v1 = vmul.f32 %v7221_v6, %v8620_v45  ;;  %v7223_v39 = vpop.eup %7222 }
 0x571   :  { %v1548_v51 = vmul.f32 %v7223_v39, %v8593_v33  ;;  %v1960_v45 = vpop.permute.xlu1 %1959 }
 0x572   :  { %v1557_v35 = vpack.c.bf16 %v1547_v1, %v1546_v42 }
 0x573   :  { %v7225_v27 = vpop.eup %7224 }
 0x574   :  { %v1958_v0 = vpop.permute.xlu0 %1957  ;;  %6408 = vmatmul.mubr.bf16.gmra.mrb[56].mxu0 %v1557_v35  ;;  %v1549_v13 = vmul.f32 %v7225_v27, %v8625_v22  ;;  %v7227_v50 = vpop.eup %7226  ;;  %v7055_v22 = vld [vmem:[#allocation7] sm:$0xff]  }
 0x575   :  { %v1550_v21 = vmul.f32 %v7227_v50, %v8589_v8  ;;  %v1964_v44 = vpop.permute.xlu1 %1963  ;;  %v7054_v8 = vld [vmem:[#allocation7 + $0x8] sm:$0xff]  }
 0x576   :  { %v1558_v14 = vpack.c.bf16 %v1549_v13, %v1548_v51  ;;  %6415 = vmatprep.subr.bf16.mxu1 %v7054_v8 }
 0x577   :  { %v7229_v2 = vpop.eup %7228  ;;  %6416 = vmatpush3.bf16.msra.mxu1 %v7054_v8 }
 0x578   :  { %v1962_v30 = vpop.permute.xlu0 %1961  ;;  %6411 = vmatprep.mubr.bf16.mxu0 %v1558_v14  ;;  %v1551_v56 = vmul.f32 %v7229_v2, %v8630_v26  ;;  %6433 = vmatprep.subr.bf16.mxu1 %v7055_v22 }
 0x579   :  { %v2243_v33 = vpop.permute.xlu1 %2242 }
 0x57a   :  { %v1559_v36 = vpack.c.bf16 %v1551_v56, %v1550_v21 }
 0x57c   :  { %v1966_v49 = vpop.permute.xlu0 %1965  ;;  %6412 = vmatmul.mubr.bf16.gmra.mrb[60].mxu0 %v1559_v36 }
 0x57d   :  { %6453 = vmatprep.mubr.msk.bf16.mxu0 %vm884_vm0, %v1952_v20 }
 0x580   :  { %v2241_v47 = vpop.permute.xlu0 %2240 }
 0x581   :  { %6469 = vmatprep.subr.bf16.mxu0 %v2241_v47 }
 0x584   :  { %6454 = vmatmul.mubr.msk.bf16.vlgmr.msra.gmra.mrb[64].mxu0 %vm884_vm0, %v1954_v19 }
 0x585   :  { %6470 = vmatpush3.bf16.msra.mxu0 %v2241_v47  ;;  %6457 = vmatprep.mubr.msk.bf16.mxu0 %vm884_vm0, %v1956_v17  ;;  %v10662_v47 = vld [vmem:[#allocation43_spill] sm:$0xff] }
 0x586   :  { %6471 = vmatprep.subr.bf16.mxu0 %v2243_v33 }
 0x589   :  { %6472 = vmatpush3.bf16.msra.mxu0 %v2243_v33 }
 0x58c   :  { %6458 = vmatmul.mubr.msk.bf16.gmra.mrb[68].mxu0 %vm884_vm0, %v1958_v0 }
 0x58d   :  { %6461 = vmatprep.mubr.msk.bf16.mxu0 %vm884_vm0, %v1960_v45 }
 0x594   :  { %6462 = vmatmul.mubr.msk.bf16.gmra.mrb[72].mxu0 %vm884_vm0, %v1962_v30 }
 0x595   :  { %6465 = vmatprep.mubr.msk.bf16.mxu0 %vm884_vm0, %v1964_v44 }
 0x59c   :  { %6466 = vmatmul.mubr.msk.bf16.gmra.mrb[76].mxu0 %vm884_vm0, %v1966_v49 }
 0x5db   :  { %v8700_v26 = vpop.f32.mrb[32].mxu0 }
 0x5dc   :  { %v1192_v59 = vpop.f32.mrb[33].mxu0 }
 0x5dd   :  { %v8702_v43 = vpop.f32.mrb[34].mxu0 }
 0x5de   :  { %v1256_v23 = vpack.c.bf16 %v8702_v43, %v8700_v26  ;;  %v1195_v60 = vpop.f32.mrb[35].mxu0  ;;  %v10669_v26 = vld [vmem:[#allocation50_spill] sm:$0xff] }
 0x5df   :  { %v1255_v5 = vpack.c.bf16 %v1195_v60, %v1192_v59 }
 0x5e7   :  { %v8706_v38 = vpop.f32.mrb[36].mxu0 }
 0x5e8   :  { %v8708_v62 = vpop.f32.mrb[37].mxu0 }
 0x5e9   :  { %v8710_v40 = vpop.f32.mrb[38].mxu0 }
 0x5ea   :  { %v1258_v7 = vpack.c.bf16 %v8710_v40, %v8706_v38  ;;  %v1211_v63 = vpop.f32.mrb[39].mxu0  ;;  %v10672_v40 = vld [vmem:[#allocation52_spill] sm:$0xff] }
 0x5eb   :  { %v1257_v53 = vpack.c.bf16 %v1211_v63, %v8708_v62  ;;  %v10664_v63 = vld [vmem:[#allocation47_spill] sm:$0xff] }
 0x5f7   :  { %v8715_v11 = vpop.f32.mrb[40].mxu0 }
 0x5f8   :  { %v8717_v61 = vpop.f32.mrb[41].mxu0 }
 0x5f9   :  { %v8719_v48 = vpop.f32.mrb[42].mxu0 }
 0x5fa   :  { %v1260_v57 = vpack.c.bf16 %v8719_v48, %v8715_v11  ;;  %v8723_v24 = vpop.f32.mrb[43].mxu0  ;;  %v10675_v48 = vld [vmem:[#allocation56_spill] sm:$0xff] }
 0x5fb   :  { %v1259_v10 = vpack.c.bf16 %v8723_v24, %v8717_v61  ;;  %v10673_v61 = vld [vmem:[#allocation54_spill] sm:$0xff] }
 0x607   :  { %v8727_v4 = vpop.f32.mrb[44].mxu0 }
 0x608   :  { %v8729_v32 = vpop.f32.mrb[45].mxu0 }
 0x609   :  { %v8731_v55 = vpop.f32.mrb[46].mxu0 }
 0x60a   :  { %v1262_v15 = vpack.c.bf16 %v8731_v55, %v8727_v4  ;;  %v8735_v28 = vpop.f32.mrb[47].mxu0  ;;  %v10681_v4 = vld [vmem:[#allocation58_spill] sm:$0xff] }
 0x60b   :  { %v1261_v52 = vpack.c.bf16 %v8735_v28, %v8729_v32  ;;  %v10676_v32 = vld [vmem:[#allocation23_spill] sm:$0xff]  ;;  %v10677_v28 = vld [vmem:[#allocation20_spill] sm:$0xff] }
 0x627   :  { %v6401_v41 = vpop.f32.mrb[48].mxu0 }
 0x628   :  { %v1626_v34 = vpop.f32.mrb[49].mxu0 }
 0x629   :  { %v6402_v19 = vpop.f32.mrb[50].mxu0 }
 0x62a   :  { %v1690_v25 = vpack.c.bf16 %v6402_v19, %v6401_v41  ;;  %v1629_v6 = vpop.f32.mrb[51].mxu0 }
 0x62b   :  { %v1689_v20 = vpack.c.bf16 %v1629_v6, %v1626_v34  ;;  %v10665_v34 = vld [vmem:[#allocation45_spill] sm:$0xff] }
 0x62d   :  { %6417 = vmatprep.mubr.msk.bf16.mxu1 %vm884_vm0, %v1689_v20 }
 0x62e   :  { %6418 = vmatmul.mubr.msk.bf16.vlgmr.msra.gmra.mrb[48].mxu1 %vm884_vm0, %v1690_v25  ;;  %v10666_v25 = vld [vmem:[#allocation48_spill] sm:$0xff] }
 0x62f   :  { %6434 = vmatpush3.bf16.msra.mxu1 %v7055_v22  ;;  %v10663_v22 = vld [vmem:[#allocation44_spill] sm:$0xff] }
 0x63b   :  { %v6405_v42 = vpop.f32.mrb[52].mxu0 }
 0x63c   :  { %v1642_v1 = vpop.f32.mrb[53].mxu0 }
 0x63d   :  { %v6406_v39 = vpop.f32.mrb[54].mxu0 }
 0x63e   :  { %v1692_v35 = vpack.c.bf16 %v6406_v39, %v6405_v42  ;;  %v1645_v27 = vpop.f32.mrb[55].mxu0 }
 0x63f   :  { %v1691_v17 = vpack.c.bf16 %v1645_v27, %v1642_v1  ;;  %v10667_v1 = vld [vmem:[#allocation46_spill] sm:$0xff]  ;;  %v10668_v27 = vld [vmem:[#allocation49_spill] sm:$0xff] }
 0x641   :  { %6421 = vmatprep.mubr.msk.bf16.mxu1 %vm884_vm0, %v1691_v17 }
 0x642   :  { %6422 = vmatmul.mubr.msk.bf16.gmra.mrb[52].mxu1 %vm884_vm0, %v1692_v35 }
 0x647   :  { %v6409_v0 = vpop.f32.mrb[56].mxu0 }
 0x648   :  { %v1658_v51 = vpop.f32.mrb[57].mxu0 }
 0x649   :  { %v6410_v13 = vpop.f32.mrb[58].mxu0 }
 0x64a   :  { %v1694_v50 = vpack.c.bf16 %v6410_v13, %v6409_v0  ;;  %v1661_v14 = vpop.f32.mrb[59].mxu0 }
 0x64b   :  { %v1693_v2 = vpack.c.bf16 %v1661_v14, %v1658_v51 }
 0x64d   :  { %6425 = vmatprep.mubr.msk.bf16.mxu1 %vm884_vm0, %v1693_v2  ;;  %v10674_v2 = vld [vmem:[#allocation55_spill] sm:$0xff] }
 0x64e   :  { %6426 = vmatmul.mubr.msk.bf16.gmra.mrb[56].mxu1 %vm884_vm0, %v1694_v50  ;;  %v10671_v50 = vld [vmem:[#allocation53_spill] sm:$0xff] }
 0x64f   :  { %v6413_v30 = vpop.f32.mrb[60].mxu0 }
 0x650   :  { %v1674_v21 = vpop.f32.mrb[61].mxu0 }
 0x651   :  { %v6414_v56 = vpop.f32.mrb[62].mxu0 }
 0x652   :  { %v1696_v45 = vpack.c.bf16 %v6414_v56, %v6413_v30  ;;  %v1677_v36 = vpop.f32.mrb[63].mxu0 }
 0x653   :  { %v1695_v49 = vpack.c.bf16 %v1677_v36, %v1674_v21  ;;  %v10680_v36 = vld [vmem:[#allocation57_spill] sm:$0xff] }
 0x655   :  { %6429 = vmatprep.mubr.msk.bf16.mxu1 %vm884_vm0, %v1695_v49 }
 0x656   :  { %6430 = vmatmul.mubr.msk.bf16.gmra.mrb[60].mxu1 %vm884_vm0, %v1696_v45  ;;  %v10679_v45 = vld [vmem:[#allocation26_spill] sm:$0xff] }
 0x657   :  { %6435 = vmatprep.mubr.msk.bf16.mxu1 %vm884_vm0, %v1255_v5  ;;  %v6455_v44 = vpop.f32.mrb[64].mxu0 }
 0x658   :  { %v8749_v33 = vadd.f32 %v6455_v44, %v10662_v47  ;;  %v2025_v8 = vpop.f32.mrb[65].mxu0 }
 0x659   :  { %v8752_v59 = vadd.f32 %v2025_v8, %v10663_v22  ;;  %v6456_v60 = vpop.f32.mrb[66].mxu0 }
 0x65a   :  { %2092 = vmax.xlane.f32.xlu0 %v8749_v33  ;;  %v2028_v62 = vpop.f32.mrb[67].mxu0  ;;  %v2037_v19 = vadd.f32 %v6456_v60, %v10665_v34 }
 0x65b   :  { %v8756_v41 = vadd.f32 %v2028_v62, %v10664_v63  ;;  %2088 = vmax.xlane.f32.xlu1 %v8752_v59 }
 0x65e   :  { %6436 = vmatmul.mubr.msk.bf16.vlgmr.msra.gmra.mrb[48].mxu1 %vm884_vm0, %v1256_v23  ;;  %2090 = vmax.xlane.f32.xlu0 %v8756_v41 }
 0x65f   :  { %6439 = vmatprep.mubr.msk.bf16.mxu1 %vm884_vm0, %v1257_v53  ;;  %2094 = vmax.xlane.f32.xlu1 %v2037_v19  ;;  %v6459_v5 = vpop.f32.mrb[68].mxu0  ;;  %v10670_v53 = vld [vmem:[#allocation51_spill] sm:$0xff] }
 0x660   :  { %v2050_v6 = vadd.f32 %v6459_v5, %v10666_v25  ;;  %v2041_v20 = vpop.f32.mrb[69].mxu0 }
 0x661   :  { %v6460_v42 = vpop.f32.mrb[70].mxu0  ;;  %v8771_v17 = vadd.f32 %v2041_v20, %v10668_v27 }
 0x662   :  { %v8768_v39 = vadd.f32 %v6460_v42, %v10667_v1  ;;  %2100 = vmax.xlane.f32.xlu0 %v2050_v6  ;;  %v2044_v35 = vpop.f32.mrb[71].mxu0 }
 0x663   :  { %v8775_v43 = vadd.f32 %v2044_v35, %v10669_v26 }
 0x664   :  { %2102 = vmax.xlane.f32.xlu1 %v8768_v39 }
 0x666   :  { %6440 = vmatmul.mubr.msk.bf16.gmra.mrb[52].mxu1 %vm884_vm0, %v1258_v7  ;;  %2096 = vmax.xlane.f32.xlu0 %v8771_v17 }
 0x667   :  { %6443 = vmatprep.mubr.msk.bf16.mxu1 %vm884_vm0, %v1259_v10  ;;  %v6463_v23 = vpop.f32.mrb[72].mxu0 }
 0x668   :  { %v8787_v0 = vadd.f32 %v6463_v23, %v10670_v53  ;;  %2098 = vmax.xlane.f32.xlu1 %v8775_v43  ;;  %v2057_v51 = vpop.f32.mrb[73].mxu0 }
 0x669   :  { %v6464_v13 = vpop.f32.mrb[74].mxu0  ;;  %v8795_v7 = vadd.f32 %v2057_v51, %v10672_v40 }
 0x66a   :  { %v8791_v14 = vadd.f32 %v6464_v13, %v10671_v50  ;;  %2108 = vmax.xlane.f32.xlu0 %v8787_v0  ;;  %v2060_v38 = vpop.f32.mrb[75].mxu0 }
 0x66b   :  { %v8799_v24 = vadd.f32 %v2060_v38, %v10673_v61 }
 0x66c   :  { %2110 = vmax.xlane.f32.xlu1 %v8791_v14 }
 0x66e   :  { %6444 = vmatmul.mubr.msk.bf16.gmra.mrb[56].mxu1 %vm884_vm0, %v1260_v57  ;;  %2104 = vmax.xlane.f32.xlu0 %v8795_v7 }
 0x66f   :  { %6447 = vmatprep.mubr.msk.bf16.mxu1 %vm884_vm0, %v1261_v52  ;;  %v6467_v10 = vpop.f32.mrb[76].mxu0  ;;  %v10678_v52 = vld [vmem:[#allocation19_spill] sm:$0xff] }
 0x670   :  { %v8811_v30 = vadd.f32 %v6467_v10, %v10674_v2  ;;  %2106 = vmax.xlane.f32.xlu1 %v8799_v24  ;;  %v2073_v21 = vpop.f32.mrb[77].mxu0 }
 0x671   :  { %v6468_v56 = vpop.f32.mrb[78].mxu0  ;;  %v8816_v57 = vadd.f32 %v2073_v21, %v10675_v48 }
 0x672   :  { %2116 = vmax.xlane.f32.xlu0 %v8811_v30  ;;  %v2076_v11 = vpop.f32.mrb[79].mxu0  ;;  %v8832_v49 = vadd.f32 %v6468_v56, %v10680_v36 }
 0x673   :  { %v8836_v55 = vadd.f32 %v2076_v11, %v10681_v4 }
 0x676   :  { %6448 = vmatmul.mubr.msk.bf16.gmra.mrb[60].mxu1 %vm884_vm0, %v1262_v15  ;;  %2112 = vmax.xlane.f32.xlu0 %v8816_v57  ;;  %v10682_v15 = vld [vmem:[#allocation22_spill] sm:$0xff] }
 0x681   :  { %2248 = vrot.lane.b32.xlu1 %v10676_v32, %s7793_s16 }
 0x68c   :  { %2244 = vrot.lane.b32.xlu0 %v10677_v28, %s7793_s16 }
 0x690   :  { %2246 = vrot.lane.b32.xlu0 %v10678_v52, %s7793_s16 }
 0x694   :  { %2252 = vrot.lane.b32.xlu0 %v10679_v45, %s7793_s16 }
 0x6a5   :  { %2118 = vmax.xlane.f32.xlu1 %v8832_v49 }
 0x6a9   :  { %2114 = vmax.xlane.f32.xlu1 %v8836_v55 }
 0x6ba   :  { %2250 = vrot.lane.b32.xlu1 %v10682_v15, %s7793_s16 }
 0x6e7   :  { %v2093_v44 = vpop.xlane.xlu0 %2092 }
 0x6e8   :  { %v2122_v8 = vsub.f32 %v8749_v33, %v2093_v44  ;;  %v2089_v60 = vpop.xlane.xlu1 %2088 }
 0x6e9   :  { %v2120_v62 = vsub.f32 %v8752_v59, %v2089_v60 }
 0x6ea   :  { %v2140_v5 = vmul.f32 1.442695, %v2122_v8 }
 0x6eb   :  { %v2091_v20 = vpop.xlane.xlu0 %2090  ;;  %v2136_v42 = vmul.f32 1.442695, %v2120_v62 }
 0x6ec   :  { %7230 = vpow2.f32 %v2140_v5  ;;  %v2095_v35 = vpop.xlane.xlu1 %2094  ;;  %v2121_v51 = vsub.f32 %v8756_v41, %v2091_v20 }
 0x6ed   :  { %v2123_v23 = vsub.f32 %v2037_v19, %v2095_v35  ;;  %7232 = vpow2.f32 %v2136_v42 }
 0x6ee   :  { %v2138_v11 = vmul.f32 1.442695, %v2121_v51 }
 0x6ef   :  { %v2142_v13 = vmul.f32 1.442695, %v2123_v23  ;;  %v2101_v38 = vpop.xlane.xlu0 %2100 }
 0x6f0   :  { %v2126_v10 = vsub.f32 %v2050_v6, %v2101_v38 }
 0x6f1   :  { %v2103_v21 = vpop.xlane.xlu1 %2102  ;;  %7234 = vpow2.f32 %v2142_v13 }
 0x6f2   :  { %v2148_v56 = vmul.f32 1.442695, %v2126_v10  ;;  %v2127_v33 = vsub.f32 %v8768_v39, %v2103_v21 }
 0x6f3   :  { %v2097_v44 = vpop.xlane.xlu0 %2096 }
 0x6f4   :  { %7236 = vpow2.f32 %v2148_v56  ;;  %v2124_v59 = vsub.f32 %v8771_v17, %v2097_v44  ;;  %v2150_v62 = vmul.f32 1.442695, %v2127_v33 }
 0x6f5   :  { %v2099_v8 = vpop.xlane.xlu1 %2098  ;;  %7238 = vpow2.f32 %v2138_v11 }
 0x6f6   :  { %v8846_v60 = vpop.eup %7230  ;;  %v2144_v19 = vmul.f32 1.442695, %v2124_v59  ;;  %v2125_v41 = vsub.f32 %v8775_v43, %v2099_v8 }
 0x6f7   :  { %v2109_v5 = vpop.xlane.xlu0 %2108  ;;  %2172 = vadd.xlane.f32.xlu1 %v8846_v60  ;;  %v8851_v42 = vpop.eup %7232 }
 0x6f8   :  { %7240 = vpow2.f32 %v2144_v19  ;;  %v2146_v6 = vmul.f32 1.442695, %v2125_v41  ;;  %v2130_v20 = vsub.f32 %v8787_v0, %v2109_v5 }
 0x6f9   :  { %v2111_v39 = vpop.xlane.xlu1 %2110  ;;  %7242 = vpow2.f32 %v2150_v62 }
 0x6fa   :  { %7244 = vpow2.f32 %v2146_v6  ;;  %v2156_v35 = vmul.f32 1.442695, %v2130_v20  ;;  %v2131_v0 = vsub.f32 %v8791_v14, %v2111_v39 }
 0x6fb   :  { %v2105_v17 = vpop.xlane.xlu0 %2104  ;;  %2168 = vadd.xlane.f32.xlu1 %v8851_v42  ;;  %v8855_v23 = vpop.eup %7234 }
 0x6fc   :  { %v2128_v43 = vsub.f32 %v8795_v7, %v2105_v17  ;;  %7246 = vpow2.f32 %v2156_v35  ;;  %v2158_v14 = vmul.f32 1.442695, %v2131_v0 }
 0x6fd   :  { %v2107_v51 = vpop.xlane.xlu1 %2106 }
 0x6fe   :  { %v8857_v13 = vpop.eup %7236  ;;  %v2129_v38 = vsub.f32 %v8799_v24, %v2107_v51  ;;  %v2152_v21 = vmul.f32 1.442695, %v2128_v43 }
 0x6ff   :  { %v2117_v10 = vpop.xlane.xlu0 %2116  ;;  %2180 = vadd.xlane.f32.xlu0 %v8857_v13  ;;  %2174 = vadd.xlane.f32.xlu1 %v8855_v23  ;;  %v8864_v7 = vpop.eup %7238 }
 0x700   :  { %v2154_v56 = vmul.f32 1.442695, %v2129_v38  ;;  %v2134_v11 = vsub.f32 %v8811_v30, %v2117_v10 }
 0x701   :  { %v2249_v6 = vpop.permute.xlu1 %2248 }
 0x702   :  { %v8866_v33 = vpop.eup %7240  ;;  %7248 = vpow2.f32 %v2154_v56  ;;  %v2164_v44 = vmul.f32 1.442695, %v2134_v11 }
 0x703   :  { %2176 = vadd.xlane.f32.xlu0 %v8866_v33  ;;  %v2113_v24 = vpop.xlane.xlu0 %2112  ;;  %2170 = vadd.xlane.f32.xlu1 %v8864_v7  ;;  %7250 = vpow2.f32 %v2152_v21  ;;  %v8871_v8 = vpop.eup %7242 }
 0x704   :  { %v2132_v59 = vsub.f32 %v8816_v57, %v2113_v24  ;;  %v8873_v19 = vpop.eup %7244  ;;  %7252 = vpow2.f32 %v2164_v44 }
 0x705   :  { %7254 = vpow2.f32 %v2158_v14 }
 0x706   :  { %v2160_v30 = vmul.f32 1.442695, %v2132_v59  ;;  %v8877_v62 = vpop.eup %7246 }
 0x707   :  { %v2245_v41 = vpop.permute.xlu0 %2244  ;;  %2182 = vadd.xlane.f32.xlu0 %v8871_v8  ;;  %2178 = vadd.xlane.f32.xlu1 %v8873_v19 }
 0x708   :  { %6473 = vmatprep.subr.bf16.mxu0 %v2245_v41  ;;  %7256 = vpow2.f32 %v2160_v30 }
 0x709   :  { %6474 = vmatpush3.bf16.msra.mxu0 %v2245_v41 }
 0x70b   :  { %v2247_v5 = vpop.permute.xlu0 %2246  ;;  %2188 = vadd.xlane.f32.xlu0 %v8877_v62 }
 0x70c   :  { %v8880_v57 = vpop.eup %7248  ;;  %6475 = vmatprep.subr.bf16.mxu0 %v2247_v5 }
 0x70d   :  { %6476 = vmatpush3.bf16.msra.mxu0 %v2247_v5  ;;  %2186 = vadd.xlane.f32.xlu1 %v8880_v57  ;;  %v8883_v20 = vpop.eup %7250 }
 0x70e   :  { %6477 = vmatprep.subr.bf16.mxu0 %v2249_v6  ;;  %v8886_v39 = vpop.eup %7252 }
 0x70f   :  { %2184 = vadd.xlane.f32.xlu0 %v8883_v20  ;;  %v8889_v17 = vpop.eup %7254  ;;  %v2253_v11 = vpop.permute.xlu0 %2252 }
 0x711   :  { %2196 = vadd.xlane.f32.xlu1 %v8886_v39  ;;  %6478 = vmatpush3.bf16.msra.mxu0 %v2249_v6 }
 0x712   :  { %v8892_v35 = vpop.eup %7256 }
 0x713   :  { %2190 = vadd.xlane.f32.xlu0 %v8889_v17 }
 0x715   :  { %2192 = vadd.xlane.f32.xlu1 %v8892_v35 }
 0x726   :  { %2254 = vrot.lane.b32.xlu1 %v8172_v12, %s7793_s16 }
 0x72a   :  { %2514 = vrot.lane.b32.xlu1 %v8121_v37, %s7794_s13 }
 0x72e   :  { %2516 = vrot.lane.b32.xlu1 %v8141_v54, %s7794_s13 }
 0x732   :  { %2520 = vrot.lane.b32.xlu1 %v8181_v16, %s7794_s13  ;;  %v2119_v43 = vpop.xlane.xlu1 %2118 }
 0x733   :  { %v2135_v38 = vsub.f32 %v8832_v49, %v2119_v43 }
 0x735   :  { %v2166_v56 = vmul.f32 1.442695, %v2135_v38 }
 0x736   :  { %2524 = vrot.lane.b32.xlu1 %v8200_v58, %s7794_s13  ;;  %v2115_v51 = vpop.xlane.xlu1 %2114 }
 0x737   :  { %v2133_v0 = vsub.f32 %v8836_v55, %v2115_v51 }
 0x739   :  { %v2162_v10 = vmul.f32 1.442695, %v2133_v0 }
 0x73a   :  { %3073 = vrot.lane.b32.xlu1 %v8102_v18, %s7787_s0  ;;  %v2251_v21 = vpop.permute.xlu1 %2250 }
 0x73b   :  { %7258 = vpow2.f32 %v2162_v10  ;;  %6479 = vmatprep.subr.bf16.mxu0 %v2251_v21 }
 0x73c   :  { %6480 = vmatpush3.bf16.msra.mxu0 %v2251_v21  ;;  %7260 = vpow2.f32 %v2166_v56 }
 0x73d   :  { %6481 = vmatprep.subr.bf16.mxu0 %v2253_v11 }
 0x73e   :  { %3077 = vrot.lane.b32.xlu1 %v8141_v54, %s7787_s0 }
 0x740   :  { %6482 = vmatpush3.bf16.msra.mxu0 %v2253_v11 }
 0x742   :  { %3081 = vrot.lane.b32.xlu1 %v8181_v16, %s7787_s0 }
 0x745   :  { %v8913_v49 = vpop.eup %7258 }
 0x746   :  { %3085 = vrot.lane.b32.xlu1 %v8200_v58, %s7787_s0  ;;  %2194 = vadd.xlane.f32.xlu0 %v8913_v49  ;;  %v8918_v55 = vpop.eup %7260 }
 0x74a   :  { %3364 = vrot.lane.b32.xlu1 %v8113_v29, %s7787_s0  ;;  %2198 = vadd.xlane.f32.xlu0 %v8918_v55 }
 0x74e   :  { %3370 = vrot.lane.b32.xlu1 %v10676_v32, %s7787_s0 }
 0x752   :  { %3372 = vrot.lane.b32.xlu1 %v10682_v15, %s7787_s0 }
 0x756   :  { %3376 = vrot.lane.b32.xlu1 %v8172_v12, %s7787_s0 }
 0x75a   :  { %3636 = vrot.lane.b32.xlu1 %v8121_v37, %s7795_s17 }
 0x75e   :  { %3638 = vrot.lane.b32.xlu1 %v8141_v54, %s7795_s17 }
 0x760   :  { %2512 = vrot.lane.b32.xlu0 %v8102_v18, %s7794_s13 }
 0x762   :  { %3642 = vrot.lane.b32.xlu1 %v8181_v16, %s7795_s17 }
 0x764   :  { %2518 = vrot.lane.b32.xlu0 %v8161_v9, %s7794_s13 }
 0x766   :  { %3646 = vrot.lane.b32.xlu1 %v8200_v58, %s7795_s17 }
 0x768   :  { %2522 = vrot.lane.b32.xlu0 %v8192_v3, %s7794_s13 }
 0x76a   :  { %4195 = vrot.lane.b32.xlu1 %v8102_v18, %s7796_s19 }
 0x76c   :  { %2526 = vrot.lane.b32.xlu0 %v8208_v46, %s7794_s13 }
 0x76e   :  { %4199 = vrot.lane.b32.xlu1 %v8141_v54, %s7796_s19 }
 0x770   :  { %3075 = vrot.lane.b32.xlu0 %v8121_v37, %s7787_s0 }
 0x774   :  { %3079 = vrot.lane.b32.xlu0 %v8161_v9, %s7787_s0 }
 0x778   :  { %3083 = vrot.lane.b32.xlu0 %v8192_v3, %s7787_s0 }
 0x77c   :  { %3087 = vrot.lane.b32.xlu0 %v8208_v46, %s7787_s0 }
 0x780   :  { %3362 = vrot.lane.b32.xlu0 %v8115_v31, %s7787_s0 }
 0x784   :  { %3366 = vrot.lane.b32.xlu0 %v10677_v28, %s7787_s0  ;;  %v2173_v44 = vpop.xlane.xlu1 %2172 }
 0x788   :  { %3368 = vrot.lane.b32.xlu0 %v10678_v52, %s7787_s0  ;;  %v2169_v24 = vpop.xlane.xlu1 %2168 }
 0x789   :  { %7262 = vrcp.f32 %v2169_v24 }
 0x78c   :  { %v2181_v14 = vpop.xlane.xlu0 %2180  ;;  %3374 = vrot.lane.b32.xlu0 %v10679_v45, %s7787_s0  ;;  %v2175_v59 = vpop.xlane.xlu1 %2174  ;;  %s7797_s0 = smov 16  }
 0x790   :  { %v2177_v30 = vpop.xlane.xlu0 %2176  ;;  %3634 = vrot.lane.b32.xlu0 %v8102_v18, %s7795_s17  ;;  %v2171_v41 = vpop.xlane.xlu1 %2170  ;;  %v10686_v18 = vld [vmem:[#allocation36_spill] sm:$0xff] }
 0x791   :  { %7264 = vrcp.f32 %v2171_v41 }
 0x792   :  { %7266 = vrcp.f32 %v2175_v59 }
 0x793   :  { %v7263_v51 = vpop.eup %7262 }
 0x794   :  { %v2183_v5 = vpop.xlane.xlu0 %2182  ;;  %3640 = vrot.lane.b32.xlu0 %v8161_v9, %s7795_s17  ;;  %v2179_v6 = vpop.xlane.xlu1 %2178  ;;  %v2216_v10 = vmul.f32 %v7263_v51, %v8851_v42 }
 0x795   :  { %7268 = vrcp.f32 %v2179_v6 }
 0x796   :  { %7270 = vrcp.f32 %v2173_v44 }
 0x797   :  { %7272 = vrcp.f32 %v2177_v30 }
 0x798   :  { %v2189_v43 = vpop.xlane.xlu0 %2188  ;;  %3644 = vrot.lane.b32.xlu0 %v8192_v3, %s7795_s17  ;;  %7274 = vrcp.f32 %v2183_v5 }
 0x79a   :  { %v2187_v38 = vpop.xlane.xlu1 %2186 }
 0x79b   :  { %v7265_v0 = vpop.eup %7264 }
 0x79c   :  { %3648 = vrot.lane.b32.xlu0 %v8208_v46, %s7795_s17  ;;  %v2217_v21 = vmul.f32 %v7265_v0, %v8864_v7  ;;  %v2185_v56 = vpop.xlane.xlu0 %2184  ;;  %v7267_v44 = vpop.eup %7266  ;;  %v10683_v0 = vld [vmem:[#allocation33_spill] sm:$0xff] }
 0x79d   :  { %7276 = vrcp.f32 %v2185_v56  ;;  %v2219_v7 = vmul.f32 %v7267_v44, %v8855_v23  ;;  %v10685_v44 = vld [vmem:[#allocation35_spill] sm:$0xff] }
 0x79e   :  { %v2197_v11 = vpop.xlane.xlu1 %2196  ;;  %v2232_v24 = vpack.c.bf16 %v2217_v21, %v2216_v10  ;;  %7278 = vrcp.f32 %v2181_v14  ;;  %v10684_v10 = vld [vmem:[#allocation34_spill] sm:$0xff]  ;;  %v781_v12 = vpack.c.bf16 %v10686_v18, %v10685_v44 }
 0x79f   :  { %v7269_v30 = vpop.eup %7268  ;;  %7280 = vrcp.f32 %v2187_v38  ;;  %v780_v21 = vpack.c.bf16 %v10684_v10, %v10683_v0 }
 0x7a0   :  { %4197 = vrot.lane.b32.xlu0 %v8121_v37, %s7796_s19  ;;  %6485 = vmatprep.mubr.bf16.mxu0 %v2232_v24  ;;  %v7271_v41 = vpop.eup %7270  ;;  %v2191_v6 = vpop.xlane.xlu0 %2190  ;;  %v2221_v5 = vmul.f32 %v7269_v30, %v8873_v19 }
 0x7a1   :  { %v7273_v42 = vpop.eup %7272  ;;  %v2218_v56 = vmul.f32 %v7271_v41, %v8846_v60  ;;  %7282 = vrcp.f32 %v2191_v6 }
 0x7a2   :  { %v2193_v59 = vpop.xlane.xlu1 %2192  ;;  %v2220_v14 = vmul.f32 %v7273_v42, %v8866_v33  ;;  %v7275_v24 = vpop.eup %7274  ;;  %7284 = vrcp.f32 %v2189_v43 }
 0x7a3   :  { %v2233_v38 = vpack.c.bf16 %v2219_v7, %v2218_v56  ;;  %v2223_v60 = vmul.f32 %v7275_v24, %v8871_v8  ;;  %7286 = vrcp.f32 %v2193_v59 }
 0x7a4   :  { %4201 = vrot.lane.b32.xlu0 %v8161_v9, %s7796_s19  ;;  %v2234_v54 = vpack.c.bf16 %v2221_v5, %v2220_v14 }
 0x7a6   :  { %v2255_v51 = vpop.permute.xlu1 %2254 }
 0x7a7   :  { %6483 = vmatprep.subr.bf16.mxu0 %v2255_v51  ;;  %v7277_v23 = vpop.eup %7276 }
 0x7a8   :  { %6484 = vmatpush3.bf16.msra.mxu0 %v2255_v51  ;;  %v7279_v19 = vpop.eup %7278  ;;  %v2224_v41 = vmul.f32 %v7277_v23, %v8883_v20 }
 0x7a9   :  { %6519 = vmatprep.subr.bf16.mxu0 %v780_v21  ;;  %v7281_v30 = vpop.eup %7280  ;;  %v2222_v33 = vmul.f32 %v7279_v19, %v8857_v13 }
 0x7aa   :  { %v2225_v42 = vmul.f32 %v7281_v30, %v8880_v57 }
 0x7ab   :  { %6486 = vmatmul.mubr.bf16.vlgmr.msra.gmra.mrb[80].mxu0 %v2233_v38  ;;  %v2235_v43 = vpack.c.bf16 %v2223_v60, %v2222_v33  ;;  %v7283_v7 = vpop.eup %7282 }
 0x7ac   :  { %6489 = vmatprep.mubr.bf16.mxu0 %v2234_v54  ;;  %6520 = vmatpush3.bf16.msra.mxu0 %v780_v21  ;;  %v2236_v6 = vpack.c.bf16 %v2225_v42, %v2224_v41  ;;  %v7285_v51 = vpop.eup %7284  ;;  %v2227_v18 = vmul.f32 %v7283_v7, %v8889_v17  ;;  %v2515_v17 = vpop.permute.xlu1 %2514 }
 0x7ad   :  { %6587 = vmatprep.subr.bf16.mxu0 %v781_v12  ;;  %v2226_v54 = vmul.f32 %v7285_v51, %v8877_v62  ;;  %v7287_v57 = vpop.eup %7286 }
 0x7ae   :  { %v2228_v21 = vmul.f32 %v7287_v57, %v8892_v35  ;;  %v10688_v57 = vld [vmem:[#allocation38_spill] sm:$0xff] }
 0x7af   :  { %v2237_v5 = vpack.c.bf16 %v2227_v18, %v2226_v54 }
 0x7b0   :  { %v2517_v44 = vpop.permute.xlu1 %2516 }
 0x7b3   :  { %6490 = vmatmul.mubr.bf16.gmra.mrb[84].mxu0 %v2235_v43  ;;  %v7056_v43 = vld [vmem:[#allocation7 + $0x10] sm:$0xff]  }
 0x7b4   :  { %6493 = vmatprep.mubr.bf16.mxu0 %v2236_v6  ;;  %v2521_v35 = vpop.permute.xlu1 %2520  ;;  %6501 = vmatprep.subr.bf16.mxu1 %v7056_v43 }
 0x7b5   :  { %6502 = vmatpush3.bf16.msra.mxu1 %v7056_v43 }
 0x7bb   :  { %6494 = vmatmul.mubr.bf16.gmra.mrb[88].mxu0 %v2237_v5 }
 0x7d3   :  { %v2195_v8 = vpop.xlane.xlu0 %2194 }
 0x7d4   :  { %7288 = vrcp.f32 %v2195_v8 }
 0x7d5   :  { %7290 = vrcp.f32 %v2197_v11 }
 0x7d7   :  { %v2199_v20 = vpop.xlane.xlu0 %2198 }
 0x7d8   :  { %7292 = vrcp.f32 %v2199_v20 }
 0x7db   :  { %v2513_v13 = vpop.permute.xlu0 %2512 }
 0x7de   :  { %v7289_v0 = vpop.eup %7288 }
 0x7df   :  { %v2519_v10 = vpop.permute.xlu0 %2518  ;;  %v2229_v56 = vmul.f32 %v7289_v0, %v8913_v49  ;;  %v7291_v14 = vpop.eup %7290 }
 0x7e0   :  { %v2230_v59 = vmul.f32 %v7291_v14, %v8886_v39  ;;  %v2525_v49 = vpop.permute.xlu1 %2524 }
 0x7e1   :  { %v2238_v38 = vpack.c.bf16 %v2229_v56, %v2228_v21 }
 0x7e2   :  { %v7293_v62 = vpop.eup %7292 }
 0x7e3   :  { %v2523_v24 = vpop.permute.xlu0 %2522  ;;  %6497 = vmatprep.mubr.bf16.mxu0 %v2238_v38  ;;  %v2231_v11 = vmul.f32 %v7293_v62, %v8918_v55 }
 0x7e4   :  { %v3074_v39 = vpop.permute.xlu1 %3073 }
 0x7e5   :  { %v2239_v23 = vpack.c.bf16 %v2231_v11, %v2230_v59 }
 0x7e7   :  { %v2527_v19 = vpop.permute.xlu0 %2526  ;;  %6498 = vmatmul.mubr.bf16.gmra.mrb[92].mxu0 %v2239_v23 }
 0x7e8   :  { %6521 = vmatprep.mubr.msk.bf16.mxu0 %vm884_vm0, %v2513_v13  ;;  %v3078_v42 = vpop.permute.xlu1 %3077  ;;  %v10687_v13 = vld [vmem:[#allocation37_spill] sm:$0xff] }
 0x7e9   :  { %v9015_v0 = vpack.c.bf16 %v10688_v57, %v10687_v13 }
 0x7eb   :  { %v3076_v30 = vpop.permute.xlu0 %3075  ;;  %10689 = vst [vmem:[#allocation31_spill] sm:$0xff] %v9015_v0 }
 0x7ef   :  { %v3080_v60 = vpop.permute.xlu0 %3079  ;;  %6522 = vmatmul.mubr.msk.bf16.vlgmr.msra.gmra.mrb[96].mxu0 %vm884_vm0, %v2515_v17 }
 0x7f0   :  { %6588 = vmatpush3.bf16.msra.mxu0 %v781_v12  ;;  %6525 = vmatprep.mubr.msk.bf16.mxu0 %vm884_vm0, %v2517_v44  ;;  %v3082_v12 = vpop.permute.xlu1 %3081 }
 0x7f3   :  { %v3084_v41 = vpop.permute.xlu0 %3083 }
 0x7f4   :  { %v3086_v7 = vpop.permute.xlu1 %3085 }
 0x7f7   :  { %v3088_v33 = vpop.permute.xlu0 %3087  ;;  %6526 = vmatmul.mubr.msk.bf16.gmra.mrb[100].mxu0 %vm884_vm0, %v2519_v10 }
 0x7f8   :  { %6529 = vmatprep.mubr.msk.bf16.mxu0 %vm884_vm0, %v2521_v35  ;;  %v3365_v6 = vpop.permute.xlu1 %3364 }
 0x7fb   :  { %v3363_v55 = vpop.permute.xlu0 %3362 }
 0x7fc   :  { %6605 = vmatprep.subr.bf16.mxu0 %v3363_v55  ;;  %v3371_v54 = vpop.permute.xlu1 %3370 }
 0x7ff   :  { %6530 = vmatmul.mubr.msk.bf16.gmra.mrb[104].mxu0 %vm884_vm0, %v2523_v24  ;;  %v3367_v51 = vpop.permute.xlu0 %3366 }
 0x800   :  { %6533 = vmatprep.mubr.msk.bf16.mxu0 %vm884_vm0, %v2525_v49  ;;  %v3373_v5 = vpop.permute.xlu1 %3372 }
 0x803   :  { %v3369_v18 = vpop.permute.xlu0 %3368 }
 0x804   :  { %v3377_v20 = vpop.permute.xlu1 %3376 }
 0x807   :  { %6534 = vmatmul.mubr.msk.bf16.gmra.mrb[108].mxu0 %vm884_vm0, %v2527_v19  ;;  %v3375_v8 = vpop.permute.xlu0 %3374 }
 0x808   :  { %6589 = vmatprep.mubr.msk.bf16.mxu0 %vm884_vm0, %v3074_v39 }
 0x80f   :  { %6590 = vmatmul.mubr.msk.bf16.vlgmr.msra.gmra.mrb[112].mxu0 %vm884_vm0, %v3076_v30 }
 0x810   :  { %6606 = vmatpush3.bf16.msra.mxu0 %v3363_v55  ;;  %6593 = vmatprep.mubr.msk.bf16.mxu0 %vm884_vm0, %v3078_v42 }
 0x811   :  { %6607 = vmatprep.subr.bf16.mxu0 %v3365_v6 }
 0x814   :  { %6608 = vmatpush3.bf16.msra.mxu0 %v3365_v6 }
 0x815   :  { %6609 = vmatprep.subr.bf16.mxu0 %v3367_v51 }
 0x817   :  { %6594 = vmatmul.mubr.msk.bf16.gmra.mrb[116].mxu0 %vm884_vm0, %v3080_v60 }
 0x818   :  { %6610 = vmatpush3.bf16.msra.mxu0 %v3367_v51  ;;  %6597 = vmatprep.mubr.msk.bf16.mxu0 %vm884_vm0, %v3082_v12 }
 0x819   :  { %6611 = vmatprep.subr.bf16.mxu0 %v3369_v18 }
 0x81c   :  { %6612 = vmatpush3.bf16.msra.mxu0 %v3369_v18 }
 0x81d   :  { %6613 = vmatprep.subr.bf16.mxu0 %v3371_v54 }
 0x81f   :  { %6598 = vmatmul.mubr.msk.bf16.gmra.mrb[120].mxu0 %vm884_vm0, %v3084_v41 }
 0x820   :  { %6614 = vmatpush3.bf16.msra.mxu0 %v3371_v54  ;;  %6601 = vmatprep.mubr.msk.bf16.mxu0 %vm884_vm0, %v3086_v7 }
 0x821   :  { %6615 = vmatprep.subr.bf16.mxu0 %v3373_v5 }
 0x824   :  { %6616 = vmatpush3.bf16.msra.mxu0 %v3373_v5 }
 0x825   :  { %6617 = vmatprep.subr.bf16.mxu0 %v3375_v8 }
 0x827   :  { %6602 = vmatmul.mubr.msk.bf16.gmra.mrb[124].mxu0 %vm884_vm0, %v3088_v33 }
 0x828   :  { %6618 = vmatpush3.bf16.msra.mxu0 %v3375_v8 }
 0x829   :  { %6619 = vmatprep.subr.bf16.mxu0 %v3377_v20 }
 0x82c   :  { %6620 = vmatpush3.bf16.msra.mxu0 %v3377_v20 }
 0x82d   :  { %6655 = vmatprep.subr.bf16.mxu0 %v9015_v0 }
 0x87e   :  { %v6487_v10 = vpop.f32.mrb[80].mxu0 }
 0x87f   :  { %v2298_v21 = vpop.f32.mrb[81].mxu0 }
 0x880   :  { %v6488_v56 = vpop.f32.mrb[82].mxu0 }
 0x881   :  { %v2362_v14 = vpack.c.bf16 %v6488_v56, %v6487_v10  ;;  %v2301_v17 = vpop.f32.mrb[83].mxu0 }
 0x882   :  { %v2361_v38 = vpack.c.bf16 %v2301_v17, %v2298_v21 }
 0x884   :  { %6503 = vmatprep.mubr.msk.bf16.mxu1 %vm884_vm0, %v2361_v38 }
 0x885   :  { %6504 = vmatmul.mubr.msk.bf16.vlgmr.msra.gmra.mrb[48].mxu1 %vm884_vm0, %v2362_v14 }
 0x886   :  { %v6491_v62 = vpop.f32.mrb[84].mxu0 }
 0x887   :  { %v2314_v24 = vpop.f32.mrb[85].mxu0 }
 0x888   :  { %v6492_v59 = vpop.f32.mrb[86].mxu0 }
 0x889   :  { %v2364_v11 = vpack.c.bf16 %v6492_v59, %v6491_v62  ;;  %v2317_v23 = vpop.f32.mrb[87].mxu0 }
 0x88a   :  { %v2363_v44 = vpack.c.bf16 %v2317_v23, %v2314_v24 }
 0x88c   :  { %6507 = vmatprep.mubr.msk.bf16.mxu1 %vm884_vm0, %v2363_v44 }
 0x88d   :  { %6508 = vmatmul.mubr.msk.bf16.gmra.mrb[52].mxu1 %vm884_vm0, %v2364_v11 }
 0x88e   :  { %v6495_v19 = vpop.f32.mrb[88].mxu0 }
 0x88f   :  { %v2330_v30 = vpop.f32.mrb[89].mxu0 }
 0x890   :  { %v6496_v35 = vpop.f32.mrb[90].mxu0 }
 0x891   :  { %v2366_v60 = vpack.c.bf16 %v6496_v35, %v6495_v19  ;;  %v2333_v49 = vpop.f32.mrb[91].mxu0 }
 0x892   :  { %v2365_v41 = vpack.c.bf16 %v2333_v49, %v2330_v30 }
 0x894   :  { %6511 = vmatprep.mubr.msk.bf16.mxu1 %vm884_vm0, %v2365_v41 }
 0x895   :  { %6512 = vmatmul.mubr.msk.bf16.gmra.mrb[56].mxu1 %vm884_vm0, %v2366_v60 }
 0x8ba   :  { %v6499_v33 = vpop.f32.mrb[92].mxu0 }
 0x8bb   :  { %v2346_v39 = vpop.f32.mrb[93].mxu0 }
 0x8bc   :  { %v6500_v55 = vpop.f32.mrb[94].mxu0 }
 0x8bd   :  { %v2368_v42 = vpack.c.bf16 %v6500_v55, %v6499_v33  ;;  %v2349_v43 = vpop.f32.mrb[95].mxu0 }
 0x8be   :  { %v2367_v12 = vpack.c.bf16 %v2349_v43, %v2346_v39 }
 0x8c0   :  { %6515 = vmatprep.mubr.msk.bf16.mxu1 %vm884_vm0, %v2367_v12 }
 0x8c1   :  { %6516 = vmatmul.mubr.msk.bf16.gmra.mrb[60].mxu1 %vm884_vm0, %v2368_v42 }
 0x8c2   :  { %v9026_v7 = vpop.f32.mrb[96].mxu0 }
 0x8c3   :  { %v9028_v6 = vpop.f32.mrb[97].mxu0 }
 0x8c4   :  { %v9030_v51 = vpop.f32.mrb[98].mxu0 }
 0x8c5   :  { %v9032_v18 = vpop.f32.mrb[99].mxu0 }
 0x8ca   :  { %v9034_v54 = vpop.f32.mrb[100].mxu0 }
 0x8cb   :  { %v9036_v5 = vpop.f32.mrb[101].mxu0 }
 0x8cc   :  { %v9038_v8 = vpop.f32.mrb[102].mxu0 }
 0x8cd   :  { %v9040_v20 = vpop.f32.mrb[103].mxu0 }
 0x8d2   :  { %v9042_v13 = vpop.f32.mrb[104].mxu0 }
 0x8d3   :  { %v9044_v57 = vpop.f32.mrb[105].mxu0 }
 0x8d4   :  { %v9046_v10 = vpop.f32.mrb[106].mxu0 }
 0x8d5   :  { %v9048_v21 = vpop.f32.mrb[107].mxu0 }
 0x8da   :  { %v9050_v56 = vpop.f32.mrb[108].mxu0 }
 0x8db   :  { %v9052_v14 = vpop.f32.mrb[109].mxu0 }
 0x8dc   :  { %v9054_v17 = vpop.f32.mrb[110].mxu0 }
 0x8dd   :  { %v9056_v38 = vpop.f32.mrb[111].mxu0 }
 0x8e2   :  { %v6591_v62 = vpop.f32.mrb[112].mxu0 }
 0x8e3   :  { %v9059_v24 = vadd.f32 %v6591_v62, %v10662_v47  ;;  %v3147_v59 = vpop.f32.mrb[113].mxu0 }
 0x8e4   :  { %v9062_v11 = vadd.f32 %v3147_v59, %v10663_v22  ;;  %v6592_v23 = vpop.f32.mrb[114].mxu0 }
 0x8e5   :  { %3214 = vmax.xlane.f32.xlu0 %v9059_v24  ;;  %v3150_v44 = vpop.f32.mrb[115].mxu0  ;;  %v9070_v30 = vadd.f32 %v6592_v23, %v10665_v34 }
 0x8e6   :  { %v9066_v19 = vadd.f32 %v3150_v44, %v10664_v63  ;;  %3210 = vmax.xlane.f32.xlu1 %v9062_v11 }
 0x8e9   :  { %3212 = vmax.xlane.f32.xlu0 %v9066_v19 }
 0x8ea   :  { %3216 = vmax.xlane.f32.xlu1 %v9070_v30  ;;  %v6595_v35 = vpop.f32.mrb[116].mxu0 }
 0x8eb   :  { %v9075_v60 = vadd.f32 %v6595_v35, %v10666_v25  ;;  %v3163_v49 = vpop.f32.mrb[117].mxu0 }
 0x8ec   :  { %v6596_v41 = vpop.f32.mrb[118].mxu0  ;;  %v9082_v55 = vadd.f32 %v3163_v49, %v10668_v27 }
 0x8ed   :  { %v9078_v33 = vadd.f32 %v6596_v41, %v10667_v1  ;;  %3222 = vmax.xlane.f32.xlu0 %v9075_v60  ;;  %v3166_v39 = vpop.f32.mrb[119].mxu0 }
 0x8ee   :  { %v9086_v42 = vadd.f32 %v3166_v39, %v10669_v26 }
 0x8ef   :  { %3224 = vmax.xlane.f32.xlu1 %v9078_v33 }
 0x8f1   :  { %3218 = vmax.xlane.f32.xlu0 %v9082_v55 }
 0x8f2   :  { %v6599_v43 = vpop.f32.mrb[120].mxu0 }
 0x8f3   :  { %v9090_v12 = vadd.f32 %v6599_v43, %v10670_v53  ;;  %3220 = vmax.xlane.f32.xlu1 %v9086_v42  ;;  %v3179_v62 = vpop.f32.mrb[121].mxu0 }
 0x8f4   :  { %v6600_v59 = vpop.f32.mrb[122].mxu0  ;;  %v9098_v35 = vadd.f32 %v3179_v62, %v10672_v40 }
 0x8f5   :  { %v9094_v23 = vadd.f32 %v6600_v59, %v10671_v50  ;;  %3230 = vmax.xlane.f32.xlu0 %v9090_v12  ;;  %v3182_v44 = vpop.f32.mrb[123].mxu0 }
 0x8f6   :  { %v9102_v49 = vadd.f32 %v3182_v44, %v10673_v61 }
 0x8f7   :  { %3232 = vmax.xlane.f32.xlu1 %v9094_v23 }
 0x8f9   :  { %3226 = vmax.xlane.f32.xlu0 %v9098_v35 }
 0x8fa   :  { %v6603_v41 = vpop.f32.mrb[124].mxu0 }
 0x8fb   :  { %v9106_v39 = vadd.f32 %v6603_v41, %v10674_v2  ;;  %3228 = vmax.xlane.f32.xlu1 %v9102_v49  ;;  %v3195_v43 = vpop.f32.mrb[125].mxu0  ;;  %v9126_v41 = vpop.permute.xlu0 %3634 }
 0x8fc   :  { %v6604_v59 = vpop.f32.mrb[126].mxu0  ;;  %v9114_v37 = vadd.f32 %v3195_v43, %v10675_v48  ;;  %10692 = vst [vmem:[#allocation33_spill] sm:$0xff] %v9126_v41 }
 0x8fd   :  { %v9110_v9 = vadd.f32 %v6604_v59, %v10680_v36  ;;  %3238 = vmax.xlane.f32.xlu0 %v9106_v39  ;;  %v3198_v62 = vpop.f32.mrb[127].mxu0  ;;  %v9128_v59 = vpop.permute.xlu1 %3636 }
 0x8fe   :  { %v9118_v44 = vadd.f32 %v3198_v62, %v10681_v4  ;;  %10693 = vst [vmem:[#allocation34_spill] sm:$0xff] %v9128_v59 }
 0x8ff   :  { %10690 = vst [vmem:[#allocation32_spill] sm:$0xff] %v9110_v9  ;;  %3240 = vmax.xlane.f32.xlu1 %v9110_v9  ;;  %v9130_v43 = vpop.permute.xlu0 %3640 }
 0x900   :  { %10691 = vst [vmem:[#allocation59_spill] sm:$0xff] %v9118_v44  ;;  %10694 = vst [vmem:[#allocation35_spill] sm:$0xff] %v9130_v43 }
 0x901   :  { %3234 = vmax.xlane.f32.xlu0 %v9114_v37  ;;  %v9132_v15 = vpop.permute.xlu1 %3638 }
 0x902   :  { %10695 = vst [vmem:[#allocation36_spill] sm:$0xff] %v9132_v15 }
 0x903   :  { %3236 = vmax.xlane.f32.xlu1 %v9118_v44  ;;  %v9134_v62 = vpop.permute.xlu0 %3644 }
 0x904   :  { %10696 = vst [vmem:[#allocation37_spill] sm:$0xff] %v9134_v62 }
 0x905   :  { %v9136_v45 = vpop.permute.xlu1 %3642 }
 0x906   :  { %10697 = vst [vmem:[#allocation38_spill] sm:$0xff] %v9136_v45 }
 0x907   :  { %v9138_v32 = vpop.permute.xlu0 %3648 }
 0x908   :  { %10698 = vst [vmem:[#allocation60_spill] sm:$0xff] %v9138_v32 }
 0x909   :  { %v9140_v52 = vpop.permute.xlu1 %3646 }
 0x90a   :  { %10699 = vst [vmem:[#allocation61_spill] sm:$0xff] %v9140_v52 }
 0x90d   :  { %v9144_v29 = vpop.permute.xlu1 %4195 }
 0x90e   :  { %10701 = vst [vmem:[#allocation63_spill] sm:$0xff] %v9144_v29 }
 0x911   :  { %v9148_v41 = vpop.permute.xlu1 %4199 }
 0x912   :  { %10703 = vst [vmem:[#allocation65_spill] sm:$0xff] %v9148_v41 }
 0x914   :  { %4203 = vrot.lane.b32.xlu1 %v8181_v16, %s7796_s19  ;;  %v9142_v16 = vpop.permute.xlu0 %4197 }
 0x915   :  { %10700 = vst [vmem:[#allocation62_spill] sm:$0xff] %v9142_v16 }
 0x917   :  { %4205 = vrot.lane.b32.xlu0 %v8192_v3, %s7796_s19 }
 0x918   :  { %v9146_v3 = vpop.permute.xlu0 %4201 }
 0x919   :  { %10702 = vst [vmem:[#allocation64_spill] sm:$0xff] %v9146_v3 }
 0x972   :  { %v3215_v59 = vpop.xlane.xlu0 %3214 }
 0x973   :  { %v3244_v43 = vsub.f32 %v9059_v24, %v3215_v59  ;;  %v3211_v15 = vpop.xlane.xlu1 %3210 }
 0x974   :  { %v3242_v62 = vsub.f32 %v9062_v11, %v3211_v15 }
 0x975   :  { %v3262_v28 = vmul.f32 1.442695, %v3244_v43 }
 0x976   :  { %v3213_v45 = vpop.xlane.xlu0 %3212  ;;  %v3258_v32 = vmul.f32 1.442695, %v3242_v62 }
 0x977   :  { %7294 = vpow2.f32 %v3262_v28  ;;  %v3217_v0 = vpop.xlane.xlu1 %3216  ;;  %v3243_v16 = vsub.f32 %v9066_v19, %v3213_v45 }
 0x978   :  { %v3245_v52 = vsub.f32 %v9070_v30, %v3217_v0  ;;  %7296 = vpow2.f32 %v3258_v32 }
 0x979   :  { %v3260_v24 = vmul.f32 1.442695, %v3243_v16 }
 0x97a   :  { %v3264_v29 = vmul.f32 1.442695, %v3245_v52  ;;  %v3223_v44 = vpop.xlane.xlu0 %3222 }
 0x97b   :  { %v3248_v3 = vsub.f32 %v9075_v60, %v3223_v44 }
 0x97c   :  { %v3225_v41 = vpop.xlane.xlu1 %3224  ;;  %7298 = vpow2.f32 %v3264_v29 }
 0x97d   :  { %v3270_v9 = vmul.f32 1.442695, %v3248_v3  ;;  %v3249_v15 = vsub.f32 %v9078_v33, %v3225_v41 }
 0x97e   :  { %v3219_v11 = vpop.xlane.xlu0 %3218 }
 0x97f   :  { %7300 = vpow2.f32 %v3270_v9  ;;  %v3246_v28 = vsub.f32 %v9082_v55, %v3219_v11  ;;  %v3272_v32 = vmul.f32 1.442695, %v3249_v15 }
 0x980   :  { %v3221_v59 = vpop.xlane.xlu1 %3220  ;;  %7302 = vpow2.f32 %v3260_v24 }
 0x981   :  { %v9157_v43 = vpop.eup %7294  ;;  %v3266_v0 = vmul.f32 1.442695, %v3246_v28  ;;  %v3247_v52 = vsub.f32 %v9086_v42, %v3221_v59 }
 0x982   :  { %v3231_v45 = vpop.xlane.xlu0 %3230  ;;  %3294 = vadd.xlane.f32.xlu1 %v9157_v43  ;;  %v9162_v19 = vpop.eup %7296 }
 0x983   :  { %7304 = vpow2.f32 %v3266_v0  ;;  %v3268_v16 = vmul.f32 1.442695, %v3247_v52  ;;  %v3252_v29 = vsub.f32 %v9090_v12, %v3231_v45 }
 0x984   :  { %v3233_v3 = vpop.xlane.xlu1 %3232  ;;  %7306 = vpow2.f32 %v3272_v32 }
 0x985   :  { %7308 = vpow2.f32 %v3268_v16  ;;  %v3278_v30 = vmul.f32 1.442695, %v3252_v29  ;;  %v3253_v12 = vsub.f32 %v9094_v23, %v3233_v3 }
 0x986   :  { %v3227_v9 = vpop.xlane.xlu0 %3226  ;;  %3290 = vadd.xlane.f32.xlu1 %v9162_v19  ;;  %v9166_v33 = vpop.eup %7298 }
 0x987   :  { %v3250_v60 = vsub.f32 %v9098_v35, %v3227_v9  ;;  %7310 = vpow2.f32 %v3278_v30  ;;  %v3280_v23 = vmul.f32 1.442695, %v3253_v12  ;;  %v9212_v9 = vadd.f32 %v9032_v18, %v10664_v63 }
 0x988   :  { %v3229_v55 = vpop.xlane.xlu1 %3228  ;;  %v9216_v30 = vadd.f32 %v9028_v6, %v10663_v22  ;;  %v9231_v18 = vadd.f32 %v9036_v5, %v10668_v27  ;;  %v9236_v6 = vadd.f32 %v9040_v20, %v10669_v26  ;;  %v9251_v5 = vadd.f32 %v9044_v57, %v10672_v40 }
 0x989   :  { %v9168_v42 = vpop.eup %7300  ;;  %v3251_v44 = vsub.f32 %v9102_v49, %v3229_v55  ;;  %v3274_v62 = vmul.f32 1.442695, %v3250_v60  ;;  %v9221_v60 = vadd.f32 %v9026_v7, %v10662_v47  ;;  %v9226_v55 = vadd.f32 %v9030_v51, %v10665_v34 }
 0x98a   :  { %v3239_v41 = vpop.xlane.xlu0 %3238  ;;  %3302 = vadd.xlane.f32.xlu0 %v9168_v42  ;;  %3296 = vadd.xlane.f32.xlu1 %v9166_v33  ;;  %v9175_v35 = vpop.eup %7302  ;;  %v9241_v7 = vadd.f32 %v9034_v54, %v10666_v25  ;;  %v9246_v51 = vadd.f32 %v9038_v8, %v10667_v1  ;;  %v9256_v20 = vadd.f32 %v9048_v21, %v10673_v61 }
 0x98b   :  { %v3276_v24 = vmul.f32 1.442695, %v3251_v44  ;;  %v3256_v15 = vsub.f32 %v9106_v39, %v3239_v41  ;;  %v9261_v54 = vadd.f32 %v9042_v13, %v10670_v53  ;;  %v9266_v8 = vadd.f32 %v9046_v10, %v10671_v50 }
 0x98c   :  { %v9271_v57 = vadd.f32 %v9052_v14, %v10675_v48  ;;  %v9276_v21 = vadd.f32 %v9056_v38, %v10681_v4  ;;  %v9281_v13 = vadd.f32 %v9050_v56, %v10674_v2  ;;  %v9286_v10 = vadd.f32 %v9054_v17, %v10680_v36  ;;  %v3241_v14 = vpop.xlane.xlu1 %3240  ;;  %v10704_v56 = vld [vmem:[#allocation32_spill] sm:$0xff] }
 0x98d   :  { %v9177_v11 = vpop.eup %7304  ;;  %7312 = vpow2.f32 %v3276_v24  ;;  %v3286_v28 = vmul.f32 1.442695, %v3256_v15  ;;  %v3257_v41 = vsub.f32 %v10704_v56, %v3241_v14  ;;  %v10707_v4 = vld [vmem:[#allocation40_spill] sm:$0xff] }
 0x98e   :  { %3298 = vadd.xlane.f32.xlu0 %v9177_v11  ;;  %v3235_v49 = vpop.xlane.xlu0 %3234  ;;  %3292 = vadd.xlane.f32.xlu1 %v9175_v35  ;;  %7314 = vpow2.f32 %v3274_v62  ;;  %v9182_v0 = vpop.eup %7306  ;;  %v10705_v62 = vld [vmem:[#allocation59_spill] sm:$0xff] }
 0x98f   :  { %v3254_v59 = vsub.f32 %v9114_v37, %v3235_v49  ;;  %v9184_v52 = vpop.eup %7308  ;;  %7316 = vpow2.f32 %v3286_v28  ;;  %v3288_v28 = vmul.f32 1.442695, %v3257_v41 }
 0x990   :  { %7318 = vpow2.f32 %v3280_v23  ;;  %v3237_v44 = vpop.xlane.xlu1 %3236 }
 0x991   :  { %v3282_v39 = vmul.f32 1.442695, %v3254_v59  ;;  %v9188_v32 = vpop.eup %7310  ;;  %v3255_v24 = vsub.f32 %v10705_v62, %v3237_v44 }
 0x992   :  { %3304 = vadd.xlane.f32.xlu0 %v9182_v0  ;;  %3300 = vadd.xlane.f32.xlu1 %v9184_v52  ;;  %v9296_v15 = vpop.permute.xlu0 %4205 }
 0x993   :  { %7320 = vpow2.f32 %v3282_v39  ;;  %v3284_v49 = vmul.f32 1.442695, %v3255_v24 }
 0x994   :  { %v9292_v38 = vpop.permute.xlu1 %4203  ;;  %7322 = vpow2.f32 %v3288_v28 }
 0x995   :  { %7324 = vpow2.f32 %v3284_v49 }
 0x996   :  { %3310 = vadd.xlane.f32.xlu0 %v9188_v32 }
 0x997   :  { %v9191_v45 = vpop.eup %7312 }
 0x998   :  { %3308 = vadd.xlane.f32.xlu1 %v9191_v45  ;;  %v9194_v37 = vpop.eup %7314 }
 0x999   :  { %v9197_v16 = vpop.eup %7316 }
 0x99a   :  { %3306 = vadd.xlane.f32.xlu0 %v9194_v37  ;;  %v9200_v29 = vpop.eup %7318 }
 0x99c   :  { %3318 = vadd.xlane.f32.xlu1 %v9197_v16 }
 0x99d   :  { %v9203_v3 = vpop.eup %7320 }
 0x99e   :  { %3312 = vadd.xlane.f32.xlu0 %v9200_v29  ;;  %v9298_v44 = vpop.eup %7322 }
 0x99f   :  { %v9300_v56 = vpop.eup %7324 }
 0x9a0   :  { %3314 = vadd.xlane.f32.xlu1 %v9203_v3 }
 0x9b1   :  { %4207 = vrot.lane.b32.xlu1 %v8200_v58, %s7796_s19 }
 0x9b4   :  { %4209 = vrot.lane.b32.xlu0 %v8208_v46, %s7796_s19 }
 0x9d3   :  { %2651 = vmax.xlane.f32.xlu0 %v9212_v9 }
 0x9d5   :  { %2649 = vmax.xlane.f32.xlu1 %v9216_v30 }
 0x9d7   :  { %2653 = vmax.xlane.f32.xlu0 %v9221_v60 }
 0x9d9   :  { %2655 = vmax.xlane.f32.xlu1 %v9226_v55 }
 0x9db   :  { %2657 = vmax.xlane.f32.xlu0 %v9231_v18 }
 0x9dd   :  { %2659 = vmax.xlane.f32.xlu1 %v9236_v6 }
 0x9df   :  { %2661 = vmax.xlane.f32.xlu0 %v9241_v7 }
 0x9e1   :  { %2663 = vmax.xlane.f32.xlu1 %v9246_v51 }
 0x9e3   :  { %2665 = vmax.xlane.f32.xlu0 %v9251_v5 }
 0x9e5   :  { %2667 = vmax.xlane.f32.xlu1 %v9256_v20 }
 0x9e7   :  { %2669 = vmax.xlane.f32.xlu0 %v9261_v54 }
 0x9e9   :  { %2671 = vmax.xlane.f32.xlu1 %v9266_v8 }
 0x9eb   :  { %2673 = vmax.xlane.f32.xlu0 %v9271_v57 }
 0x9ed   :  { %2675 = vmax.xlane.f32.xlu1 %v9276_v21 }
 0x9ef   :  { %2677 = vmax.xlane.f32.xlu0 %v9281_v13 }
 0x9f1   :  { %2679 = vmax.xlane.f32.xlu1 %v9286_v10 }
 0xa05   :  { %2801 = vrot.lane.b32.xlu0 %v8115_v31, %s7794_s13 }
 0xa0f   :  { %v3295_v12 = vpop.xlane.xlu1 %3294 }
 0xa13   :  { %v3291_v17 = vpop.xlane.xlu1 %3290 }
 0xa17   :  { %v3303_v23 = vpop.xlane.xlu0 %3302  ;;  %v3297_v59 = vpop.xlane.xlu1 %3296 }
 0xa18   :  { %7326 = vrcp.f32 %v3297_v59 }
 0xa19   :  { %7328 = vrcp.f32 %v3291_v17 }
 0xa1a   :  { %7330 = vrcp.f32 %v3295_v12 }
 0xa1b   :  { %v3299_v39 = vpop.xlane.xlu0 %3298  ;;  %v3293_v58 = vpop.xlane.xlu1 %3292 }
 0xa1c   :  { %7332 = vrcp.f32 %v3293_v58 }
 0xa1d   :  { %7334 = vrcp.f32 %v3299_v39 }
 0xa1f   :  { %v3305_v46 = vpop.xlane.xlu0 %3304  ;;  %v3301_v14 = vpop.xlane.xlu1 %3300 }
 0xa20   :  { %7336 = vrcp.f32 %v3301_v14 }
 0xa21   :  { %7338 = vrcp.f32 %v3305_v46 }
 0xa22   :  { %v7327_v62 = vpop.eup %7326  ;;  %7340 = vrcp.f32 %v3303_v23 }
 0xa23   :  { %v3311_v41 = vpop.xlane.xlu0 %3310  ;;  %v7329_v24 = vpop.eup %7328  ;;  %v3341_v58 = vmul.f32 %v7327_v62, %v9166_v33 }
 0xa24   :  { %3320 = vadd.xlane.f32.xlu0 %v9298_v44  ;;  %v7331_v28 = vpop.eup %7330  ;;  %v3338_v46 = vmul.f32 %v7329_v24, %v9162_v19  ;;  %v10708_v24 = vld [vmem:[#allocation31_spill] sm:$0xff] }
 0xa25   :  { %v3309_v17 = vpop.xlane.xlu1 %3308  ;;  %v3340_v23 = vmul.f32 %v7331_v28, %v9157_v43 }
 0xa26   :  { %7342 = vrcp.f32 %v3309_v17  ;;  %v7333_v12 = vpop.eup %7332 }
 0xa27   :  { %v3307_v49 = vpop.xlane.xlu0 %3306  ;;  %v3339_v59 = vmul.f32 %v7333_v12, %v9175_v35  ;;  %v7335_v39 = vpop.eup %7334  ;;  %v3355_v50 = vpack.c.bf16 %v3341_v58, %v3340_v23 }
 0xa28   :  { %7344 = vrcp.f32 %v3307_v49  ;;  %3316 = vadd.xlane.f32.xlu0 %v9300_v56  ;;  %v3342_v33 = vmul.f32 %v7335_v39, %v9177_v11  ;;  %v10706_v49 = vld [vmem:[#allocation39_spill] sm:$0xff]  ;;  %v10709_v39 = vld [vmem:[#allocation20_spill] sm:$0xff] }
 0xa29   :  { %7346 = vrcp.f32 %v3311_v41  ;;  %v3354_v14 = vpack.c.bf16 %v3339_v59, %v3338_v46  ;;  %v9312_v19 = vpack.c.bf16 %v10707_v4, %v10706_v49 }
 0xa2a   :  { %v7337_v36 = vpop.eup %7336 }
 0xa2b   :  { %v3313_v48 = vpop.xlane.xlu0 %3312  ;;  %v7339_v17 = vpop.eup %7338  ;;  %6621 = vmatprep.mubr.bf16.mxu0 %v3354_v14  ;;  %v3343_v62 = vmul.f32 %v7337_v36, %v9184_v52 }
 0xa2c   :  { %7348 = vrcp.f32 %v3313_v48  ;;  %6622 = vmatmul.mubr.bf16.vlgmr.msra.gmra.mrb[128].mxu0 %v3355_v50  ;;  %v7341_v35 = vpop.eup %7340  ;;  %v3345_v41 = vmul.f32 %v7339_v17, %v9182_v0 }
 0xa2d   :  { %6656 = vmatpush3.bf16.msra.mxu0 %v10708_v24  ;;  %v3356_v43 = vpack.c.bf16 %v3343_v62, %v3342_v33  ;;  %v3344_v48 = vmul.f32 %v7341_v35, %v9168_v42  ;;  %v9324_v42 = vpop.xlane.xlu1 %3318 }
 0xa2e   :  { %6723 = vmatprep.subr.bf16.mxu0 %v9312_v19 }
 0xa2f   :  { %6625 = vmatprep.mubr.bf16.mxu0 %v3356_v43  ;;  %v3357_v12 = vpack.c.bf16 %v3345_v41, %v3344_v48 }
 0xa30   :  { %v7343_v28 = vpop.eup %7342 }
 0xa31   :  { %v3347_v4 = vmul.f32 %v7343_v28, %v9191_v45  ;;  %v9326_v23 = vpop.xlane.xlu1 %3314 }
 0xa32   :  { %v7345_v11 = vpop.eup %7344 }
 0xa33   :  { %v3346_v36 = vmul.f32 %v7345_v11, %v9194_v37  ;;  %v7347_v52 = vpop.eup %7346  ;;  %v9328_v37 = vpop.permute.xlu0 %4209 }
 0xa34   :  { %6626 = vmatmul.mubr.bf16.gmra.mrb[132].mxu0 %v3357_v12  ;;  %v3348_v46 = vmul.f32 %v7347_v52, %v9188_v32 }
 0xa35   :  { %v3358_v50 = vpack.c.bf16 %v3347_v4, %v3346_v36  ;;  %v9330_v45 = vpop.permute.xlu1 %4207 }
 0xa36   :  { %v7349_v58 = vpop.eup %7348 }
 0xa37   :  { %6629 = vmatprep.mubr.bf16.mxu0 %v3358_v50  ;;  %v3349_v59 = vmul.f32 %v7349_v58, %v9200_v29 }
 0xa39   :  { %v3359_v0 = vpack.c.bf16 %v3349_v59, %v3348_v46 }
 0xa3c   :  { %6630 = vmatmul.mubr.bf16.gmra.mrb[136].mxu0 %v3359_v0 }
 0xa3e   :  { %2805 = vrot.lane.b32.xlu0 %v10709_v39, %s7794_s13 }
 0xa60   :  { %v2652_v14 = vpop.xlane.xlu0 %2651 }
 0xa61   :  { %v2682_v33 = vsub.f32 %v9212_v9, %v2652_v14 }
 0xa62   :  { %v2650_v17 = vpop.xlane.xlu1 %2649 }
 0xa63   :  { %v2681_v32 = vsub.f32 %v9216_v30, %v2650_v17  ;;  %v2699_v35 = vmul.f32 1.442695, %v2682_v33 }
 0xa64   :  { %v2654_v29 = vpop.xlane.xlu0 %2653 }
 0xa65   :  { %v2697_v62 = vmul.f32 1.442695, %v2681_v32  ;;  %v2683_v24 = vsub.f32 %v9221_v60, %v2654_v29  ;;  %v10710_v29 = vld [vmem:[#allocation16_spill] sm:$0xff] }
 0xa66   :  { %v2656_v49 = vpop.xlane.xlu1 %2655 }
 0xa67   :  { %7350 = vpow2.f32 %v2697_v62  ;;  %v2701_v48 = vmul.f32 1.442695, %v2683_v24  ;;  %v2684_v11 = vsub.f32 %v9226_v55, %v2656_v49  ;;  %v10711_v62 = vld [vmem:[#allocation19_spill] sm:$0xff] }
 0xa68   :  { %v2658_v43 = vpop.xlane.xlu0 %2657  ;;  %7352 = vpow2.f32 %v2699_v35 }
 0xa69   :  { %v2685_v41 = vsub.f32 %v9231_v18, %v2658_v43  ;;  %v2703_v4 = vmul.f32 1.442695, %v2684_v11 }
 0xa6a   :  { %v2660_v28 = vpop.xlane.xlu1 %2659 }
 0xa6b   :  { %v2705_v12 = vmul.f32 1.442695, %v2685_v41  ;;  %v2686_v49 = vsub.f32 %v9236_v6, %v2660_v28 }
 0xa6c   :  { %v2662_v36 = vpop.xlane.xlu0 %2661 }
 0xa6d   :  { %7354 = vpow2.f32 %v2705_v12  ;;  %v2687_v9 = vsub.f32 %v9241_v7, %v2662_v36  ;;  %v2707_v43 = vmul.f32 1.442695, %v2686_v49  ;;  %v10712_v49 = vld [vmem:[#allocation23_spill] sm:$0xff] }
 0xa6e   :  { %v2664_v30 = vpop.xlane.xlu1 %2663  ;;  %7356 = vpow2.f32 %v2701_v48 }
 0xa6f   :  { %v2709_v52 = vmul.f32 1.442695, %v2687_v9  ;;  %v2688_v50 = vsub.f32 %v9246_v51, %v2664_v30 }
 0xa70   :  { %v2666_v60 = vpop.xlane.xlu0 %2665 }
 0xa71   :  { %v9339_v58 = vpop.eup %7350  ;;  %7358 = vpow2.f32 %v2709_v52  ;;  %v2711_v18 = vmul.f32 1.442695, %v2688_v50  ;;  %v2689_v24 = vsub.f32 %v9251_v5, %v2666_v60 }
 0xa72   :  { %2729 = vadd.xlane.f32.xlu1 %v9339_v58  ;;  %7360 = vpow2.f32 %v2703_v4  ;;  %v9342_v46 = vpop.eup %7352  ;;  %v2668_v35 = vpop.xlane.xlu1 %2667 }
 0xa73   :  { %7362 = vpow2.f32 %v2711_v18  ;;  %v2713_v41 = vmul.f32 1.442695, %v2689_v24 }
 0xa74   :  { %v2670_v55 = vpop.xlane.xlu0 %2669  ;;  %7364 = vpow2.f32 %v2707_v43  ;;  %v10713_v43 = vld [vmem:[#allocation33_spill] sm:$0xff] }
 0xa75   :  { %v2691_v48 = vsub.f32 %v9261_v54, %v2670_v55  ;;  %7366 = vpow2.f32 %v2713_v41  ;;  %v10714_v41 = vld [vmem:[#allocation34_spill] sm:$0xff] }
 0xa76   :  { %2731 = vadd.xlane.f32.xlu1 %v9342_v46  ;;  %v2672_v11 = vpop.xlane.xlu1 %2671 }
 0xa77   :  { %v9345_v7 = vpop.eup %7354  ;;  %v2717_v12 = vmul.f32 1.442695, %v2691_v48  ;;  %v2692_v36 = vsub.f32 %v9266_v8, %v2672_v11  ;;  %v10718_v48 = vld [vmem:[#allocation38_spill] sm:$0xff] }
 0xa78   :  { %v9347_v59 = vpop.xlane.xlu0 %2673  ;;  %2737 = vadd.xlane.f32.xlu0 %v9345_v7  ;;  %v9350_v51 = vpop.eup %7356 }
 0xa79   :  { %7368 = vpow2.f32 %v2717_v12  ;;  %v2719_v9 = vmul.f32 1.442695, %v2692_v36  ;;  %v10719_v36 = vld [vmem:[#allocation37_spill] sm:$0xff] }
 0xa7a   :  { %2733 = vadd.xlane.f32.xlu1 %v9350_v51  ;;  %v2676_v12 = vpop.xlane.xlu1 %2675 }
 0xa7b   :  { %v9353_v0 = vpop.eup %7358  ;;  %7370 = vpow2.f32 %v2719_v9  ;;  %v10720_v9 = vld [vmem:[#allocation61_spill] sm:$0xff] }
 0xa7c   :  { %v9355_v14 = vpop.xlane.xlu0 %2677  ;;  %2741 = vadd.xlane.f32.xlu0 %v9353_v0  ;;  %v9358_v17 = vpop.eup %7360 }
 0xa7d   :  { %v9361_v33 = vpop.eup %7362 }
 0xa7e   :  { %2735 = vadd.xlane.f32.xlu1 %v9358_v17  ;;  %v9372_v4 = vpop.eup %7364 }
 0xa7f   :  { %v9375_v6 = vpop.eup %7366 }
 0xa80   :  { %v2802_v32 = vpop.permute.xlu0 %2801  ;;  %2743 = vadd.xlane.f32.xlu0 %v9361_v33 }
 0xa81   :  { %6537 = vmatprep.subr.bf16.mxu1 %v2802_v32 }
 0xa82   :  { %6538 = vmatpush3.bf16.msra.mxu1 %v2802_v32 }
 0xa83   :  { %v9380_v54 = vpop.eup %7368 }
 0xa85   :  { %v9383_v8 = vpop.eup %7370 }
 0xa8f   :  { %2803 = vrot.lane.b32.xlu1 %v10710_v29, %s7794_s13 }
 0xa96   :  { %2807 = vrot.lane.b32.xlu0 %v10711_v62, %s7794_s13 }
 0xab1   :  { %v3321_v30 = vpop.xlane.xlu0 %3320 }
 0xab2   :  { %7372 = vrcp.f32 %v3321_v30  ;;  %v2680_v30 = vpop.xlane.xlu1 %2679 }
 0xab3   :  { %2739 = vadd.xlane.f32.xlu1 %v9372_v4  ;;  %7374 = vrcp.f32 %v9326_v23 }
 0xab4   :  { %7376 = vrcp.f32 %v9324_v42 }
 0xab5   :  { %v3317_v5 = vpop.xlane.xlu0 %3316  ;;  %2745 = vadd.xlane.f32.xlu0 %v9375_v6 }
 0xab6   :  { %7378 = vrcp.f32 %v3317_v5 }
 0xab9   :  { %2749 = vadd.xlane.f32.xlu0 %v9380_v54 }
 0xabc   :  { %v7373_v28 = vpop.eup %7372 }
 0xabd   :  { %2751 = vadd.xlane.f32.xlu0 %v9383_v8  ;;  %v7375_v52 = vpop.eup %7374  ;;  %v3353_v23 = vmul.f32 %v7373_v28, %v9298_v44  ;;  %v2690_v44 = vsub.f32 %v9256_v20, %v2668_v35  ;;  %v2696_v20 = vsub.f32 %v9286_v10, %v2680_v30  ;;  %v10721_v35 = vld [vmem:[#allocation60_spill] sm:$0xff] }
 0xabe   :  { %v7377_v50 = vpop.eup %7376  ;;  %v3350_v42 = vmul.f32 %v7375_v52, %v9203_v3  ;;  %v10715_v3 = vld [vmem:[#allocation36_spill] sm:$0xff] }
 0xabf   :  { %v3352_v55 = vmul.f32 %v7377_v50, %v9197_v16  ;;  %v10716_v16 = vld [vmem:[#allocation26_spill] sm:$0xff]  ;;  %v2715_v11 = vmul.f32 1.442695, %v2690_v44  ;;  %v2727_v52 = vmul.f32 1.442695, %v2696_v20  ;;  %v10722_v50 = vld [vmem:[#allocation63_spill] sm:$0xff] }
 0xac0   :  { %v7379_v60 = vpop.eup %7378 }
 0xac1   :  { %v3351_v18 = vmul.f32 %v7379_v60, %v9300_v56  ;;  %v3361_v24 = vpack.c.bf16 %v3353_v23, %v3352_v55  ;;  %v10717_v56 = vld [vmem:[#allocation35_spill] sm:$0xff]  ;;  %7380 = vpow2.f32 %v2715_v11  ;;  %v10724_v60 = vld [vmem:[#allocation65_spill] sm:$0xff] }
 0xac3   :  { %v3360_v32 = vpack.c.bf16 %v3351_v18, %v3350_v42  ;;  %v10725_v42 = vld [vmem:[#allocation64_spill] sm:$0xff]  ;;  %v10726_v18 = vld [vmem:[#allocation22_spill] sm:$0xff] }
 0xac4   :  { %2809 = vrot.lane.b32.xlu1 %v10712_v49, %s7794_s13 }
 0xac5   :  { %6633 = vmatprep.mubr.bf16.mxu0 %v3360_v32 }
 0xac6   :  { %6634 = vmatmul.mubr.bf16.gmra.mrb[140].mxu0 %v3361_v24  ;;  %v2806_v24 = vpop.permute.xlu0 %2805 }
 0xac7   :  { %6657 = vmatprep.mubr.msk.bf16.mxu0 %vm884_vm0, %v10713_v43 }
 0xacb   :  { %v9414_v28 = vpop.eup %7380 }
 0xace   :  { %6658 = vmatmul.mubr.msk.bf16.vlgmr.msra.gmra.mrb[144].mxu0 %vm884_vm0, %v10714_v41 }
 0xacf   :  { %6724 = vmatpush3.bf16.msra.mxu0 %v9312_v19  ;;  %6661 = vmatprep.mubr.msk.bf16.mxu0 %vm884_vm0, %v10715_v3  ;;  %v2694_v19 = vsub.f32 %v9276_v21, %v2676_v12  ;;  %v10723_v21 = vld [vmem:[#allocation62_spill] sm:$0xff] }
 0xad1   :  { %v2723_v5 = vmul.f32 1.442695, %v2694_v19 }
 0xad3   :  { %2813 = vrot.lane.b32.xlu0 %v10716_v16, %s7794_s13  ;;  %7382 = vpow2.f32 %v2723_v5 }
 0xad4   :  { %7384 = vpow2.f32 %v2727_v52 }
 0xad6   :  { %6662 = vmatmul.mubr.msk.bf16.gmra.mrb[148].mxu0 %vm884_vm0, %v10717_v56 }
 0xad7   :  { %6665 = vmatprep.mubr.msk.bf16.mxu0 %vm884_vm0, %v10718_v48 }
 0xadd   :  { %v9423_v10 = vpop.eup %7382 }
 0xade   :  { %6666 = vmatmul.mubr.msk.bf16.gmra.mrb[152].mxu0 %vm884_vm0, %v10719_v36  ;;  %v9426_v23 = vpop.eup %7384  ;;  %v2693_v36 = vsub.f32 %v9271_v57, %v9347_v59  ;;  %v2695_v57 = vsub.f32 %v9281_v13, %v9355_v14 }
 0xadf   :  { %6669 = vmatprep.mubr.msk.bf16.mxu0 %vm884_vm0, %v10720_v9 }
 0xae0   :  { %v2721_v52 = vmul.f32 1.442695, %v2693_v36  ;;  %v2725_v36 = vmul.f32 1.442695, %v2695_v57 }
 0xae6   :  { %6670 = vmatmul.mubr.msk.bf16.gmra.mrb[156].mxu0 %vm884_vm0, %v10721_v35 }
 0xae7   :  { %6725 = vmatprep.mubr.msk.bf16.mxu0 %vm884_vm0, %v10722_v50 }
 0xae8   :  { %2747 = vadd.xlane.f32.xlu1 %v9414_v28 }
 0xaee   :  { %6726 = vmatmul.mubr.msk.bf16.vlgmr.msra.gmra.mrb[160].mxu0 %vm884_vm0, %v10723_v21 }
 0xaef   :  { %6729 = vmatprep.mubr.msk.bf16.mxu0 %vm884_vm0, %v10724_v60 }
 0xaf2   :  { %2755 = vadd.xlane.f32.xlu0 %v9423_v10 }
 0xaf6   :  { %6730 = vmatmul.mubr.msk.bf16.gmra.mrb[164].mxu0 %vm884_vm0, %v10725_v42  ;;  %2759 = vadd.xlane.f32.xlu0 %v9426_v23 }
 0xaf7   :  { %6733 = vmatprep.mubr.msk.bf16.mxu0 %vm884_vm0, %v9292_v38 }
 0xaf9   :  { %2811 = vrot.lane.b32.xlu1 %v10726_v18, %s7794_s13 }
 0xafe   :  { %6734 = vmatmul.mubr.msk.bf16.gmra.mrb[168].mxu0 %vm884_vm0, %v9296_v15 }
 0xaff   :  { %6737 = vmatprep.mubr.msk.bf16.mxu0 %vm884_vm0, %v9330_v45  ;;  %v2730_v55 = vpop.xlane.xlu1 %2729  ;;  %v9439_v32 = vpop.f32.mrb[128].mxu0 }
 0xb00   :  { %v9441_v43 = vpop.f32.mrb[129].mxu0  ;;  %7386 = vrcp.f32 %v2730_v55 }
 0xb01   :  { %v9443_v41 = vpop.f32.mrb[130].mxu0 }
 0xb02   :  { %v9447_v3 = vpop.f32.mrb[131].mxu0 }
 0xb03   :  { %v2732_v44 = vpop.xlane.xlu1 %2731 }
 0xb04   :  { %7388 = vrcp.f32 %v2732_v44 }
 0xb05   :  { %v9451_v45 = vpop.xlane.xlu0 %2737  ;;  %7390 = vpow2.f32 %v2721_v52  ;;  %v10733_v52 = vld [vmem:[#allocation18_spill] sm:$0xff] }
 0xb06   :  { %6738 = vmatmul.mubr.msk.bf16.gmra.mrb[172].mxu0 %vm884_vm0, %v9328_v37  ;;  %7392 = vpow2.f32 %v2725_v36  ;;  %v10737_v36 = vld [vmem:[#allocation15_spill] sm:$0xff] }
 0xb07   :  { %v9455_v56 = vpop.xlane.xlu1 %2733  ;;  %v9457_v48 = vpop.f32.mrb[132].mxu0 }
 0xb08   :  { %10727 = vst [vmem:[#allocation32_spill] sm:$0xff] %v9457_v48  ;;  %v9459_v11 = vpop.f32.mrb[133].mxu0 }
 0xb09   :  { %v9461_v12 = vpop.xlane.xlu0 %2741  ;;  %v9465_v19 = vpop.f32.mrb[134].mxu0 }
 0xb0a   :  { %10728 = vst [vmem:[#allocation59_spill] sm:$0xff] %v9465_v19  ;;  %v9469_v30 = vpop.f32.mrb[135].mxu0  ;;  %v7387_v37 = vpop.eup %7386 }
 0xb0b   :  { %v9471_v5 = vpop.xlane.xlu1 %2735  ;;  %v2777_v21 = vmul.f32 %v7387_v37, %v9339_v58 }
 0xb0c   :  { %4484 = vrot.lane.b32.xlu0 %v8115_v31, %s7796_s19  ;;  %7394 = vrcp.f32 %v9471_v5 }
 0xb0d   :  { %v9479_v59 = vpop.xlane.xlu0 %2743 }
 0xb0e   :  { %v7389_v35 = vpop.eup %7388 }
 0xb0f   :  { %v2804_v50 = vpop.permute.xlu1 %2803  ;;  %v2778_v60 = vmul.f32 %v7389_v35, %v9342_v46  ;;  %v9483_v42 = vpop.f32.mrb[136].mxu0 }
 0xb10   :  { %10729 = vst [vmem:[#allocation39_spill] sm:$0xff] %v9483_v42  ;;  %4488 = vrot.lane.b32.xlu0 %v10709_v39, %s7796_s19  ;;  %6539 = vmatprep.subr.bf16.mxu1 %v2804_v50  ;;  %v9487_v55 = vpop.f32.mrb[137].mxu0  ;;  %v9501_v35 = vpop.eup %7390 }
 0xb11   :  { %10730 = vst [vmem:[#allocation40_spill] sm:$0xff] %v9487_v55  ;;  %6540 = vmatpush3.bf16.msra.mxu1 %v2804_v50  ;;  %v2793_v44 = vpack.c.bf16 %v2778_v60, %v2777_v21  ;;  %v9489_v13 = vpop.f32.mrb[138].mxu0  ;;  %v2808_v37 = vpop.permute.xlu0 %2807  ;;  %v10734_v50 = vld [vmem:[#allocation24_spill] sm:$0xff]  ;;  %v10736_v21 = vld [vmem:[#allocation25_spill] sm:$0xff] }
 0xb12   :  { %10731 = vst [vmem:[#allocation31_spill] sm:$0xff] %v9489_v13  ;;  %6541 = vmatprep.subr.bf16.mxu1 %v2806_v24  ;;  %v9493_v14 = vpop.f32.mrb[139].mxu0  ;;  %v9506_v57 = vpop.eup %7392 }
 0xb13   :  { %10732 = vst [vmem:[#allocation20_spill] sm:$0xff] %v9493_v14  ;;  %6553 = vmatprep.mubr.bf16.mxu1 %v2793_v44 }
 0xb14   :  { %4490 = vrot.lane.b32.xlu0 %v10711_v62, %s7796_s19 }
 0xb15   :  { %6542 = vmatpush3.bf16.msra.mxu1 %v2806_v24  ;;  %v10735_v24 = vld [vmem:[#allocation27_spill] sm:$0xff] }
 0xb16   :  { %6543 = vmatprep.subr.bf16.mxu1 %v2808_v37 }
 0xb18   :  { %4496 = vrot.lane.b32.xlu0 %v10716_v16, %s7796_s19 }
 0xb19   :  { %6544 = vmatpush3.bf16.msra.mxu1 %v2808_v37  ;;  %v10738_v37 = vld [vmem:[#allocation21_spill] sm:$0xff] }
 0xb1c   :  { %4758 = vrot.lane.b32.xlu0 %v10733_v52, %s7797_s0  ;;  %v10739_v52 = vld [vmem:[#allocation28_spill] sm:$0xff] }
 0xb1d   :  { %2753 = vadd.xlane.f32.xlu1 %v9501_v35 }
 0xb20   :  { %4762 = vrot.lane.b32.xlu0 %v10734_v50, %s7797_s0 }
 0xb21   :  { %2757 = vadd.xlane.f32.xlu1 %v9506_v57 }
 0xb24   :  { %4764 = vrot.lane.b32.xlu0 %v10735_v24, %s7797_s0 }
 0xb32   :  { %2815 = vrot.lane.b32.xlu1 %v10736_v21, %s7794_s13 }
 0xb36   :  { %4486 = vrot.lane.b32.xlu1 %v10710_v29, %s7796_s19 }
 0xb3a   :  { %4492 = vrot.lane.b32.xlu1 %v10712_v49, %s7796_s19 }
 0xb3e   :  { %4494 = vrot.lane.b32.xlu1 %v10726_v18, %s7796_s19 }
 0xb40   :  { %v2740_v60 = vpop.xlane.xlu1 %2739 }
 0xb41   :  { %7396 = vrcp.f32 %v2740_v60 }
 0xb42   :  { %4498 = vrot.lane.b32.xlu1 %v10736_v21, %s7796_s19  ;;  %v2746_v50 = vpop.xlane.xlu0 %2745  ;;  %7398 = vrcp.f32 %v9455_v56 }
 0xb43   :  { %7400 = vrcp.f32 %v9451_v45 }
 0xb44   :  { %v2810_v44 = vpop.permute.xlu1 %2809  ;;  %7402 = vrcp.f32 %v9479_v59 }
 0xb45   :  { %6545 = vmatprep.subr.bf16.mxu1 %v2810_v44 }
 0xb46   :  { %4756 = vrot.lane.b32.xlu1 %v10737_v36, %s7797_s0  ;;  %6546 = vmatpush3.bf16.msra.mxu1 %v2810_v44  ;;  %v9529_v24 = vpop.xlane.xlu0 %2749 }
 0xb4a   :  { %4760 = vrot.lane.b32.xlu1 %v10738_v37, %s7797_s0  ;;  %v9531_v58 = vpop.xlane.xlu0 %2751 }
 0xb4e   :  { %4766 = vrot.lane.b32.xlu1 %v10739_v52, %s7797_s0  ;;  %v2814_v20 = vpop.permute.xlu0 %2813 }
 0xb75   :  { %v2748_v46 = vpop.xlane.xlu1 %2747 }
 0xb76   :  { %7404 = vrcp.f32 %v2748_v46 }
 0xb77   :  { %7406 = vrcp.f32 %v9461_v12 }
 0xb78   :  { %7408 = vrcp.f32 %v2746_v50 }
 0xb79   :  { %v2812_v9 = vpop.permute.xlu1 %2811  ;;  %7410 = vrcp.f32 %v9531_v58 }
 0xb7a   :  { %6547 = vmatprep.subr.bf16.mxu1 %v2812_v9 }
 0xb7b   :  { %6548 = vmatpush3.bf16.msra.mxu1 %v2812_v9 }
 0xb7c   :  { %6549 = vmatprep.subr.bf16.mxu1 %v2814_v20 }
 0xb7f   :  { %v9533_v38 = vpop.xlane.xlu0 %2755  ;;  %6550 = vmatpush3.bf16.msra.mxu1 %v2814_v20 }
 0xb83   :  { %v9535_v44 = vpop.xlane.xlu0 %2759 }
 0xb87   :  { %v4485_v36 = vpop.permute.xlu0 %4484 }
 0xb88   :  { %6741 = vmatprep.subr.bf16.mxu0 %v4485_v36 }
 0xb89   :  { %6742 = vmatpush3.bf16.msra.mxu0 %v4485_v36 }
 0xb8b   :  { %v4489_v58 = vpop.permute.xlu0 %4488 }
 0xb99   :  { %v9537_v37 = vpop.f32.mrb[140].mxu0 }
 0xb9a   :  { %10740 = vst [vmem:[#allocation19_spill] sm:$0xff] %v9537_v37  ;;  %v9539_v52 = vpop.f32.mrb[141].mxu0 }
 0xb9b   :  { %10741 = vst [vmem:[#allocation33_spill] sm:$0xff] %v9539_v52  ;;  %v9541_v15 = vpop.f32.mrb[142].mxu0 }
 0xb9c   :  { %10742 = vst [vmem:[#allocation34_spill] sm:$0xff] %v9541_v15  ;;  %v9545_v21 = vpop.f32.mrb[143].mxu0 }
 0xb9d   :  { %10743 = vst [vmem:[#allocation36_spill] sm:$0xff] %v9545_v21 }
 0xba1   :  { %v6659_v20 = vpop.f32.mrb[144].mxu0 }
 0xba2   :  { %v9550_v49 = vadd.f32 %v6659_v20, %v10662_v47  ;;  %v3708_v18 = vpop.f32.mrb[145].mxu0 }
 0xba3   :  { %v6660_v36 = vpop.f32.mrb[146].mxu0  ;;  %v9555_v13 = vadd.f32 %v3708_v18, %v10663_v22 }
 0xba4   :  { %v3711_v42 = vpop.f32.mrb[147].mxu0  ;;  %3775 = vmax.xlane.f32.xlu0 %v9550_v49  ;;  %v9561_v20 = vadd.f32 %v6660_v36, %v10665_v34 }
 0xba5   :  { %v9570_v18 = vadd.f32 %v3711_v42, %v10664_v63 }
 0xba8   :  { %3771 = vmax.xlane.f32.xlu0 %v9555_v13 }
 0xba9   :  { %v6663_v16 = vpop.f32.mrb[148].mxu0 }
 0xbaa   :  { %v9564_v9 = vadd.f32 %v6663_v16, %v10666_v25  ;;  %v3724_v37 = vpop.f32.mrb[149].mxu0  ;;  %v2754_v15 = vpop.xlane.xlu1 %2753 }
 0xbab   :  { %v6664_v5 = vpop.f32.mrb[150].mxu0  ;;  %v9573_v45 = vadd.f32 %v3724_v37, %v10668_v27  ;;  %v7395_v16 = vpop.eup %7394  ;;  %7412 = vrcp.f32 %v2754_v15 }
 0xbac   :  { %v3727_v60 = vpop.f32.mrb[151].mxu0  ;;  %3783 = vmax.xlane.f32.xlu1 %v9564_v9  ;;  %3777 = vmax.xlane.f32.xlu0 %v9561_v20  ;;  %v7397_v36 = vpop.eup %7396  ;;  %v2780_v46 = vmul.f32 %v7395_v16, %v9358_v17  ;;  %v9580_v42 = vadd.f32 %v6664_v5, %v10667_v1  ;;  %7414 = vrcp.f32 %v9529_v24 }
 0xbad   :  { %v7399_v52 = vpop.eup %7398  ;;  %v9583_v37 = vadd.f32 %v3727_v60, %v10669_v26  ;;  %v2782_v50 = vmul.f32 %v7397_v36, %v9372_v4  ;;  %7416 = vrcp.f32 %v9533_v38 }
 0xbae   :  { %v2758_v56 = vpop.xlane.xlu1 %2757  ;;  %v7401_v59 = vpop.eup %7400  ;;  %v2779_v48 = vmul.f32 %v7399_v52, %v9350_v51 }
 0xbaf   :  { %v2781_v5 = vmul.f32 %v7401_v59, %v9345_v7  ;;  %v7403_v51 = vpop.eup %7402  ;;  %7418 = vrcp.f32 %v2758_v56 }
 0xbb0   :  { %3779 = vmax.xlane.f32.xlu1 %v9573_v45  ;;  %3773 = vmax.xlane.f32.xlu0 %v9570_v18  ;;  %v2794_v16 = vpack.c.bf16 %v2780_v46, %v2779_v48  ;;  %v7405_v36 = vpop.eup %7404  ;;  %v2784_v38 = vmul.f32 %v7403_v51, %v9361_v33  ;;  %7420 = vrcp.f32 %v9535_v44 }
 0xbb1   :  { %v6667_v21 = vpop.f32.mrb[152].mxu0  ;;  %v2795_v52 = vpack.c.bf16 %v2782_v50, %v2781_v5  ;;  %v2786_v59 = vmul.f32 %v7405_v36, %v9414_v28  ;;  %v10744_v5 = vld [vmem:[#allocation58_spill] sm:$0xff] }
 0xbb2   :  { %v3740_v55 = vpop.f32.mrb[153].mxu0  ;;  %v2816_v14 = vpop.permute.xlu1 %2815  ;;  %v9595_v60 = vadd.f32 %v6667_v21, %v10670_v53 }
 0xbb3   :  { %6551 = vmatprep.subr.bf16.mxu1 %v2816_v14  ;;  %v6668_v12 = vpop.f32.mrb[154].mxu0  ;;  %v9602_v48 = vadd.f32 %v3740_v55, %v10672_v40 }
 0xbb4   :  { %v3743_v19 = vpop.f32.mrb[155].mxu0  ;;  %3785 = vmax.xlane.f32.xlu1 %v9580_v42  ;;  %3781 = vmax.xlane.f32.xlu0 %v9583_v37 }
 0xbb5   :  { %v9591_v17 = vadd.f32 %v3743_v19, %v10673_v61  ;;  %6552 = vmatpush3.bf16.msra.mxu1 %v2816_v14  ;;  %v7407_v19 = vpop.eup %7406 }
 0xbb6   :  { %v4487_v4 = vpop.permute.xlu1 %4486  ;;  %v7409_v15 = vpop.eup %7408  ;;  %v2783_v50 = vmul.f32 %v7407_v19, %v9353_v0 }
 0xbb7   :  { %6743 = vmatprep.subr.bf16.mxu0 %v4487_v4  ;;  %v7411_v28 = vpop.eup %7410 }
 0xbb8   :  { %6554 = vmatmul.mubr.bf16.vlgmr.msra.gmra.mrb[64].mxu1 %v2794_v16  ;;  %3791 = vmax.xlane.f32.xlu1 %v9595_v60  ;;  %v4491_v16 = vpop.permute.xlu0 %4490  ;;  %v2796_v51 = vpack.c.bf16 %v2784_v38, %v2783_v50  ;;  %v7413_v0 = vpop.eup %7412  ;;  %v2788_v38 = vmul.f32 %v7411_v28, %v9383_v8 }
 0xbb9   :  { %3789 = vmax.xlane.f32.xlu0 %v9591_v17  ;;  %6557 = vmatprep.mubr.bf16.mxu1 %v2795_v52  ;;  %v6671_v7 = vpop.f32.mrb[156].mxu0  ;;  %v10745_v52 = vld [vmem:[#allocation53_spill] sm:$0xff]  ;;  %v7415_v19 = vpop.eup %7414 }
 0xbba   :  { %6744 = vmatpush3.bf16.msra.mxu0 %v4487_v4  ;;  %v9605_v14 = vadd.f32 %v6671_v7, %v10674_v2  ;;  %v3756_v21 = vpop.f32.mrb[157].mxu0  ;;  %v2785_v4 = vmul.f32 %v7409_v15, %v9375_v6  ;;  %v9617_v33 = vadd.f32 %v6668_v12, %v10745_v52  ;;  %v4493_v56 = vpop.permute.xlu1 %4492  ;;  %v10746_v12 = vld [vmem:[#allocation56_spill] sm:$0xff] }
 0xbbb   :  { %6745 = vmatprep.subr.bf16.mxu0 %v4489_v58  ;;  %v6672_v24 = vpop.f32.mrb[158].mxu0  ;;  %v7417_v7 = vpop.eup %7416  ;;  %v9623_v15 = vadd.f32 %v3756_v21, %v10746_v12 }
 0xbbc   :  { %v3759_v46 = vpop.f32.mrb[159].mxu0  ;;  %3787 = vmax.xlane.f32.xlu1 %v9602_v48  ;;  %v2797_v36 = vpack.c.bf16 %v2786_v59, %v2785_v4  ;;  %v2787_v4 = vmul.f32 %v7415_v19, %v9380_v54  ;;  %v2790_v21 = vmul.f32 %v7417_v7, %v9423_v10  ;;  %v7419_v8 = vpop.eup %7418 }
 0xbbd   :  { %v9612_v55 = vadd.f32 %v3759_v46, %v10744_v5  ;;  %3799 = vmax.xlane.f32.xlu0 %v9605_v14  ;;  %v2789_v46 = vmul.f32 %v7413_v0, %v9501_v35  ;;  %v7421_v54 = vpop.eup %7420  ;;  %v4497_v0 = vpop.permute.xlu0 %4496 }
 0xbbe   :  { %6746 = vmatpush3.bf16.msra.mxu0 %v4489_v58 }
 0xbbf   :  { %6747 = vmatprep.subr.bf16.mxu0 %v4491_v16  ;;  %v2799_v35 = vpack.c.bf16 %v2790_v21, %v2789_v46 }
 0xbc0   :  { %6558 = vmatmul.mubr.bf16.gmra.mrb[68].mxu1 %v2796_v51  ;;  %3793 = vmax.xlane.f32.xlu1 %v9617_v33 }
 0xbc1   :  { %3797 = vmax.xlane.f32.xlu0 %v9612_v55  ;;  %6561 = vmatprep.mubr.bf16.mxu1 %v2797_v36  ;;  %v6727_v6 = vpop.f32.mrb[160].mxu0  ;;  %v4495_v36 = vpop.permute.xlu1 %4494 }
 0xbc2   :  { %6748 = vmatpush3.bf16.msra.mxu0 %v4491_v16  ;;  %v9626_v58 = vadd.f32 %v6727_v6, %v10662_v47  ;;  %v4269_v44 = vpop.f32.mrb[161].mxu0  ;;  %v10747_v16 = vld [vmem:[#allocation57_spill] sm:$0xff]  ;;  %v2798_v6 = vpack.c.bf16 %v2788_v38, %v2787_v4  ;;  %v2792_v38 = vmul.f32 %v7421_v54, %v9426_v23 }
 0xbc3   :  { %6749 = vmatprep.subr.bf16.mxu0 %v4493_v56  ;;  %v6728_v59 = vpop.f32.mrb[162].mxu0  ;;  %v9635_v51 = vadd.f32 %v6672_v24, %v10747_v16  ;;  %v9638_v28 = vadd.f32 %v4269_v44, %v10663_v22 }
 0xbc4   :  { %v4272_v50 = vpop.f32.mrb[163].mxu0  ;;  %3795 = vmax.xlane.f32.xlu1 %v9623_v15  ;;  %v9644_v19 = vadd.f32 %v6728_v59, %v10665_v34  ;;  %v10749_v59 = vld [vmem:[#allocation42_spill] sm:$0xff] }
 0xbc5   :  { %4336 = vmax.xlane.f32.xlu0 %v9626_v58  ;;  %v4499_v4 = vpop.permute.xlu1 %4498 }
 0xbc6   :  { %6750 = vmatpush3.bf16.msra.mxu0 %v4493_v56  ;;  %v2791_v56 = vmul.f32 %v7419_v8, %v9506_v57  ;;  %v10748_v57 = vld [vmem:[#allocation41_spill] sm:$0xff] }
 0xbc7   :  { %6751 = vmatprep.subr.bf16.mxu0 %v4495_v36 }
 0xbc8   :  { %6562 = vmatmul.mubr.bf16.gmra.mrb[72].mxu1 %v2798_v6  ;;  %3801 = vmax.xlane.f32.xlu1 %v9635_v51  ;;  %v2800_v21 = vpack.c.bf16 %v2792_v38, %v2791_v56  ;;  %v9657_v6 = vpack.c.bf16 %v10749_v59, %v10748_v57 }
 0xbc9   :  { %4332 = vmax.xlane.f32.xlu0 %v9638_v28  ;;  %6565 = vmatprep.mubr.bf16.mxu1 %v2799_v35  ;;  %v6731_v10 = vpop.f32.mrb[164].mxu0 }
 0xbca   :  { %6752 = vmatpush3.bf16.msra.mxu0 %v4495_v36  ;;  %v4285_v24 = vpop.f32.mrb[165].mxu0  ;;  %v9652_v36 = vadd.f32 %v4272_v50, %v10664_v63  ;;  %v9661_v35 = vadd.f32 %v6731_v10, %v10666_v25 }
 0xbcb   :  { %6753 = vmatprep.subr.bf16.mxu0 %v4497_v0  ;;  %v6732_v7 = vpop.f32.mrb[166].mxu0 }
 0xbcc   :  { %v4288_v44 = vpop.f32.mrb[167].mxu0  ;;  %v9670_v38 = vadd.f32 %v6732_v7, %v10667_v1 }
 0xbcd   :  { %v9648_v46 = vadd.f32 %v4288_v44, %v10669_v26  ;;  %4338 = vmax.xlane.f32.xlu0 %v9644_v19 }
 0xbce   :  { %6754 = vmatpush3.bf16.msra.mxu0 %v4497_v0  ;;  %v9666_v0 = vadd.f32 %v4285_v24, %v10668_v27 }
 0xbcf   :  { %6755 = vmatprep.subr.bf16.mxu0 %v4499_v4  ;;  %4342 = vmax.xlane.f32.xlu1 %v9648_v46 }
 0xbd0   :  { %6566 = vmatmul.mubr.bf16.gmra.mrb[76].mxu1 %v2800_v21 }
 0xbd1   :  { %4334 = vmax.xlane.f32.xlu0 %v9652_v36  ;;  %v6735_v23 = vpop.f32.mrb[168].mxu0 }
 0xbd2   :  { %6756 = vmatpush3.bf16.msra.mxu0 %v4499_v4  ;;  %v4301_v8 = vpop.f32.mrb[169].mxu0  ;;  %v9678_v57 = vadd.f32 %v6735_v23, %v10670_v53 }
 0xbd3   :  { %6791 = vmatprep.subr.bf16.mxu0 %v9657_v6  ;;  %v6736_v50 = vpop.f32.mrb[170].mxu0  ;;  %v9682_v24 = vadd.f32 %v4301_v8, %v10672_v40 }
 0xbd4   :  { %v4304_v54 = vpop.f32.mrb[171].mxu0  ;;  %v9686_v7 = vadd.f32 %v6736_v50, %v10745_v52 }
 0xbd5   :  { %4344 = vmax.xlane.f32.xlu0 %v9661_v35  ;;  %v9690_v59 = vadd.f32 %v4304_v54, %v10673_v61  ;;  %v7057_v54 = vld [vmem:[#allocation7 + $0x18] sm:$0xff]  }
 0xbd6   :  { %6569 = vmatprep.subr.bf16.mxu1 %v7057_v54 }
 0xbd7   :  { %6570 = vmatpush3.bf16.msra.mxu1 %v7057_v54 }
 0xbd9   :  { %4340 = vmax.xlane.f32.xlu0 %v9666_v0  ;;  %v6739_v56 = vpop.f32.mrb[172].mxu0 }
 0xbda   :  { %v4317_v44 = vpop.f32.mrb[173].mxu0  ;;  %v9694_v23 = vadd.f32 %v6739_v56, %v10674_v2  ;;  %v10751_v56 = vld [vmem:[#allocation29_spill] sm:$0xff] }
 0xbdb   :  { %v6740_v4 = vpop.f32.mrb[174].mxu0  ;;  %v9700_v8 = vadd.f32 %v4317_v44, %v10746_v12  ;;  %v9713_v44 = vld [vmem:[#allocation7 + $0x20] sm:$0xff]  }
 0xbdc   :  { %v9673_v10 = vadd.f32 %v6740_v4, %v10747_v16  ;;  %v4320_v21 = vpop.f32.mrb[175].mxu0  ;;  %v10750_v4 = vld [vmem:[#allocation30_spill] sm:$0xff]  ;;  %6637 = vmatprep.subr.bf16.mxu1 %v9713_v44 }
 0xbdd   :  { %4346 = vmax.xlane.f32.xlu0 %v9670_v38  ;;  %v9706_v50 = vadd.f32 %v4320_v21, %v10744_v5  ;;  %v9720_v21 = vpop.permute.xlu1 %4756 }
 0xbde   :  { %4362 = vmax.xlane.f32.xlu1 %v9673_v10  ;;  %10754 = vst [vmem:[#allocation37_spill] sm:$0xff] %v9720_v21 }
 0xbe1   :  { %4352 = vmax.xlane.f32.xlu0 %v9678_v57  ;;  %v9724_v12 = vpop.permute.xlu1 %4760 }
 0xbe2   :  { %10756 = vst [vmem:[#allocation60_spill] sm:$0xff] %v9724_v12 }
 0xbe5   :  { %4348 = vmax.xlane.f32.xlu0 %v9682_v24 }
 0xbe9   :  { %4354 = vmax.xlane.f32.xlu0 %v9686_v7 }
 0xbed   :  { %4350 = vmax.xlane.f32.xlu0 %v9690_v59 }
 0xbef   :  { %4770 = vrot.lane.b32.xlu1 %v10750_v4, %s7797_s0  ;;  %v9716_v4 = vpop.permute.xlu0 %4758 }
 0xbf0   :  { %10752 = vst [vmem:[#allocation35_spill] sm:$0xff] %v9716_v4 }
 0xbf1   :  { %4360 = vmax.xlane.f32.xlu0 %v9694_v23 }
 0xbf3   :  { %3923 = vrot.lane.b32.xlu1 %v8115_v31, %s7795_s17  ;;  %v9718_v16 = vpop.permute.xlu0 %4762 }
 0xbf4   :  { %10753 = vst [vmem:[#allocation38_spill] sm:$0xff] %v9718_v16 }
 0xbf5   :  { %4356 = vmax.xlane.f32.xlu0 %v9700_v8 }
 0xbf7   :  { %3925 = vrot.lane.b32.xlu1 %v10710_v29, %s7795_s17  ;;  %v9722_v5 = vpop.permute.xlu0 %4764 }
 0xbf8   :  { %10755 = vst [vmem:[#allocation61_spill] sm:$0xff] %v9722_v5 }
 0xbf9   :  { %4358 = vmax.xlane.f32.xlu0 %v9706_v50 }
 0xc0f   :  { %4768 = vrot.lane.b32.xlu0 %v10751_v56, %s7797_s0  ;;  %v9727_v56 = vpop.permute.xlu1 %4766 }
 0xc10   :  { %10757 = vst [vmem:[#allocation63_spill] sm:$0xff] %v9727_v56 }
 0xc31   :  { %v3776_v29 = vpop.xlane.xlu0 %3775 }
 0xc32   :  { %v3805_v2 = vsub.f32 %v9550_v49, %v3776_v29 }
 0xc34   :  { %v3823_v61 = vmul.f32 1.442695, %v3805_v2 }
 0xc35   :  { %v3772_v54 = vpop.xlane.xlu0 %3771 }
 0xc36   :  { %7422 = vpow2.f32 %v3823_v61  ;;  %v3803_v52 = vsub.f32 %v9555_v13, %v3772_v54 }
 0xc38   :  { %v3819_v40 = vmul.f32 1.442695, %v3803_v52 }
 0xc39   :  { %v3778_v31 = vpop.xlane.xlu0 %3777  ;;  %v9730_v53 = vpop.xlane.xlu1 %3783 }
 0xc3a   :  { %7424 = vpow2.f32 %v3819_v40  ;;  %v3806_v26 = vsub.f32 %v9561_v20, %v3778_v31 }
 0xc3c   :  { %v3825_v1 = vmul.f32 1.442695, %v3806_v26 }
 0xc3d   :  { %v3774_v25 = vpop.xlane.xlu0 %3773  ;;  %v9733_v63 = vpop.xlane.xlu1 %3779 }
 0xc3e   :  { %7426 = vpow2.f32 %v3825_v1  ;;  %v3804_v2 = vsub.f32 %v9570_v18, %v3774_v25 }
 0xc40   :  { %v9736_v29 = vpop.eup %7422  ;;  %v3821_v49 = vmul.f32 1.442695, %v3804_v2 }
 0xc41   :  { %10758 = vst [vmem:[#allocation62_spill] sm:$0xff] %v9736_v29  ;;  %3855 = vadd.xlane.f32.xlu0 %v9736_v29  ;;  %v9739_v61 = vpop.xlane.xlu0 %3781  ;;  %v9741_v13 = vpop.xlane.xlu1 %3785 }
 0xc42   :  { %7428 = vpow2.f32 %v3821_v49 }
 0xc44   :  { %v9743_v40 = vpop.eup %7424 }
 0xc45   :  { %3851 = vadd.xlane.f32.xlu1 %v9743_v40  ;;  %v9746_v31 = vpop.xlane.xlu1 %3791 }
 0xc46   :  { %v9748_v26 = vpop.xlane.xlu0 %3789 }
 0xc48   :  { %v9750_v1 = vpop.eup %7426 }
 0xc49   :  { %10759 = vst [vmem:[#allocation65_spill] sm:$0xff] %v9750_v1  ;;  %3857 = vadd.xlane.f32.xlu0 %v9750_v1  ;;  %v9753_v25 = vpop.xlane.xlu1 %3787 }
 0xc4a   :  { %v9755_v20 = vpop.xlane.xlu0 %3799 }
 0xc4c   :  { %v9757_v18 = vpop.eup %7428 }
 0xc4d   :  { %3853 = vadd.xlane.f32.xlu0 %v9757_v18  ;;  %v9760_v52 = vpop.xlane.xlu1 %3793 }
 0xc4e   :  { %v9762_v54 = vpop.xlane.xlu0 %3797 }
 0xc51   :  { %v9764_v49 = vpop.xlane.xlu1 %3795 }
 0xc52   :  { %v4337_v2 = vpop.xlane.xlu0 %4336 }
 0xc53   :  { %v4366_v27 = vsub.f32 %v9626_v58, %v4337_v2 }
 0xc55   :  { %v4384_v34 = vmul.f32 1.442695, %v4366_v27  ;;  %v9768_v29 = vpop.xlane.xlu1 %3801 }
 0xc56   :  { %v4333_v22 = vpop.xlane.xlu0 %4332 }
 0xc57   :  { %7430 = vpow2.f32 %v4384_v34  ;;  %v4364_v47 = vsub.f32 %v9638_v28, %v4333_v22 }
 0xc59   :  { %v4380_v1 = vmul.f32 1.442695, %v4364_v47 }
 0xc5a   :  { %v4339_v56 = vpop.xlane.xlu0 %4338 }
 0xc5b   :  { %7432 = vpow2.f32 %v4380_v1  ;;  %v4367_v5 = vsub.f32 %v9644_v19, %v4339_v56 }
 0xc5c   :  { %v4343_v16 = vpop.xlane.xlu1 %4342 }
 0xc5d   :  { %v4386_v12 = vmul.f32 1.442695, %v4367_v5  ;;  %v4369_v4 = vsub.f32 %v9648_v46, %v4343_v16 }
 0xc5e   :  { %v4335_v21 = vpop.xlane.xlu0 %4334 }
 0xc5f   :  { %7434 = vpow2.f32 %v4386_v12  ;;  %v4365_v58 = vsub.f32 %v9652_v36, %v4335_v21  ;;  %v4390_v2 = vmul.f32 1.442695, %v4369_v4 }
 0xc61   :  { %v9773_v27 = vpop.eup %7430  ;;  %v4382_v34 = vmul.f32 1.442695, %v4365_v58 }
 0xc62   :  { %4416 = vadd.xlane.f32.xlu1 %v9773_v27  ;;  %v4345_v22 = vpop.xlane.xlu0 %4344 }
 0xc63   :  { %7436 = vpow2.f32 %v4382_v34  ;;  %v4370_v47 = vsub.f32 %v9661_v35, %v4345_v22 }
 0xc64   :  { %7438 = vpow2.f32 %v4390_v2 }
 0xc65   :  { %v9777_v28 = vpop.eup %7432  ;;  %v4392_v19 = vmul.f32 1.442695, %v4370_v47 }
 0xc66   :  { %4412 = vadd.xlane.f32.xlu1 %v9777_v28  ;;  %v4341_v5 = vpop.xlane.xlu0 %4340 }
 0xc67   :  { %7440 = vpow2.f32 %v4392_v19  ;;  %v4368_v12 = vsub.f32 %v9666_v0, %v4341_v5 }
 0xc69   :  { %v9781_v16 = vpop.eup %7434  ;;  %v4388_v46 = vmul.f32 1.442695, %v4368_v12 }
 0xc6a   :  { %4418 = vadd.xlane.f32.xlu1 %v9781_v16  ;;  %v4347_v36 = vpop.xlane.xlu0 %4346 }
 0xc6b   :  { %7442 = vpow2.f32 %v4388_v46  ;;  %v4371_v4 = vsub.f32 %v9670_v38, %v4347_v36 }
 0xc6d   :  { %v9785_v35 = vpop.eup %7436  ;;  %v4394_v21 = vmul.f32 1.442695, %v4371_v4 }
 0xc6e   :  { %4414 = vadd.xlane.f32.xlu1 %v9785_v35  ;;  %v4353_v56 = vpop.xlane.xlu0 %4352  ;;  %v9789_v58 = vpop.eup %7438 }
 0xc6f   :  { %7444 = vpow2.f32 %v4394_v21  ;;  %v4374_v1 = vsub.f32 %v9678_v57, %v4353_v56  ;;  %v4363_v57 = vpop.xlane.xlu1 %4362 }
 0xc70   :  { %v4379_v36 = vsub.f32 %v9673_v10, %v4363_v57  ;;  %v3807_v10 = vsub.f32 %v9573_v45, %v9733_v63 }
 0xc71   :  { %v9791_v0 = vpop.eup %7440  ;;  %v4400_v34 = vmul.f32 1.442695, %v4374_v1 }
 0xc72   :  { %4424 = vadd.xlane.f32.xlu0 %v9791_v0  ;;  %v4349_v2 = vpop.xlane.xlu0 %4348  ;;  %4422 = vadd.xlane.f32.xlu1 %v9789_v58  ;;  %v4410_v1 = vmul.f32 1.442695, %v4379_v36 }
 0xc73   :  { %7446 = vpow2.f32 %v4400_v34  ;;  %v4372_v38 = vsub.f32 %v9682_v24, %v4349_v2 }
 0xc75   :  { %v9796_v22 = vpop.eup %7442  ;;  %v4396_v47 = vmul.f32 1.442695, %v4372_v38 }
 0xc76   :  { %4420 = vadd.xlane.f32.xlu0 %v9796_v22  ;;  %v4355_v19 = vpop.xlane.xlu0 %4354 }
 0xc77   :  { %7448 = vpow2.f32 %v4396_v47  ;;  %v4375_v5 = vsub.f32 %v9686_v7, %v4355_v19 }
 0xc79   :  { %v9800_v12 = vpop.eup %7444  ;;  %v4402_v46 = vmul.f32 1.442695, %v4375_v5  ;;  %v3827_v5 = vmul.f32 1.442695, %v3807_v10 }
 0xc7a   :  { %4426 = vadd.xlane.f32.xlu0 %v9800_v12  ;;  %v4351_v4 = vpop.xlane.xlu0 %4350 }
 0xc7b   :  { %7450 = vpow2.f32 %v4402_v46  ;;  %v4373_v24 = vsub.f32 %v9690_v59, %v4351_v4  ;;  %v3809_v46 = vsub.f32 %v9564_v9, %v9730_v53 }
 0xc7d   :  { %v9805_v21 = vpop.eup %7446  ;;  %v4398_v56 = vmul.f32 1.442695, %v4373_v24 }
 0xc7e   :  { %4432 = vadd.xlane.f32.xlu0 %v9805_v21  ;;  %v4361_v34 = vpop.xlane.xlu0 %4360 }
 0xc7f   :  { %7452 = vpow2.f32 %v4398_v56  ;;  %v4378_v7 = vsub.f32 %v9694_v23, %v4361_v34  ;;  %v9828_v34 = vpop.permute.xlu1 %4770 }
 0xc80   :  { %7454 = vpow2.f32 %v4410_v1 }
 0xc81   :  { %v9809_v2 = vpop.eup %7448  ;;  %v4408_v38 = vmul.f32 1.442695, %v4378_v7 }
 0xc82   :  { %v4357_v47 = vpop.xlane.xlu0 %4356  ;;  %4428 = vadd.xlane.f32.xlu1 %v9809_v2 }
 0xc83   :  { %7456 = vpow2.f32 %v4408_v38  ;;  %v4376_v59 = vsub.f32 %v9700_v8, %v4357_v47  ;;  %v3831_v8 = vmul.f32 1.442695, %v3809_v46  ;;  %v3924_v10 = vpop.permute.xlu1 %3923 }
 0xc85   :  { %v9815_v19 = vpop.eup %7450  ;;  %v4404_v57 = vmul.f32 1.442695, %v4376_v59 }
 0xc86   :  { %4434 = vadd.xlane.f32.xlu0 %v9815_v19  ;;  %v4359_v23 = vpop.xlane.xlu0 %4358 }
 0xc87   :  { %7458 = vpow2.f32 %v4404_v57  ;;  %v4377_v63 = vsub.f32 %v9706_v50, %v4359_v23 }
 0xc88   :  { %7460 = vpow2.f32 %v3827_v5 }
 0xc89   :  { %v9821_v45 = vpop.eup %7452  ;;  %v4406_v36 = vmul.f32 1.442695, %v4377_v63 }
 0xc8a   :  { %4430 = vadd.xlane.f32.xlu0 %v9821_v45  ;;  %v9824_v24 = vpop.eup %7454 }
 0xc8b   :  { %7462 = vpow2.f32 %v4406_v36  ;;  %v6555_v4 = vpop.f32.mrb[64].mxu1 }
 0xc8c   :  { %v2859_v56 = vpop.f32.mrb[65].mxu1  ;;  %7464 = vpow2.f32 %v3831_v8 }
 0xc8d   :  { %v9826_v1 = vpop.eup %7456  ;;  %v6556_v53 = vpop.f32.mrb[66].mxu1 }
 0xc8e   :  { %v2923_v9 = vpack.c.bf16 %v6556_v53, %v6555_v4  ;;  %v2862_v7 = vpop.f32.mrb[67].mxu1  ;;  %4440 = vadd.xlane.f32.xlu1 %v9826_v1  ;;  %4442 = vadd.xlane.f32.xlu0 %v9824_v24 }
 0xc8f   :  { %v2922_v50 = vpack.c.bf16 %v2862_v7, %v2859_v56 }
 0xc91   :  { %v9832_v38 = vpop.eup %7458  ;;  %6571 = vmatprep.mubr.msk.bf16.mxu1 %vm884_vm0, %v2922_v50 }
 0xc92   :  { %6572 = vmatmul.mubr.msk.bf16.vlgmr.msra.gmra.mrb[48].mxu1 %vm884_vm0, %v2923_v9  ;;  %4436 = vadd.xlane.f32.xlu1 %v9832_v38  ;;  %v9838_v59 = vpop.eup %7460 }
 0xc93   :  { %6638 = vmatpush3.bf16.msra.mxu1 %v9713_v44  ;;  %v6559_v47 = vpop.f32.mrb[68].mxu1 }
 0xc94   :  { %6673 = vmatprep.subr.bf16.mxu1 %v3924_v10  ;;  %v2875_v57 = vpop.f32.mrb[69].mxu1 }
 0xc95   :  { %v9840_v5 = vpop.eup %7462  ;;  %v6560_v23 = vpop.f32.mrb[70].mxu1 }
 0xc96   :  { %v2925_v46 = vpack.c.bf16 %v6560_v23, %v6559_v47  ;;  %v2878_v63 = vpop.f32.mrb[71].mxu1  ;;  %3859 = vadd.xlane.f32.xlu1 %v9838_v59  ;;  %4438 = vadd.xlane.f32.xlu0 %v9840_v5  ;;  %v9844_v8 = vpop.eup %7464 }
 0xc97   :  { %v2924_v36 = vpack.c.bf16 %v2878_v63, %v2875_v57 }
 0xc99   :  { %6575 = vmatprep.mubr.msk.bf16.mxu1 %vm884_vm0, %v2924_v36 }
 0xc9a   :  { %6576 = vmatmul.mubr.msk.bf16.gmra.mrb[52].mxu1 %vm884_vm0, %v2925_v46  ;;  %3863 = vadd.xlane.f32.xlu1 %v9844_v8  ;;  %v10760_v46 = vpack.c.bf16 %v9447_v3, %v9441_v43  ;;  %v3808_v43 = vsub.f32 %v9583_v37, %v9739_v61  ;;  %v10763_v3 = vld [vmem:[#allocation59_spill] sm:$0xff]  ;;  %v3813_v37 = vsub.f32 %v9595_v60, %v9746_v31 }
 0xc9b   :  { %v6563_v44 = vpop.f32.mrb[72].mxu1 }
 0xc9c   :  { %v2891_v4 = vpop.f32.mrb[73].mxu1 }
 0xc9d   :  { %v6564_v56 = vpop.f32.mrb[74].mxu1 }
 0xc9e   :  { %v2927_v53 = vpack.c.bf16 %v6564_v56, %v6563_v44  ;;  %v2894_v9 = vpop.f32.mrb[75].mxu1  ;;  %v10761_v44 = vpack.c.bf16 %v9443_v41, %v9439_v32  ;;  %v10762_v56 = vpack.c.bf16 %v9469_v30, %v9459_v11  ;;  %v3810_v32 = vsub.f32 %v9580_v42, %v9741_v13  ;;  %v10766_v41 = vld [vmem:[#allocation20_spill] sm:$0xff]  ;;  %v10773_v13 = vld [vmem:[#allocation33_spill] sm:$0xff] }
 0xc9f   :  { %v2926_v7 = vpack.c.bf16 %v2894_v9, %v2891_v4  ;;  %v3926_v4 = vpop.permute.xlu1 %3925  ;;  %v3829_v11 = vmul.f32 1.442695, %v3808_v43  ;;  %v3811_v30 = vsub.f32 %v9602_v48, %v9753_v25  ;;  %v10772_v42 = vld [vmem:[#allocation36_spill] sm:$0xff]  ;;  %v10775_v25 = vld [vmem:[#allocation34_spill] sm:$0xff] }
 0xca1   :  { %6579 = vmatprep.mubr.msk.bf16.mxu1 %vm884_vm0, %v2926_v7  ;;  %7466 = vpow2.f32 %v3829_v11  ;;  %v3835_v61 = vmul.f32 1.442695, %v3811_v30 }
 0xca2   :  { %6580 = vmatmul.mubr.msk.bf16.gmra.mrb[56].mxu1 %vm884_vm0, %v2927_v53  ;;  %v10764_v53 = vld [vmem:[#allocation32_spill] sm:$0xff] }
 0xca3   :  { %v6567_v50 = vpop.f32.mrb[76].mxu1  ;;  %v10765_v9 = vpack.c.bf16 %v10763_v3, %v10764_v53 }
 0xca4   :  { %v2907_v47 = vpop.f32.mrb[77].mxu1 }
 0xca5   :  { %v6568_v57 = vpop.f32.mrb[78].mxu1 }
 0xca6   :  { %v2929_v23 = vpack.c.bf16 %v6568_v57, %v6567_v50  ;;  %v2910_v63 = vpop.f32.mrb[79].mxu1  ;;  %v3833_v50 = vmul.f32 1.442695, %v3810_v32  ;;  %v10770_v57 = vld [vmem:[#allocation39_spill] sm:$0xff] }
 0xca7   :  { %v2928_v36 = vpack.c.bf16 %v2910_v63, %v2907_v47  ;;  %v10769_v47 = vld [vmem:[#allocation31_spill] sm:$0xff]  ;;  %v10774_v63 = vpack.c.bf16 %v10772_v42, %v10773_v13  ;;  %v3815_v13 = vsub.f32 %v9623_v15, %v9764_v49 }
 0xca8   :  { %7468 = vpow2.f32 %v3833_v50 }
 0xca9   :  { %6583 = vmatprep.mubr.msk.bf16.mxu1 %vm884_vm0, %v2928_v36  ;;  %v3839_v36 = vmul.f32 1.442695, %v3813_v37  ;;  %7470 = vpow2.f32 %v3835_v61  ;;  %v3812_v37 = vsub.f32 %v9591_v17, %v9748_v26 }
 0xcaa   :  { %6584 = vmatmul.mubr.msk.bf16.gmra.mrb[60].mxu1 %vm884_vm0, %v2929_v23  ;;  %v10771_v23 = vpack.c.bf16 %v10769_v47, %v10770_v57  ;;  %v3814_v47 = vsub.f32 %v9617_v33, %v9760_v52 }
 0xcab   :  { %6639 = vmatprep.mubr.msk.bf16.mxu1 %vm884_vm0, %v10760_v46  ;;  %3929 = vrot.lane.b32.xlu1 %v10711_v62, %s7795_s17  ;;  %7472 = vpow2.f32 %v3839_v36  ;;  %v9893_v48 = vpop.eup %7466  ;;  %v10776_v46 = vld [vmem:[#allocation19_spill] sm:$0xff]  ;;  %v3837_v57 = vmul.f32 1.442695, %v3812_v37 }
 0xcac   :  { %3927 = vrot.lane.b32.xlu0 %v10709_v39, %s7795_s17  ;;  %v10777_v60 = vpack.c.bf16 %v10775_v25, %v10776_v46  ;;  %v3841_v42 = vmul.f32 1.442695, %v3814_v47 }
 0xcb2   :  { %6640 = vmatmul.mubr.msk.bf16.vlgmr.msra.gmra.mrb[48].mxu1 %vm884_vm0, %v10761_v44  ;;  %v9900_v31 = vpop.eup %7468 }
 0xcb3   :  { %6674 = vmatpush3.bf16.msra.mxu1 %v3924_v10  ;;  %6643 = vmatprep.mubr.msk.bf16.mxu1 %vm884_vm0, %v10762_v56  ;;  %v10767_v10 = vld [vmem:[#allocation40_spill] sm:$0xff]  ;;  %v9902_v44 = vpop.eup %7470 }
 0xcb4   :  { %6675 = vmatprep.subr.bf16.mxu1 %v3926_v4  ;;  %v10768_v7 = vpack.c.bf16 %v10766_v41, %v10767_v10  ;;  %v10778_v41 = vld [vmem:[#allocation22_spill] sm:$0xff] }
 0xcb5   :  { %v9908_v56 = vpop.eup %7472 }
 0xcb7   :  { %6676 = vmatpush3.bf16.msra.mxu1 %v3926_v4  ;;  %v9904_v4 = vpop.permute.xlu0 %4768 }
 0xcba   :  { %6644 = vmatmul.mubr.msk.bf16.gmra.mrb[52].mxu1 %vm884_vm0, %v10765_v9 }
 0xcbb   :  { %6647 = vmatprep.mubr.msk.bf16.mxu1 %vm884_vm0, %v10768_v7  ;;  %v10779_v7 = vld [vmem:[#allocation23_spill] sm:$0xff] }
 0xcc2   :  { %6648 = vmatmul.mubr.msk.bf16.gmra.mrb[56].mxu1 %vm884_vm0, %v10771_v23 }
 0xcc3   :  { %6651 = vmatprep.mubr.msk.bf16.mxu1 %vm884_vm0, %v10774_v63 }
 0xcca   :  { %6652 = vmatmul.mubr.msk.bf16.gmra.mrb[60].mxu1 %vm884_vm0, %v10777_v60 }
 0xccb   :  { %3861 = vadd.xlane.f32.xlu0 %v9893_v48 }
 0xcce   :  { %v9910_v43 = vpop.xlane.xlu0 %3855 }
 0xccf   :  { %3867 = vadd.xlane.f32.xlu1 %v9902_v44  ;;  %3865 = vadd.xlane.f32.xlu0 %v9900_v31 }
 0xcd2   :  { %v3852_v3 = vpop.xlane.xlu1 %3851 }
 0xcd3   :  { %3871 = vadd.xlane.f32.xlu1 %v9908_v56  ;;  %7474 = vrcp.f32 %v3852_v3 }
 0xcd6   :  { %v9913_v53 = vpop.xlane.xlu0 %3857 }
 0xcda   :  { %v3854_v9 = vpop.xlane.xlu0 %3853 }
 0xcdb   :  { %7476 = vrcp.f32 %v3854_v9 }
 0xcdc   :  { %7478 = vpow2.f32 %v3837_v57 }
 0xcdd   :  { %v7475_v32 = vpop.eup %7474  ;;  %7480 = vpow2.f32 %v3841_v42 }
 0xcde   :  { %v3899_v11 = vmul.f32 %v7475_v32, %v9743_v40  ;;  %v3817_v40 = vsub.f32 %v9605_v14, %v9755_v20 }
 0xce0   :  { %v3847_v26 = vmul.f32 1.442695, %v3817_v40 }
 0xce4   :  { %3933 = vrot.lane.b32.xlu1 %v10778_v41, %s7795_s17 }
 0xce5   :  { %v7477_v10 = vpop.eup %7476  ;;  %3931 = vrot.lane.b32.xlu0 %v10779_v7, %s7795_s17 }
 0xce6   :  { %v3900_v30 = vmul.f32 %v7477_v10, %v9757_v18  ;;  %v3843_v18 = vmul.f32 1.442695, %v3815_v13  ;;  %v9929_v36 = vpop.eup %7478 }
 0xce7   :  { %v9931_v15 = vpop.eup %7480 }
 0xce8   :  { %v3915_v50 = vpack.c.bf16 %v3900_v30, %v3899_v11 }
 0xcea   :  { %6689 = vmatprep.mubr.bf16.mxu1 %v3915_v50 }
 0xcef   :  { %v4417_v61 = vpop.xlane.xlu1 %4416 }
 0xcf3   :  { %v4413_v23 = vpop.xlane.xlu1 %4412 }
 0xcf7   :  { %v4419_v63 = vpop.xlane.xlu1 %4418 }
 0xcf8   :  { %7482 = vrcp.f32 %v4419_v63 }
 0xcf9   :  { %7484 = vrcp.f32 %v4413_v23 }
 0xcfa   :  { %7486 = vrcp.f32 %v4417_v61 }
 0xcfb   :  { %v4415_v17 = vpop.xlane.xlu1 %4414 }
 0xcfc   :  { %7488 = vrcp.f32 %v4415_v17 }
 0xcfd   :  { %7490 = vpow2.f32 %v3843_v18 }
 0xcfe   :  { %7492 = vpow2.f32 %v3847_v26  ;;  %v10781_v26 = vld [vmem:[#allocation26_spill] sm:$0xff] }
 0xcff   :  { %v4425_v33 = vpop.xlane.xlu0 %4424  ;;  %v4423_v52 = vpop.xlane.xlu1 %4422 }
 0xd00   :  { %7494 = vrcp.f32 %v4423_v52 }
 0xd02   :  { %v7483_v49 = vpop.eup %7482 }
 0xd03   :  { %v4421_v25 = vpop.xlane.xlu0 %4420  ;;  %v7485_v46 = vpop.eup %7484  ;;  %v4463_v60 = vmul.f32 %v7483_v49, %v9781_v16 }
 0xd04   :  { %7496 = vrcp.f32 %v4421_v25  ;;  %3869 = vadd.xlane.f32.xlu0 %v9929_v36  ;;  %v7487_v14 = vpop.eup %7486  ;;  %v4460_v32 = vmul.f32 %v7485_v46, %v9777_v28 }
 0xd05   :  { %7498 = vrcp.f32 %v4425_v33  ;;  %v4462_v11 = vmul.f32 %v7487_v14, %v9773_v27 }
 0xd06   :  { %v7489_v20 = vpop.eup %7488 }
 0xd07   :  { %v9935_v3 = vpop.eup %7490  ;;  %v4427_v9 = vpop.xlane.xlu0 %4426  ;;  %v4461_v10 = vmul.f32 %v7489_v20, %v9785_v35  ;;  %v4477_v50 = vpack.c.bf16 %v4463_v60, %v4462_v11 }
 0xd08   :  { %7500 = vrcp.f32 %v4427_v9  ;;  %3875 = vadd.xlane.f32.xlu1 %v9935_v3  ;;  %3873 = vadd.xlane.f32.xlu0 %v9931_v15  ;;  %v9942_v37 = vpop.eup %7492 }
 0xd09   :  { %v4476_v30 = vpack.c.bf16 %v4461_v10, %v4460_v32 }
 0xd0a   :  { %v7495_v16 = vpop.eup %7494 }
 0xd0b   :  { %6757 = vmatprep.mubr.bf16.mxu0 %v4476_v30  ;;  %v4433_v35 = vpop.xlane.xlu0 %4432  ;;  %v4465_v61 = vmul.f32 %v7495_v16, %v9789_v58  ;;  %v10780_v58 = vld [vmem:[#allocation25_spill] sm:$0xff] }
 0xd0c   :  { %3879 = vadd.xlane.f32.xlu1 %v9942_v37  ;;  %6758 = vmatmul.mubr.bf16.vlgmr.msra.gmra.mrb[176].mxu0 %v4477_v50 }
 0xd0d   :  { %6792 = vmatpush3.bf16.msra.mxu0 %v9657_v6 }
 0xd0e   :  { %v7497_v28 = vpop.eup %7496 }
 0xd0f   :  { %v4464_v27 = vmul.f32 %v7497_v28, %v9796_v22  ;;  %v7499_v47 = vpop.eup %7498  ;;  %v4429_v42 = vpop.xlane.xlu1 %4428 }
 0xd10   :  { %v4466_v63 = vmul.f32 %v7499_v47, %v9791_v0 }
 0xd11   :  { %v4478_v57 = vpack.c.bf16 %v4465_v61, %v4464_v27 }
 0xd12   :  { %v7501_v23 = vpop.eup %7500 }
 0xd13   :  { %v4435_v13 = vpop.xlane.xlu0 %4434  ;;  %6761 = vmatprep.mubr.bf16.mxu0 %v4478_v57  ;;  %v4467_v40 = vmul.f32 %v7501_v23, %v9800_v12 }
 0xd14   :  { %7502 = vrcp.f32 %v4435_v13 }
 0xd15   :  { %v4479_v18 = vpack.c.bf16 %v4467_v40, %v4466_v63  ;;  %7504 = vrcp.f32 %v4429_v42  ;;  %v10782_v42 = vld [vmem:[#allocation37_spill] sm:$0xff] }
 0xd16   :  { %7506 = vrcp.f32 %v4433_v35 }
 0xd17   :  { %v4431_v6 = vpop.xlane.xlu0 %4430  ;;  %6762 = vmatmul.mubr.bf16.gmra.mrb[180].mxu0 %v4479_v18 }
 0xd18   :  { %7508 = vrcp.f32 %v4431_v6 }
 0xd1b   :  { %v4441_v22 = vpop.xlane.xlu1 %4440  ;;  %v4443_v17 = vpop.xlane.xlu0 %4442 }
 0xd1c   :  { %7510 = vrcp.f32 %v4443_v17 }
 0xd1d   :  { %3937 = vrot.lane.b32.xlu1 %v10780_v58, %s7795_s17  ;;  %7512 = vrcp.f32 %v4441_v22 }
 0xd1e   :  { %3935 = vrot.lane.b32.xlu0 %v10781_v26, %s7795_s17  ;;  %v7503_v33 = vpop.eup %7502 }
 0xd1f   :  { %v4437_v52 = vpop.xlane.xlu1 %4436  ;;  %v7505_v0 = vpop.eup %7504  ;;  %v4471_v25 = vmul.f32 %v7503_v33, %v9815_v19  ;;  %v3816_v19 = vsub.f32 %v9612_v55, %v9762_v54 }
 0xd20   :  { %v7507_v12 = vpop.eup %7506  ;;  %7514 = vrcp.f32 %v4437_v52  ;;  %v4468_v20 = vmul.f32 %v7505_v0, %v9809_v2 }
 0xd21   :  { %v4470_v9 = vmul.f32 %v7507_v12, %v9805_v21  ;;  %v3845_v35 = vmul.f32 1.442695, %v3816_v19  ;;  %v3818_v21 = vsub.f32 %v9635_v51, %v9768_v29  ;;  %v10783_v51 = vld [vmem:[#allocation35_spill] sm:$0xff]  ;;  %v10784_v29 = vld [vmem:[#allocation60_spill] sm:$0xff] }
 0xd22   :  { %v7509_v49 = vpop.eup %7508 }
 0xd23   :  { %v4439_v46 = vpop.xlane.xlu0 %4438  ;;  %v3860_v14 = vpop.xlane.xlu1 %3859  ;;  %v4469_v60 = vmul.f32 %v7509_v49, %v9821_v45  ;;  %v4481_v10 = vpack.c.bf16 %v4471_v25, %v4470_v9  ;;  %v3849_v55 = vmul.f32 1.442695, %v3818_v21 }
 0xd24   :  { %7516 = vrcp.f32 %v4439_v46 }
 0xd25   :  { %v4480_v32 = vpack.c.bf16 %v4469_v60, %v4468_v20  ;;  %7518 = vpow2.f32 %v3845_v35 }
 0xd26   :  { %v7511_v50 = vpop.eup %7510  ;;  %7520 = vpow2.f32 %v3849_v55 }
 0xd27   :  { %v3928_v11 = vpop.permute.xlu0 %3927  ;;  %6765 = vmatprep.mubr.bf16.mxu0 %v4480_v32  ;;  %v3864_v30 = vpop.xlane.xlu1 %3863  ;;  %v4475_v61 = vmul.f32 %v7511_v50, %v9824_v24  ;;  %7522 = vrcp.f32 %v9913_v53  ;;  %v10788_v53 = vld [vmem:[#allocation65_spill] sm:$0xff] }
 0xd28   :  { %6677 = vmatprep.subr.bf16.mxu1 %v3928_v11  ;;  %6766 = vmatmul.mubr.bf16.gmra.mrb[184].mxu0 %v4481_v10  ;;  %v7513_v16 = vpop.eup %7512 }
 0xd29   :  { %6678 = vmatpush3.bf16.msra.mxu1 %v3928_v11  ;;  %v4474_v27 = vmul.f32 %v7513_v16, %v9826_v1  ;;  %v10785_v1 = vld [vmem:[#allocation38_spill] sm:$0xff] }
 0xd2a   :  { %v7515_v2 = vpop.eup %7514 }
 0xd2b   :  { %v3930_v28 = vpop.permute.xlu1 %3929  ;;  %v4472_v47 = vmul.f32 %v7515_v2, %v9832_v38  ;;  %v4483_v54 = vpack.c.bf16 %v4475_v61, %v4474_v27  ;;  %v10786_v38 = vld [vmem:[#allocation61_spill] sm:$0xff] }
 0xd2c   :  { %6679 = vmatprep.subr.bf16.mxu1 %v3930_v28 }
 0xd2d   :  { %6680 = vmatpush3.bf16.msra.mxu1 %v3930_v28 }
 0xd2e   :  { %v7517_v45 = vpop.eup %7516 }
 0xd2f   :  { %v4473_v57 = vmul.f32 %v7517_v45, %v9840_v5  ;;  %v9968_v13 = vpop.eup %7518  ;;  %v10787_v5 = vld [vmem:[#allocation63_spill] sm:$0xff] }
 0xd30   :  { %v9975_v24 = vpop.eup %7520 }
 0xd31   :  { %v4482_v23 = vpack.c.bf16 %v4473_v57, %v4472_v47 }
 0xd33   :  { %6769 = vmatprep.mubr.bf16.mxu0 %v4482_v23 }
 0xd34   :  { %6770 = vmatmul.mubr.bf16.gmra.mrb[188].mxu0 %v4483_v54 }
 0xd35   :  { %6793 = vmatprep.mubr.msk.bf16.mxu0 %vm884_vm0, %v10782_v42 }
 0xd3c   :  { %6794 = vmatmul.mubr.msk.bf16.vlgmr.msra.gmra.mrb[192].mxu0 %vm884_vm0, %v10783_v51 }
 0xd3d   :  { %3877 = vadd.xlane.f32.xlu0 %v9968_v13  ;;  %6797 = vmatprep.mubr.msk.bf16.mxu0 %vm884_vm0, %v10784_v29 }
 0xd41   :  { %3881 = vadd.xlane.f32.xlu0 %v9975_v24 }
 0xd44   :  { %6798 = vmatmul.mubr.msk.bf16.gmra.mrb[196].mxu0 %vm884_vm0, %v10785_v1 }
 0xd45   :  { %6801 = vmatprep.mubr.msk.bf16.mxu0 %vm884_vm0, %v10786_v38 }
 0xd4c   :  { %6802 = vmatmul.mubr.msk.bf16.gmra.mrb[200].mxu0 %vm884_vm0, %v10787_v5 }
 0xd4d   :  { %6805 = vmatprep.mubr.msk.bf16.mxu0 %vm884_vm0, %v9904_v4 }
 0xd54   :  { %6806 = vmatmul.mubr.msk.bf16.gmra.mrb[204].mxu0 %vm884_vm0, %v9828_v34  ;;  %v7523_v34 = vpop.eup %7522 }
 0xd55   :  { %v3902_v20 = vmul.f32 %v7523_v34, %v10788_v53 }
 0xd58   :  { %v3862_v63 = vpop.xlane.xlu0 %3861 }
 0xd59   :  { %7524 = vrcp.f32 %v3862_v63 }
 0xd5a   :  { %7526 = vrcp.f32 %v9910_v43 }
 0xd5b   :  { %7528 = vrcp.f32 %v3860_v14  ;;  %v10789_v14 = vld [vmem:[#allocation62_spill] sm:$0xff] }
 0xd5c   :  { %v3866_v40 = vpop.xlane.xlu0 %3865  ;;  %v3868_v18 = vpop.xlane.xlu1 %3867 }
 0xd5d   :  { %7530 = vrcp.f32 %v3866_v40 }
 0xd60   :  { %v3932_v6 = vpop.permute.xlu0 %3931  ;;  %v3872_v22 = vpop.xlane.xlu1 %3871 }
 0xd61   :  { %6681 = vmatprep.subr.bf16.mxu1 %v3932_v6 }
 0xd62   :  { %6682 = vmatpush3.bf16.msra.mxu1 %v3932_v6 }
 0xd63   :  { %v7525_v49 = vpop.eup %7524 }
 0xd64   :  { %v3934_v17 = vpop.permute.xlu1 %3933  ;;  %v7527_v25 = vpop.eup %7526  ;;  %v3904_v43 = vmul.f32 %v7525_v49, %v9893_v48 }
 0xd65   :  { %6683 = vmatprep.subr.bf16.mxu1 %v3934_v17  ;;  %v7529_v46 = vpop.eup %7528  ;;  %v3901_v9 = vmul.f32 %v7527_v25, %v10789_v14  ;;  %v10790_v14 = vld [vmem:[#allocation43_spill] sm:$0xff] }
 0xd66   :  { %6684 = vmatpush3.bf16.msra.mxu1 %v3934_v17  ;;  %v3903_v32 = vmul.f32 %v7529_v46, %v9838_v59  ;;  %v7059_v17 = vld [vmem:[#allocation7 + $0x28] sm:$0xff]  }
 0xd67   :  { %v3916_v10 = vpack.c.bf16 %v3902_v20, %v3901_v9  ;;  %v7531_v11 = vpop.eup %7530 }
 0xd68   :  { %v3906_v28 = vmul.f32 %v7531_v11, %v9900_v31 }
 0xd91   :  { %v3870_v33 = vpop.xlane.xlu0 %3869 }
 0xd92   :  { %7532 = vrcp.f32 %v3870_v33 }
 0xd93   :  { %7534 = vrcp.f32 %v3864_v30  ;;  %v3917_v30 = vpack.c.bf16 %v3904_v43, %v3903_v32 }
 0xd94   :  { %7536 = vrcp.f32 %v3868_v18 }
 0xd95   :  { %v3874_v4 = vpop.xlane.xlu0 %3873  ;;  %v3876_v52 = vpop.xlane.xlu1 %3875 }
 0xd96   :  { %7538 = vrcp.f32 %v3874_v4 }
 0xd97   :  { %7540 = vrcp.f32 %v3872_v22 }
 0xd98   :  { %7542 = vrcp.f32 %v3876_v52 }
 0xd99   :  { %v3936_v0 = vpop.permute.xlu0 %3935  ;;  %v3880_v12 = vpop.xlane.xlu1 %3879 }
 0xd9a   :  { %6685 = vmatprep.subr.bf16.mxu1 %v3936_v0 }
 0xd9b   :  { %6686 = vmatpush3.bf16.msra.mxu1 %v3936_v0 }
 0xd9c   :  { %v7533_v50 = vpop.eup %7532 }
 0xd9d   :  { %v3938_v60 = vpop.permute.xlu1 %3937  ;;  %v7535_v19 = vpop.eup %7534  ;;  %v3908_v48 = vmul.f32 %v7533_v50, %v9929_v36 }
 0xd9e   :  { %6687 = vmatprep.subr.bf16.mxu1 %v3938_v60  ;;  %v7537_v16 = vpop.eup %7536  ;;  %v3905_v2 = vmul.f32 %v7535_v19, %v9844_v8 }
 0xd9f   :  { %6688 = vmatpush3.bf16.msra.mxu1 %v3938_v60  ;;  %v3907_v45 = vmul.f32 %v7537_v16, %v9902_v44  ;;  %v10792_v16 = vld [vmem:[#allocation45_spill] sm:$0xff] }
 0xda0   :  { %v3918_v35 = vpack.c.bf16 %v3906_v28, %v3905_v2  ;;  %v7539_v21 = vpop.eup %7538  ;;  %6705 = vmatprep.subr.bf16.mxu1 %v7059_v17  ;;  %v10793_v2 = vld [vmem:[#allocation49_spill] sm:$0xff] }
 0xda1   :  { %v3919_v59 = vpack.c.bf16 %v3908_v48, %v3907_v45  ;;  %v7541_v27 = vpop.eup %7540  ;;  %v3910_v61 = vmul.f32 %v7539_v21, %v9931_v15 }
 0xda2   :  { %6690 = vmatmul.mubr.bf16.vlgmr.msra.gmra.mrb[80].mxu1 %v3916_v10  ;;  %v3909_v47 = vmul.f32 %v7541_v27, %v9908_v56  ;;  %v7543_v8 = vpop.eup %7542 }
 0xda3   :  { %6693 = vmatprep.mubr.bf16.mxu1 %v3917_v30  ;;  %v3911_v23 = vmul.f32 %v7543_v8, %v9935_v3  ;;  %6706 = vmatpush3.bf16.msra.mxu1 %v7059_v17  ;;  %v10791_v30 = vld [vmem:[#allocation44_spill] sm:$0xff]  ;;  %v10798_v17 = vld [vmem:[#allocation51_spill] sm:$0xff] }
 0xda4   :  { %v3920_v57 = vpack.c.bf16 %v3910_v61, %v3909_v47  ;;  %v10795_v47 = vld [vmem:[#allocation48_spill] sm:$0xff] }
 0xdaa   :  { %6694 = vmatmul.mubr.bf16.gmra.mrb[84].mxu1 %v3918_v35 }
 0xdab   :  { %6697 = vmatprep.mubr.bf16.mxu1 %v3919_v59  ;;  %v10794_v59 = vld [vmem:[#allocation47_spill] sm:$0xff] }
 0xdb2   :  { %6698 = vmatmul.mubr.bf16.gmra.mrb[88].mxu1 %v3920_v57 }
 0xdca   :  { %v3878_v31 = vpop.xlane.xlu0 %3877 }
 0xdcb   :  { %7544 = vrcp.f32 %v3878_v31 }
 0xdcc   :  { %7546 = vrcp.f32 %v3880_v12 }
 0xdce   :  { %v3882_v36 = vpop.xlane.xlu0 %3881 }
 0xdcf   :  { %7548 = vrcp.f32 %v3882_v36 }
 0xdd5   :  { %v7545_v44 = vpop.eup %7544 }
 0xdd6   :  { %v3912_v55 = vmul.f32 %v7545_v44, %v9968_v13  ;;  %v7547_v54 = vpop.eup %7546  ;;  %v10796_v44 = vld [vmem:[#allocation46_spill] sm:$0xff] }
 0xdd7   :  { %v3913_v56 = vmul.f32 %v7547_v54, %v9942_v37  ;;  %v10797_v54 = vld [vmem:[#allocation50_spill] sm:$0xff] }
 0xdd8   :  { %v3921_v42 = vpack.c.bf16 %v3912_v55, %v3911_v23 }
 0xdd9   :  { %v7549_v51 = vpop.eup %7548 }
 0xdda   :  { %6701 = vmatprep.mubr.bf16.mxu1 %v3921_v42  ;;  %v3914_v15 = vmul.f32 %v7549_v51, %v9975_v24 }
 0xddc   :  { %v3922_v29 = vpack.c.bf16 %v3914_v15, %v3913_v56 }
 0xdde   :  { %6702 = vmatmul.mubr.bf16.gmra.mrb[92].mxu1 %v3922_v29  ;;  %v7060_v29 = vld [vmem:[#allocation7 + $0x30] sm:$0xff]  }
 0xddf   :  { %v10004_v1 = vpop.f32.mrb[176].mxu0  ;;  %6773 = vmatprep.subr.bf16.mxu1 %v7060_v29 }
 0xde0   :  { %v10006_v38 = vpop.f32.mrb[177].mxu0 }
 0xde1   :  { %v10008_v5 = vpop.f32.mrb[178].mxu0 }
 0xde2   :  { %v4606_v3 = vpack.c.bf16 %v10008_v5, %v10004_v1  ;;  %v10012_v13 = vpop.f32.mrb[179].mxu0 }
 0xde3   :  { %v4605_v63 = vpack.c.bf16 %v10012_v13, %v10006_v38 }
 0xdea   :  { %v10016_v40 = vpop.f32.mrb[180].mxu0 }
 0xdeb   :  { %v10018_v37 = vpop.f32.mrb[181].mxu0 }
 0xdec   :  { %v10020_v24 = vpop.f32.mrb[182].mxu0 }
 0xded   :  { %v4608_v18 = vpack.c.bf16 %v10020_v24, %v10016_v40  ;;  %v10024_v6 = vpop.f32.mrb[183].mxu0 }
 0xdee   :  { %v4607_v22 = vpack.c.bf16 %v10024_v6, %v10018_v37 }
 0xdfb   :  { %v10028_v33 = vpop.f32.mrb[184].mxu0 }
 0xdfc   :  { %v10030_v4 = vpop.f32.mrb[185].mxu0 }
 0xdfd   :  { %v10032_v52 = vpop.f32.mrb[186].mxu0 }
 0xdfe   :  { %v4610_v34 = vpack.c.bf16 %v10032_v52, %v10028_v33  ;;  %v10036_v0 = vpop.f32.mrb[187].mxu0 }
 0xdff   :  { %v4609_v12 = vpack.c.bf16 %v10036_v0, %v10030_v4 }
 0xe07   :  { %v10040_v49 = vpop.f32.mrb[188].mxu0 }
 0xe08   :  { %v10042_v25 = vpop.f32.mrb[189].mxu0 }
 0xe09   :  { %v10044_v46 = vpop.f32.mrb[190].mxu0 }
 0xe0a   :  { %v4612_v53 = vpack.c.bf16 %v10044_v46, %v10040_v49  ;;  %v10048_v20 = vpop.f32.mrb[191].mxu0 }
 0xe0b   :  { %v4611_v60 = vpack.c.bf16 %v10048_v20, %v10042_v25 }
 0xe0f   :  { %v6795_v43 = vpop.f32.mrb[192].mxu0 }
 0xe10   :  { %v10053_v9 = vadd.f32 %v6795_v43, %v10790_v14  ;;  %v4830_v32 = vpop.f32.mrb[193].mxu0  ;;  %v10799_v14 = vld [vmem:[#allocation17_spill] sm:$0xff] }
 0xe11   :  { %v6796_v10 = vpop.f32.mrb[194].mxu0  ;;  %v10057_v50 = vadd.f32 %v4830_v32, %v10791_v30  ;;  %v10800_v32 = vld [vmem:[#allocation52_spill] sm:$0xff] }
 0xe12   :  { %4897 = vmax.xlane.f32.xlu0 %v10053_v9  ;;  %v4833_v11 = vpop.f32.mrb[195].mxu0  ;;  %v10061_v28 = vadd.f32 %v6796_v10, %v10792_v16 }
 0xe13   :  { %v10069_v27 = vadd.f32 %v4833_v11, %v10794_v59  ;;  %v10801_v11 = vld [vmem:[#allocation53_spill] sm:$0xff] }
 0xe16   :  { %4893 = vmax.xlane.f32.xlu0 %v10057_v50 }
 0xe17   :  { %v6799_v19 = vpop.f32.mrb[196].mxu0 }
 0xe18   :  { %v4846_v48 = vpop.f32.mrb[197].mxu0  ;;  %v10073_v57 = vadd.f32 %v6799_v19, %v10795_v47  ;;  %v10802_v19 = vld [vmem:[#allocation54_spill] sm:$0xff] }
 0xe19   :  { %v10064_v45 = vadd.f32 %v4846_v48, %v10793_v2  ;;  %v6800_v35 = vpop.f32.mrb[198].mxu0  ;;  %v10803_v48 = vld [vmem:[#allocation55_spill] sm:$0xff] }
 0xe1a   :  { %v4849_v21 = vpop.f32.mrb[199].mxu0  ;;  %4899 = vmax.xlane.f32.xlu0 %v10061_v28  ;;  %v10077_v23 = vadd.f32 %v6800_v35, %v10796_v44  ;;  %v10804_v35 = vld [vmem:[#allocation16_spill] sm:$0xff]  ;;  %v10807_v44 = vld [vmem:[#allocation58_spill] sm:$0xff] }
 0xe1b   :  { %4901 = vmax.xlane.f32.xlu1 %v10064_v45  ;;  %v10081_v42 = vadd.f32 %v4849_v21, %v10797_v54  ;;  %v10805_v21 = vld [vmem:[#allocation56_spill] sm:$0xff] }
 0xe1e   :  { %4895 = vmax.xlane.f32.xlu0 %v10069_v27 }
 0xe1f   :  { %v6803_v61 = vpop.f32.mrb[200].mxu0 }
 0xe20   :  { %v4862_v31 = vpop.f32.mrb[201].mxu0  ;;  %v10085_v43 = vadd.f32 %v6803_v61, %v10798_v17  ;;  %v10806_v61 = vld [vmem:[#allocation57_spill] sm:$0xff] }
 0xe21   :  { %v6804_v36 = vpop.f32.mrb[202].mxu0  ;;  %v10091_v10 = vadd.f32 %v4862_v31, %v10800_v32 }
 0xe22   :  { %v4865_v8 = vpop.f32.mrb[203].mxu0  ;;  %4905 = vmax.xlane.f32.xlu0 %v10073_v57  ;;  %v10095_v30 = vadd.f32 %v6804_v36, %v10801_v11 }
 0xe23   :  { %v10099_v16 = vadd.f32 %v4865_v8, %v10802_v19 }
 0xe26   :  { %4907 = vmax.xlane.f32.xlu0 %v10077_v23 }
 0xe27   :  { %v6807_v55 = vpop.f32.mrb[204].mxu0 }
 0xe28   :  { %v4878_v51 = vpop.f32.mrb[205].mxu0  ;;  %v10103_v2 = vadd.f32 %v6807_v55, %v10803_v48 }
 0xe29   :  { %v6808_v56 = vpop.f32.mrb[206].mxu0  ;;  %v10117_v59 = vadd.f32 %v4878_v51, %v10805_v21 }
 0xe2a   :  { %v4881_v15 = vpop.f32.mrb[207].mxu0  ;;  %4903 = vmax.xlane.f32.xlu0 %v10081_v42  ;;  %v10121_v47 = vadd.f32 %v6808_v56, %v10806_v61 }
 0xe2c   :  { %5045 = vrot.lane.b32.xlu1 %v10799_v14, %s7797_s0 }
 0xe2e   :  { %4913 = vmax.xlane.f32.xlu0 %v10085_v43 }
 0xe32   :  { %4909 = vmax.xlane.f32.xlu0 %v10091_v10 }
 0xe36   :  { %4915 = vmax.xlane.f32.xlu0 %v10095_v30 }
 0xe3a   :  { %4911 = vmax.xlane.f32.xlu0 %v10099_v16 }
 0xe50   :  { %4921 = vmax.xlane.f32.xlu1 %v10103_v2  ;;  %5049 = vrot.lane.b32.xlu0 %v10709_v39, %s7797_s0 }
 0xe54   :  { %5053 = vrot.lane.b32.xlu0 %v10779_v7, %s7797_s0 }
 0xe61   :  { %5047 = vrot.lane.b32.xlu1 %v10804_v35, %s7797_s0 }
 0xe65   :  { %5051 = vrot.lane.b32.xlu1 %v10711_v62, %s7797_s0  ;;  %v10125_v62 = vadd.f32 %v4881_v15, %v10807_v44 }
 0xe69   :  { %5057 = vrot.lane.b32.xlu1 %v10781_v26, %s7797_s0 }
 0xe73   :  { %4917 = vmax.xlane.f32.xlu0 %v10117_v59 }
 0xe75   :  { %v6691_v39 = vpop.f32.mrb[80].mxu1 }
 0xe76   :  { %v3981_v31 = vpop.f32.mrb[81].mxu1 }
 0xe77   :  { %4923 = vmax.xlane.f32.xlu0 %v10121_v47  ;;  %v6692_v7 = vpop.f32.mrb[82].mxu1 }
 0xe78   :  { %v4045_v36 = vpack.c.bf16 %v6692_v7, %v6691_v39  ;;  %v3984_v8 = vpop.f32.mrb[83].mxu1 }
 0xe79   :  { %v4044_v55 = vpack.c.bf16 %v3984_v8, %v3981_v31 }
 0xe7b   :  { %4919 = vmax.xlane.f32.xlu0 %v10125_v62  ;;  %6707 = vmatprep.mubr.msk.bf16.mxu1 %vm884_vm0, %v4044_v55 }
 0xe7c   :  { %6708 = vmatmul.mubr.msk.bf16.vlgmr.msra.gmra.mrb[48].mxu1 %vm884_vm0, %v4045_v36 }
 0xe7d   :  { %v6695_v26 = vpop.f32.mrb[84].mxu1  ;;  %6774 = vmatpush3.bf16.msra.mxu1 %v7060_v29 }
 0xe7e   :  { %v3997_v54 = vpop.f32.mrb[85].mxu1 }
 0xe7f   :  { %v6696_v51 = vpop.f32.mrb[86].mxu1 }
 0xe80   :  { %v4047_v56 = vpack.c.bf16 %v6696_v51, %v6695_v26  ;;  %v4000_v17 = vpop.f32.mrb[87].mxu1 }
 0xe81   :  { %v4046_v14 = vpack.c.bf16 %v4000_v17, %v3997_v54 }
 0xe83   :  { %6711 = vmatprep.mubr.msk.bf16.mxu1 %vm884_vm0, %v4046_v14 }
 0xe84   :  { %6712 = vmatmul.mubr.msk.bf16.gmra.mrb[52].mxu1 %vm884_vm0, %v4047_v56 }
 0xe85   :  { %v6699_v15 = vpop.f32.mrb[88].mxu1 }
 0xe86   :  { %v4013_v32 = vpop.f32.mrb[89].mxu1 }
 0xe87   :  { %v6700_v11 = vpop.f32.mrb[90].mxu1 }
 0xe88   :  { %v4049_v19 = vpack.c.bf16 %v6700_v11, %v6699_v15  ;;  %v4016_v48 = vpop.f32.mrb[91].mxu1 }
 0xe89   :  { %v4048_v35 = vpack.c.bf16 %v4016_v48, %v4013_v32 }
 0xe8b   :  { %6715 = vmatprep.mubr.msk.bf16.mxu1 %vm884_vm0, %v4048_v35 }
 0xe8c   :  { %6716 = vmatmul.mubr.msk.bf16.gmra.mrb[56].mxu1 %vm884_vm0, %v4049_v19 }
 0xe91   :  { %5055 = vrot.lane.b32.xlu0 %v10778_v41, %s7797_s0 }
 0xe9f   :  { %v4898_v29 = vpop.xlane.xlu0 %4897 }
 0xea0   :  { %v4927_v21 = vsub.f32 %v10053_v9, %v4898_v29 }
 0xea2   :  { %v4945_v61 = vmul.f32 1.442695, %v4927_v21 }
 0xea3   :  { %v4894_v39 = vpop.xlane.xlu0 %4893 }
 0xea4   :  { %7550 = vpow2.f32 %v4945_v61  ;;  %v4925_v31 = vsub.f32 %v10057_v50, %v4894_v39 }
 0xea6   :  { %v4941_v7 = vmul.f32 1.442695, %v4925_v31 }
 0xea7   :  { %v4900_v36 = vpop.xlane.xlu0 %4899 }
 0xea8   :  { %7552 = vpow2.f32 %v4941_v7  ;;  %v4928_v8 = vsub.f32 %v10061_v28, %v4900_v36  ;;  %v4902_v44 = vpop.xlane.xlu1 %4901 }
 0xea9   :  { %v4929_v17 = vsub.f32 %v10064_v45, %v4902_v44 }
 0xeaa   :  { %v4947_v55 = vmul.f32 1.442695, %v4928_v8 }
 0xeab   :  { %v4896_v26 = vpop.xlane.xlu0 %4895  ;;  %v4949_v19 = vmul.f32 1.442695, %v4929_v17 }
 0xeac   :  { %7554 = vpow2.f32 %v4947_v55  ;;  %v4926_v54 = vsub.f32 %v10069_v27, %v4896_v26  ;;  %v5046_v41 = vpop.permute.xlu1 %5045 }
 0xead   :  { %6809 = vmatprep.subr.bf16.mxu1 %v5046_v41 }
 0xeae   :  { %v10140_v51 = vpop.eup %7550  ;;  %v4943_v9 = vmul.f32 1.442695, %v4926_v54 }
 0xeaf   :  { %v4906_v56 = vpop.xlane.xlu0 %4905 }
 0xeb0   :  { %7556 = vpow2.f32 %v4943_v9  ;;  %v4931_v50 = vsub.f32 %v10073_v57, %v4906_v56  ;;  %4977 = vadd.xlane.f32.xlu0 %v10140_v51 }
 0xeb1   :  { %v6703_v28 = vpop.f32.mrb[92].mxu1 }
 0xeb2   :  { %v10145_v14 = vpop.eup %7552  ;;  %v4953_v15 = vmul.f32 1.442695, %v4931_v50  ;;  %v4029_v32 = vpop.f32.mrb[93].mxu1 }
 0xeb3   :  { %v4908_v11 = vpop.xlane.xlu0 %4907  ;;  %v6704_v27 = vpop.f32.mrb[94].mxu1 }
 0xeb4   :  { %7558 = vpow2.f32 %v4953_v15  ;;  %v4932_v48 = vsub.f32 %v10077_v23, %v4908_v11  ;;  %v4051_v35 = vpack.c.bf16 %v6704_v27, %v6703_v28  ;;  %4973 = vadd.xlane.f32.xlu0 %v10145_v14  ;;  %v4032_v45 = vpop.f32.mrb[95].mxu1 }
 0xeb5   :  { %v4050_v29 = vpack.c.bf16 %v4032_v45, %v4029_v32  ;;  %7560 = vpow2.f32 %v4949_v19 }
 0xeb6   :  { %v10149_v21 = vpop.eup %7554  ;;  %v4955_v57 = vmul.f32 1.442695, %v4932_v48 }
 0xeb7   :  { %v4904_v61 = vpop.xlane.xlu0 %4903  ;;  %6719 = vmatprep.mubr.msk.bf16.mxu1 %vm884_vm0, %v4050_v29 }
 0xeb8   :  { %v4930_v39 = vsub.f32 %v10081_v42, %v4904_v61  ;;  %4979 = vadd.xlane.f32.xlu0 %v10149_v21  ;;  %6720 = vmatmul.mubr.msk.bf16.gmra.mrb[60].mxu1 %vm884_vm0, %v4051_v35  ;;  %7562 = vpow2.f32 %v4955_v57 }
 0xeb9   :  { %6775 = vmatprep.mubr.msk.bf16.mxu1 %vm884_vm0, %v4605_v63 }
 0xeba   :  { %v10159_v23 = vpop.eup %7556  ;;  %v4951_v31 = vmul.f32 1.442695, %v4930_v39 }
 0xebb   :  { %v4914_v7 = vpop.xlane.xlu0 %4913 }
 0xebc   :  { %7564 = vpow2.f32 %v4951_v31  ;;  %v4935_v36 = vsub.f32 %v10085_v43, %v4914_v7  ;;  %4975 = vadd.xlane.f32.xlu0 %v10159_v23 }
 0xebe   :  { %v10163_v42 = vpop.eup %7558  ;;  %v4961_v8 = vmul.f32 1.442695, %v4935_v36 }
 0xebf   :  { %4985 = vadd.xlane.f32.xlu1 %v10163_v42  ;;  %v4910_v44 = vpop.xlane.xlu0 %4909  ;;  %v10175_v13 = vpop.eup %7560 }
 0xec0   :  { %7566 = vpow2.f32 %v4961_v8  ;;  %v4933_v38 = vsub.f32 %v10091_v10, %v4910_v44  ;;  %6776 = vmatmul.mubr.msk.bf16.vlgmr.msra.gmra.mrb[48].mxu1 %vm884_vm0, %v4606_v3 }
 0xec1   :  { %6810 = vmatpush3.bf16.msra.mxu1 %v5046_v41  ;;  %6779 = vmatprep.mubr.msk.bf16.mxu1 %vm884_vm0, %v4607_v22 }
 0xec2   :  { %v4957_v63 = vmul.f32 1.442695, %v4933_v38  ;;  %v10179_v55 = vpop.eup %7562 }
 0xec3   :  { %v4916_v43 = vpop.xlane.xlu0 %4915  ;;  %4981 = vadd.xlane.f32.xlu1 %v10175_v13 }
 0xec4   :  { %7568 = vpow2.f32 %v4957_v63  ;;  %v4936_v10 = vsub.f32 %v10095_v30, %v4916_v43 }
 0xec6   :  { %v10181_v1 = vpop.eup %7564  ;;  %v4963_v5 = vmul.f32 1.442695, %v4936_v10 }
 0xec7   :  { %4983 = vadd.xlane.f32.xlu0 %v10181_v1  ;;  %v4912_v3 = vpop.xlane.xlu0 %4911  ;;  %4987 = vadd.xlane.f32.xlu1 %v10179_v55 }
 0xec8   :  { %7570 = vpow2.f32 %v4963_v5  ;;  %v4934_v37 = vsub.f32 %v10099_v16, %v4912_v3  ;;  %6780 = vmatmul.mubr.msk.bf16.gmra.mrb[52].mxu1 %vm884_vm0, %v4608_v18 }
 0xec9   :  { %6783 = vmatprep.mubr.msk.bf16.mxu1 %vm884_vm0, %v4609_v12 }
 0xeca   :  { %v10194_v6 = vpop.eup %7566  ;;  %v4959_v22 = vmul.f32 1.442695, %v4934_v37 }
 0xecb   :  { %4993 = vadd.xlane.f32.xlu1 %v10194_v6 }
 0xecc   :  { %7572 = vpow2.f32 %v4959_v22 }
 0xece   :  { %v10197_v30 = vpop.eup %7568 }
 0xecf   :  { %4989 = vadd.xlane.f32.xlu1 %v10197_v30 }
 0xed0   :  { %6784 = vmatmul.mubr.msk.bf16.gmra.mrb[56].mxu1 %vm884_vm0, %v4610_v34  ;;  %v5050_v34 = vpop.permute.xlu0 %5049 }
 0xed1   :  { %6787 = vmatprep.mubr.msk.bf16.mxu1 %vm884_vm0, %v4611_v60 }
 0xed2   :  { %v10208_v40 = vpop.eup %7570 }
 0xed3   :  { %4995 = vadd.xlane.f32.xlu1 %v10208_v40 }
 0xed4   :  { %v5054_v12 = vpop.permute.xlu0 %5053 }
 0xed6   :  { %v10211_v24 = vpop.eup %7572 }
 0xed7   :  { %4991 = vadd.xlane.f32.xlu0 %v10211_v24 }
 0xed8   :  { %6788 = vmatmul.mubr.msk.bf16.gmra.mrb[60].mxu1 %vm884_vm0, %v4612_v53 }
 0xedd   :  { %v4922_v18 = vpop.xlane.xlu1 %4921 }
 0xede   :  { %v4939_v33 = vsub.f32 %v10103_v2, %v4922_v18 }
 0xee0   :  { %v4969_v4 = vmul.f32 1.442695, %v4939_v33 }
 0xee1   :  { %v5048_v52 = vpop.permute.xlu1 %5047 }
 0xee2   :  { %7574 = vpow2.f32 %v4969_v4  ;;  %6811 = vmatprep.subr.bf16.mxu1 %v5048_v52 }
 0xee3   :  { %6812 = vmatpush3.bf16.msra.mxu1 %v5048_v52 }
 0xee4   :  { %6813 = vmatprep.subr.bf16.mxu1 %v5050_v34 }
 0xee5   :  { %v5052_v0 = vpop.permute.xlu1 %5051 }
 0xee7   :  { %6814 = vmatpush3.bf16.msra.mxu1 %v5050_v34 }
 0xee8   :  { %6815 = vmatprep.subr.bf16.mxu1 %v5052_v0 }
 0xee9   :  { %v5058_v9 = vpop.permute.xlu1 %5057 }
 0xeeb   :  { %6816 = vmatpush3.bf16.msra.mxu1 %v5052_v0 }
 0xeec   :  { %v10219_v25 = vpop.eup %7574  ;;  %6817 = vmatprep.subr.bf16.mxu1 %v5054_v12 }
 0xeed   :  { %5001 = vadd.xlane.f32.xlu0 %v10219_v25 }
 0xeef   :  { %6818 = vmatpush3.bf16.msra.mxu1 %v5054_v12 }
 0xf00   :  { %v4918_v49 = vpop.xlane.xlu0 %4917 }
 0xf01   :  { %v4937_v46 = vsub.f32 %v10117_v59, %v4918_v49 }
 0xf03   :  { %v4965_v53 = vmul.f32 1.442695, %v4937_v46 }
 0xf04   :  { %v4924_v20 = vpop.xlane.xlu0 %4923 }
 0xf05   :  { %7576 = vpow2.f32 %v4965_v53  ;;  %v4940_v60 = vsub.f32 %v10121_v47, %v4924_v20 }
 0xf07   :  { %v4971_v16 = vmul.f32 1.442695, %v4940_v60 }
 0xf08   :  { %v4920_v2 = vpop.xlane.xlu0 %4919 }
 0xf09   :  { %7578 = vpow2.f32 %v4971_v16  ;;  %v4938_v26 = vsub.f32 %v10125_v62, %v4920_v2 }
 0xf0b   :  { %v4967_v54 = vmul.f32 1.442695, %v4938_v26 }
 0xf0c   :  { %v5056_v41 = vpop.permute.xlu0 %5055 }
 0xf0d   :  { %7580 = vpow2.f32 %v4967_v54  ;;  %6819 = vmatprep.subr.bf16.mxu1 %v5056_v41 }
 0xf0e   :  { %6820 = vmatpush3.bf16.msra.mxu1 %v5056_v41 }
 0xf0f   :  { %v10225_v56 = vpop.eup %7576  ;;  %6821 = vmatprep.subr.bf16.mxu1 %v5058_v9 }
 0xf10   :  { %4997 = vadd.xlane.f32.xlu1 %v10225_v56 }
 0xf12   :  { %6822 = vmatpush3.bf16.msra.mxu1 %v5058_v9  ;;  %v7061_v9 = vld [vmem:[#allocation7 + $0x38] sm:$0xff]  }
 0xf13   :  { %v10228_v59 = vpop.eup %7578 }
 0xf14   :  { %5003 = vadd.xlane.f32.xlu1 %v10228_v59 }
 0xf17   :  { %v10231_v47 = vpop.eup %7580 }
 0xf18   :  { %4999 = vadd.xlane.f32.xlu0 %v10231_v47 }
 0xf2e   :  { %5059 = vrot.lane.b32.xlu0 %v10780_v58, %s7797_s0 }
 0xf3d   :  { %v4978_v62 = vpop.xlane.xlu0 %4977 }
 0xf3e   :  { %7582 = vrcp.f32 %v4978_v62 }
 0xf41   :  { %v4974_v17 = vpop.xlane.xlu0 %4973 }
 0xf45   :  { %v4980_v50 = vpop.xlane.xlu0 %4979 }
 0xf46   :  { %7584 = vrcp.f32 %v4980_v50 }
 0xf47   :  { %7586 = vrcp.f32 %v4974_v17 }
 0xf48   :  { %v7583_v15 = vpop.eup %7582 }
 0xf49   :  { %v4976_v28 = vpop.xlane.xlu0 %4975  ;;  %v5023_v11 = vmul.f32 %v7583_v15, %v10140_v51 }
 0xf4a   :  { %7588 = vrcp.f32 %v4976_v28 }
 0xf4c   :  { %v4986_v57 = vpop.xlane.xlu1 %4985 }
 0xf50   :  { %v7585_v32 = vpop.eup %7584  ;;  %v4982_v61 = vpop.xlane.xlu1 %4981 }
 0xf51   :  { %v5024_v27 = vmul.f32 %v7585_v32, %v10149_v21  ;;  %v7587_v19 = vpop.eup %7586 }
 0xf52   :  { %v5021_v45 = vmul.f32 %v7587_v19, %v10145_v14 }
 0xf53   :  { %v5038_v48 = vpack.c.bf16 %v5024_v27, %v5023_v11 }
 0xf54   :  { %v7589_v35 = vpop.eup %7588  ;;  %v4988_v39 = vpop.xlane.xlu1 %4987 }
 0xf55   :  { %v5022_v58 = vmul.f32 %v7589_v35, %v10159_v23  ;;  %v4984_v31 = vpop.xlane.xlu0 %4983 }
 0xf56   :  { %7590 = vrcp.f32 %v4984_v31 }
 0xf57   :  { %v5037_v29 = vpack.c.bf16 %v5022_v58, %v5021_v45  ;;  %7592 = vrcp.f32 %v4982_v61 }
 0xf58   :  { %v4994_v7 = vpop.xlane.xlu1 %4993  ;;  %7594 = vrcp.f32 %v4988_v39 }
 0xf59   :  { %6825 = vmatprep.mubr.bf16.mxu1 %v5037_v29 }
 0xf5c   :  { %v4990_v51 = vpop.xlane.xlu1 %4989 }
 0xf60   :  { %v7591_v44 = vpop.eup %7590  ;;  %v4996_v14 = vpop.xlane.xlu1 %4995 }
 0xf61   :  { %v7593_v23 = vpop.eup %7592  ;;  %v5026_v63 = vmul.f32 %v7591_v44, %v10181_v1  ;;  %v7646_v44 = vld [vmem:[#allocation2 + $0x10] sm:$0xff] }
 0xf62   :  { %v5025_v10 = vmul.f32 %v7593_v23, %v10175_v13  ;;  %v7595_v5 = vpop.eup %7594 }
 0xf63   :  { %v5028_v4 = vmul.f32 %v7595_v5, %v10179_v55 }
 0xf64   :  { %v4992_v36 = vpop.xlane.xlu0 %4991  ;;  %v5039_v3 = vpack.c.bf16 %v5026_v63, %v5025_v10  ;;  %v7647_v63 = vld [vmem:[#allocation2] sm:$0xff] }
 0xf65   :  { %7596 = vrcp.f32 %v4992_v36 }
 0xf66   :  { %7598 = vrcp.f32 %v4986_v57 }
 0xf67   :  { %7600 = vrcp.f32 %v4990_v51 }
 0xf68   :  { %7602 = vrcp.f32 %v4996_v14 }
 0xf6f   :  { %v7597_v37 = vpop.eup %7596 }
 0xf70   :  { %v7599_v22 = vpop.eup %7598  ;;  %v5030_v1 = vmul.f32 %v7597_v37, %v10211_v24 }
 0xf71   :  { %v7601_v18 = vpop.eup %7600  ;;  %v5027_v52 = vmul.f32 %v7599_v22, %v10163_v42 }
 0xf72   :  { %v5029_v13 = vmul.f32 %v7601_v18, %v10197_v30  ;;  %v7603_v0 = vpop.eup %7602  ;;  %v7648_v18 = vld [vmem:[#allocation2 + $0x18] sm:$0xff] }
 0xf73   :  { %v5040_v34 = vpack.c.bf16 %v5028_v4, %v5027_v52  ;;  %v5032_v20 = vmul.f32 %v7603_v0, %v10208_v40 }
 0xf74   :  { %v5041_v12 = vpack.c.bf16 %v5030_v1, %v5029_v13  ;;  %v7649_v1 = vld [vmem:[#allocation2 + $0x30] sm:$0xff] }
 0xf7a   :  { %v5002_v8 = vpop.xlane.xlu0 %5001 }
 0xf9d   :  { %v4998_v43 = vpop.xlane.xlu1 %4997 }
 0xfa1   :  { %v5004_v33 = vpop.xlane.xlu1 %5003 }
 0xfa5   :  { %v5000_v21 = vpop.xlane.xlu0 %4999 }
 0xfa6   :  { %7604 = vrcp.f32 %v5000_v21 }
 0xfa7   :  { %7606 = vrcp.f32 %v4994_v7  ;;  %v10263_v7 = vld [vmem:[%s10507_s6] ss:$0 sm:$0xff] }
 0xfa8   :  { %7608 = vrcp.f32 %v4998_v43 }
 0xfa9   :  { %v5060_v38 = vpop.permute.xlu0 %5059  ;;  %7610 = vrcp.f32 %v5004_v33 }
 0xfaa   :  { %6823 = vmatprep.subr.bf16.mxu1 %v5060_v38  ;;  %7612 = vrcp.f32 %v5002_v8 }
 0xfab   :  { %6824 = vmatpush3.bf16.msra.mxu1 %v5060_v38 }
 0xfac   :  { %6841 = vmatprep.subr.bf16.mxu1 %v7061_v9 }
 0xfae   :  { %6826 = vmatmul.mubr.bf16.vlgmr.msra.gmra.mrb[96].mxu1 %v5038_v48 }
 0xfaf   :  { %6829 = vmatprep.mubr.bf16.mxu1 %v5039_v3  ;;  %6842 = vmatpush3.bf16.msra.mxu1 %v7061_v9  ;;  %v7653_v9 = vld [vmem:[#allocation2 + $0x28] sm:$0xff] }
 0xfb0   :  { %v7605_v49 = vpop.eup %7604 }
 0xfb1   :  { %v7607_v46 = vpop.eup %7606  ;;  %v5034_v55 = vmul.f32 %v7605_v49, %v10231_v47 }
 0xfb2   :  { %v7609_v53 = vpop.eup %7608  ;;  %v5031_v24 = vmul.f32 %v7607_v46, %v10194_v6 }
 0xfb3   :  { %v5033_v42 = vmul.f32 %v7609_v53, %v10225_v56  ;;  %v7611_v16 = vpop.eup %7610 }
 0xfb4   :  { %v5042_v60 = vpack.c.bf16 %v5032_v20, %v5031_v24  ;;  %v7613_v2 = vpop.eup %7612  ;;  %v5036_v26 = vmul.f32 %v7611_v16, %v10228_v59  ;;  %v7651_v20 = vld [vmem:[#allocation2 + $0x20] sm:$0xff] }
 0xfb5   :  { %v5043_v30 = vpack.c.bf16 %v5034_v55, %v5033_v42  ;;  %v5035_v54 = vmul.f32 %v7613_v2, %v10219_v25 }
 0xfb6   :  { %6830 = vmatmul.mubr.bf16.gmra.mrb[100].mxu1 %v5040_v34  ;;  %v7650_v34 = vld [vmem:[#allocation2 + $0x8] sm:$0xff] }
 0xfb7   :  { %6833 = vmatprep.mubr.bf16.mxu1 %v5041_v12  ;;  %v5044_v41 = vpack.c.bf16 %v5036_v26, %v5035_v54 }
 0xfbe   :  { %6834 = vmatmul.mubr.bf16.gmra.mrb[104].mxu1 %v5042_v60  ;;  %v7652_v60 = vld [vmem:[#allocation2 + $0x38] sm:$0xff] }
 0xfbf   :  { %6837 = vmatprep.mubr.bf16.mxu1 %v5043_v30 }
 0xfc6   :  { %6838 = vmatmul.mubr.bf16.gmra.mrb[108].mxu1 %v5044_v41 }
0x1081   :  { %v6827_v40 = vpop.f32.mrb[96].mxu1 }
0x1082   :  { %v5103_v47 = vpop.f32.mrb[97].mxu1 }
0x1083   :  { %v6828_v6 = vpop.f32.mrb[98].mxu1 }
0x1084   :  { %v5167_v62 = vpack.c.bf16 %v6828_v6, %v6827_v40  ;;  %v5106_v56 = vpop.f32.mrb[99].mxu1  ;;  %v7654_v6 = vld [vmem:[#allocation2 + $0x70] sm:$0xff] }
0x1085   :  { %v5166_v17 = vpack.c.bf16 %v5106_v56, %v5103_v47 }
0x1087   :  { %6843 = vmatprep.mubr.msk.bf16.mxu1 %vm884_vm0, %v5166_v17  ;;  %v7655_v17 = vld [vmem:[#allocation2 + $0x50] sm:$0xff] }
0x1088   :  { %6844 = vmatmul.mubr.msk.bf16.vlgmr.msra.gmra.mrb[48].mxu1 %vm884_vm0, %v5167_v62 }
0x1089   :  { %v6831_v50 = vpop.f32.mrb[100].mxu1 }
0x108a   :  { %v5119_v28 = vpop.f32.mrb[101].mxu1 }
0x108b   :  { %v6832_v59 = vpop.f32.mrb[102].mxu1 }
0x108c   :  { %v5169_v15 = vpack.c.bf16 %v6832_v59, %v6831_v50  ;;  %v5122_v25 = vpop.f32.mrb[103].mxu1  ;;  %v7656_v59 = vld [vmem:[#allocation2 + $0x40] sm:$0xff] }
0x108d   :  { %v5168_v32 = vpack.c.bf16 %v5122_v25, %v5119_v28 }
0x108f   :  { %6847 = vmatprep.mubr.msk.bf16.mxu1 %vm884_vm0, %v5168_v32  ;;  %v7657_v32 = vld [vmem:[#allocation2 + $0x58] sm:$0xff] }
0x1090   :  { %6848 = vmatmul.mubr.msk.bf16.gmra.mrb[52].mxu1 %vm884_vm0, %v5169_v15 }
0x1091   :  { %v6835_v11 = vpop.f32.mrb[104].mxu1 }
0x1092   :  { %v5135_v27 = vpop.f32.mrb[105].mxu1 }
0x1093   :  { %v6836_v19 = vpop.f32.mrb[106].mxu1 }
0x1094   :  { %v5171_v48 = vpack.c.bf16 %v6836_v19, %v6835_v11  ;;  %v5138_v35 = vpop.f32.mrb[107].mxu1  ;;  %v7658_v19 = vld [vmem:[#allocation2 + $0x48] sm:$0xff] }
0x1095   :  { %v5170_v45 = vpack.c.bf16 %v5138_v35, %v5135_v27 }
0x1097   :  { %6851 = vmatprep.mubr.msk.bf16.mxu1 %vm884_vm0, %v5170_v45  ;;  %v7659_v45 = vld [vmem:[#allocation2 + $0x60] sm:$0xff] }
0x1098   :  { %6852 = vmatmul.mubr.msk.bf16.gmra.mrb[56].mxu1 %vm884_vm0, %v5171_v48 }
0x1099   :  { %v6839_v58 = vpop.f32.mrb[108].mxu1 }
0x109a   :  { %v5151_v29 = vpop.f32.mrb[109].mxu1 }
0x109b   :  { %v6840_v57 = vpop.f32.mrb[110].mxu1 }
0x109c   :  { %v5173_v61 = vpack.c.bf16 %v6840_v57, %v6839_v58  ;;  %v5154_v39 = vpop.f32.mrb[111].mxu1 }
0x109d   :  { %v5172_v31 = vpack.c.bf16 %v5154_v39, %v5151_v29 }
0x109f   :  { %6855 = vmatprep.mubr.msk.bf16.mxu1 %vm884_vm0, %v5172_v31  ;;  %v7661_v31 = vld [vmem:[#allocation2 + $0x78] sm:$0xff] }
0x10a0   :  { %6856 = vmatmul.mubr.msk.bf16.gmra.mrb[60].mxu1 %vm884_vm0, %v5173_v61  ;;  %v7660_v61 = vld [vmem:[#allocation2 + $0x68] sm:$0xff] }
0x115b   :  { %v6845_v36 = vpop.f32.mrb[48].mxu1 }
0x115c   :  { %v5326_v51 = vadd.f32 %v6845_v36, %v10263_v7  ;;  %v5238_v8 = vpop.f32.mrb[49].mxu1 }
0x115d   :  { %v6846_v21 = vpop.f32.mrb[50].mxu1  ;;  %v5324_v23 = vadd.f32 %v10263_v7, %v5238_v8 }
0x115e   :  { %v10266_v14 = vadd.f32 %v7646_v44, %v5326_v51  ;;  %v5241_v38 = vpop.f32.mrb[51].mxu1  ;;  %v5327_v10 = vadd.f32 %v6846_v21, %v10263_v7 }
0x115f   :  { %v10270_v43 = vadd.f32 %v7647_v63, %v5324_v23  ;;  %v5325_v4 = vadd.f32 %v10263_v7, %v5241_v38 }
0x1160   :  { %5362 = vadd.xlane.f32.xlu1 %v10266_v14  ;;  %v10275_v33 = vadd.f32 %v7648_v18, %v5327_v10 }
0x1161   :  { %v10282_v0 = vadd.f32 %v7650_v34, %v5325_v4 }
0x1163   :  { %v6849_v5 = vpop.f32.mrb[52].mxu1 }
0x1164   :  { %v5330_v3 = vadd.f32 %v6849_v5, %v10263_v7  ;;  %5358 = vadd.xlane.f32.xlu1 %v10270_v43  ;;  %v5254_v37 = vpop.f32.mrb[53].mxu1 }
0x1165   :  { %v6850_v22 = vpop.f32.mrb[54].mxu1  ;;  %v5328_v12 = vadd.f32 %v10263_v7, %v5254_v37 }
0x1166   :  { %v10278_v52 = vadd.f32 %v7649_v1, %v5330_v3  ;;  %v5257_v13 = vpop.f32.mrb[55].mxu1  ;;  %v5331_v24 = vadd.f32 %v6850_v22, %v10263_v7 }
0x1167   :  { %v10286_v55 = vadd.f32 %v7651_v20, %v5328_v12  ;;  %v5329_v30 = vadd.f32 %v10263_v7, %v5257_v13 }
0x1168   :  { %5364 = vadd.xlane.f32.xlu1 %v10275_v33  ;;  %5370 = vadd.xlane.f32.xlu0 %v10278_v52  ;;  %v10290_v16 = vadd.f32 %v7652_v60, %v5331_v24 }
0x1169   :  { %v10295_v40 = vadd.f32 %v7653_v9, %v5329_v30 }
0x116b   :  { %v6853_v49 = vpop.f32.mrb[56].mxu1 }
0x116c   :  { %5360 = vadd.xlane.f32.xlu1 %v10282_v0  ;;  %v5270_v46 = vpop.f32.mrb[57].mxu1  ;;  %v5334_v47 = vadd.f32 %v6853_v49, %v10263_v7 }
0x116d   :  { %v6854_v53 = vpop.f32.mrb[58].mxu1  ;;  %v5332_v28 = vadd.f32 %v10263_v7, %v5270_v46 }
0x116e   :  { %v5273_v42 = vpop.f32.mrb[59].mxu1  ;;  %v10302_v50 = vadd.f32 %v7655_v17, %v5334_v47  ;;  %v5335_v25 = vadd.f32 %v6854_v53, %v10263_v7 }
0x116f   :  { %v10306_v15 = vadd.f32 %v7656_v59, %v5332_v28  ;;  %v5333_v27 = vadd.f32 %v10263_v7, %v5273_v42 }
0x1170   :  { %5366 = vadd.xlane.f32.xlu1 %v10286_v55  ;;  %v10310_v11 = vadd.f32 %v7657_v32, %v5335_v25  ;;  %v7064_v32 = vld [vmem:[#allocation8 + $0x10] sm:$0xff]  }
0x1171   :  { %v10314_v48 = vadd.f32 %v7658_v19, %v5333_v27 }
0x1173   :  { %v6857_v2 = vpop.f32.mrb[60].mxu1 }
0x1174   :  { %v5338_v26 = vadd.f32 %v6857_v2, %v10263_v7  ;;  %5372 = vadd.xlane.f32.xlu1 %v10290_v16  ;;  %v5286_v54 = vpop.f32.mrb[61].mxu1 }
0x1175   :  { %v6858_v41 = vpop.f32.mrb[62].mxu1  ;;  %v5336_v35 = vadd.f32 %v10263_v7, %v5286_v54  ;;  %v7062_v54 = vld [vmem:[#allocation8] sm:$0xff]  }
0x1176   :  { %v10298_v62 = vadd.f32 %v7654_v6, %v5338_v26  ;;  %v5289_v56 = vpop.f32.mrb[63].mxu1  ;;  %v5339_v57 = vadd.f32 %v6858_v41, %v10263_v7  ;;  %6859 = vmatprep.subr.bf16.mxu0 %v7062_v54  ;;  %v7063_v6 = vld [vmem:[#allocation8 + $0x8] sm:$0xff]  }
0x1177   :  { %v10318_v58 = vadd.f32 %v7659_v45, %v5336_v35  ;;  %v5337_v29 = vadd.f32 %v10263_v7, %v5289_v56  ;;  %6860 = vmatpush3.bf16.msra.mxu0 %v7062_v54  ;;  %v7065_v45 = vld [vmem:[#allocation8 + $0x18] sm:$0xff]  }
0x1178   :  { %5368 = vadd.xlane.f32.xlu1 %v10295_v40  ;;  %5386 = vadd.xlane.f32.xlu0 %v10298_v62  ;;  %v10326_v36 = vadd.f32 %v7661_v31, %v5339_v57  ;;  %v7069_v54 = vld [vmem:[#allocation8 + $0x38] sm:$0xff]  }
0x1179   :  { %v10323_v39 = vadd.f32 %v7660_v61, %v5337_v29  ;;  %6861 = vmatprep.subr.bf16.mxu0 %v7063_v6 }
0x117b   :  { %6862 = vmatpush3.bf16.msra.mxu0 %v7063_v6 }
0x117c   :  { %5378 = vadd.xlane.f32.xlu1 %v10302_v50  ;;  %6863 = vmatprep.subr.bf16.mxu0 %v7064_v32 }
0x117f   :  { %6864 = vmatpush3.bf16.msra.mxu0 %v7064_v32 }
0x1180   :  { %5374 = vadd.xlane.f32.xlu1 %v10306_v15  ;;  %6865 = vmatprep.subr.bf16.mxu0 %v7065_v45 }
0x1183   :  { %6866 = vmatpush3.bf16.msra.mxu0 %v7065_v45 }
0x1184   :  { %5380 = vadd.xlane.f32.xlu1 %v10310_v11 }
0x1188   :  { %5376 = vadd.xlane.f32.xlu1 %v10314_v48 }
0x118c   :  { %5382 = vadd.xlane.f32.xlu1 %v10318_v58 }
0x1190   :  { %5384 = vadd.xlane.f32.xlu1 %v10323_v39 }
0x1194   :  { %5388 = vadd.xlane.f32.xlu1 %v10326_v36 }
0x11ed   :  { %v5363_v51 = vpop.xlane.xlu1 %5362 }
0x11ee   :  { %v5392_v21 = vmul.f32 0.0078125, %v5363_v51 }
0x11f0   :  { %v10333_v7 = vsub.f32 %v10266_v14, %v5392_v21  ;;  %v7066_v21 = vld [vmem:[#allocation8 + $0x20] sm:$0xff]  }
0x11f1   :  { %v5359_v8 = vpop.xlane.xlu1 %5358  ;;  %6867 = vmatprep.subr.bf16.mxu0 %v7066_v21 }
0x11f2   :  { %v5390_v44 = vmul.f32 0.0078125, %v5359_v8  ;;  %v5424_v37 = vmul.f32 %v10333_v7, %v10333_v7  ;;  %6868 = vmatpush3.bf16.msra.mxu0 %v7066_v21 }
0x11f4   :  { %v10330_v23 = vsub.f32 %v10270_v43, %v5390_v44 }
0x11f5   :  { %v5365_v38 = vpop.xlane.xlu1 %5364  ;;  %v5371_v22 = vpop.xlane.xlu0 %5370 }
0x11f6   :  { %v5422_v63 = vmul.f32 %v10330_v23, %v10330_v23  ;;  %v5393_v5 = vmul.f32 0.0078125, %v5365_v38  ;;  %v5396_v13 = vmul.f32 0.0078125, %v5371_v22 }
0x11f8   :  { %5438 = vadd.xlane.f32.xlu0 %v5422_v63  ;;  %v10343_v1 = vsub.f32 %v10275_v33, %v5393_v5  ;;  %v10351_v53 = vsub.f32 %v10278_v52, %v5396_v13 }
0x11f9   :  { %v5361_v10 = vpop.xlane.xlu1 %5360 }
0x11fa   :  { %v5391_v3 = vmul.f32 0.0078125, %v5361_v10  ;;  %v5425_v24 = vmul.f32 %v10343_v1, %v10343_v1  ;;  %v5428_v2 = vmul.f32 %v10351_v53, %v10351_v53 }
0x11fc   :  { %v10340_v18 = vsub.f32 %v10282_v0, %v5391_v3  ;;  %5442 = vadd.xlane.f32.xlu0 %v5424_v37  ;;  %v7067_v37 = vld [vmem:[#allocation8 + $0x28] sm:$0xff]  }
0x11fd   :  { %v5367_v4 = vpop.xlane.xlu1 %5366  ;;  %6869 = vmatprep.subr.bf16.mxu0 %v7067_v37 }
0x11fe   :  { %v5394_v34 = vmul.f32 0.0078125, %v5367_v4  ;;  %v5423_v12 = vmul.f32 %v10340_v18, %v10340_v18  ;;  %6870 = vmatpush3.bf16.msra.mxu0 %v7067_v37 }
0x1200   :  { %v10348_v49 = vsub.f32 %v10286_v55, %v5394_v34  ;;  %5440 = vadd.xlane.f32.xlu1 %v5423_v12 }
0x1201   :  { %v5373_v46 = vpop.xlane.xlu1 %5372 }
0x1202   :  { %v5426_v20 = vmul.f32 %v10348_v49, %v10348_v49  ;;  %v5397_v60 = vmul.f32 0.0078125, %v5373_v46 }
0x1204   :  { %5446 = vadd.xlane.f32.xlu0 %v5426_v20  ;;  %5444 = vadd.xlane.f32.xlu1 %v5425_v24  ;;  %v10363_v9 = vsub.f32 %v10290_v16, %v5397_v60  ;;  %v7068_v20 = vld [vmem:[#allocation8 + $0x30] sm:$0xff]  }
0x1205   :  { %v5369_v42 = vpop.xlane.xlu1 %5368  ;;  %v5387_v51 = vpop.xlane.xlu0 %5386  ;;  %6871 = vmatprep.subr.bf16.mxu0 %v7068_v20 }
0x1206   :  { %v5395_v30 = vmul.f32 0.0078125, %v5369_v42  ;;  %v5429_v59 = vmul.f32 %v10363_v9, %v10363_v9  ;;  %v5404_v38 = vmul.f32 0.0078125, %v5387_v51  ;;  %6872 = vmatpush3.bf16.msra.mxu0 %v7068_v20 }
0x1207   :  { %6873 = vmatprep.subr.bf16.mxu0 %v7069_v54 }
0x1208   :  { %v10360_v26 = vsub.f32 %v10295_v40, %v5395_v30  ;;  %5450 = vadd.xlane.f32.xlu0 %v5428_v2  ;;  %v10391_v4 = vsub.f32 %v10298_v62, %v5404_v38 }
0x1209   :  { %v5379_v41 = vpop.xlane.xlu1 %5378 }
0x120a   :  { %v5427_v47 = vmul.f32 %v10360_v26, %v10360_v26  ;;  %v5400_v17 = vmul.f32 0.0078125, %v5379_v41  ;;  %v5436_v60 = vmul.f32 %v10391_v4, %v10391_v4  ;;  %6874 = vmatpush3.bf16.msra.mxu0 %v7069_v54 }
0x120c   :  { %5448 = vadd.xlane.f32.xlu1 %v5427_v47  ;;  %v10373_v19 = vsub.f32 %v10302_v50, %v5400_v17 }
0x120d   :  { %v5375_v56 = vpop.xlane.xlu1 %5374 }
0x120e   :  { %v5398_v28 = vmul.f32 0.0078125, %v5375_v56  ;;  %v5432_v31 = vmul.f32 %v10373_v19, %v10373_v19 }
0x1210   :  { %v10370_v25 = vsub.f32 %v10306_v15, %v5398_v28  ;;  %5452 = vadd.xlane.f32.xlu1 %v5429_v59 }
0x1211   :  { %v5381_v27 = vpop.xlane.xlu1 %5380 }
0x1212   :  { %v5430_v35 = vmul.f32 %v10370_v25, %v10370_v25  ;;  %v5401_v57 = vmul.f32 0.0078125, %v5381_v27 }
0x1214   :  { %5454 = vadd.xlane.f32.xlu0 %v5430_v35  ;;  %v10383_v63 = vsub.f32 %v10310_v11, %v5401_v57 }
0x1215   :  { %v5377_v29 = vpop.xlane.xlu1 %5376 }
0x1216   :  { %v5399_v61 = vmul.f32 0.0078125, %v5377_v29  ;;  %v5433_v12 = vmul.f32 %v10383_v63, %v10383_v63 }
0x1218   :  { %v10380_v8 = vsub.f32 %v10314_v48, %v5399_v61  ;;  %5458 = vadd.xlane.f32.xlu0 %v5432_v31 }
0x1219   :  { %v5383_v44 = vpop.xlane.xlu1 %5382 }
0x121a   :  { %v5402_v10 = vmul.f32 0.0078125, %v5383_v44  ;;  %v5431_v5 = vmul.f32 %v10380_v8, %v10380_v8 }
0x121c   :  { %v10388_v3 = vsub.f32 %v10318_v58, %v5402_v10  ;;  %5456 = vadd.xlane.f32.xlu1 %v5431_v5 }
0x121d   :  { %v5385_v22 = vpop.xlane.xlu1 %5384 }
0x121e   :  { %v5403_v13 = vmul.f32 0.0078125, %v5385_v22  ;;  %v5434_v34 = vmul.f32 %v10388_v3, %v10388_v3  ;;  %v10413_v22 = vld [vmem:[%s10508_s7] ss:$0 sm:$0xff] }
0x1220   :  { %v10398_v46 = vsub.f32 %v10323_v39, %v5403_v13  ;;  %5462 = vadd.xlane.f32.xlu0 %v5434_v34  ;;  %5460 = vadd.xlane.f32.xlu1 %v5433_v12 }
0x1221   :  { %v5389_v24 = vpop.xlane.xlu1 %5388 }
0x1222   :  { %v5405_v42 = vmul.f32 0.0078125, %v5389_v24  ;;  %v5435_v30 = vmul.f32 %v10398_v46, %v10398_v46 }
0x1224   :  { %v10405_v2 = vsub.f32 %v10326_v36, %v5405_v42  ;;  %5466 = vadd.xlane.f32.xlu0 %v5436_v60  ;;  %5464 = vadd.xlane.f32.xlu1 %v5435_v30 }
0x1226   :  { %v5437_v41 = vmul.f32 %v10405_v2, %v10405_v2 }
0x1228   :  { %5468 = vadd.xlane.f32.xlu1 %v5437_v41 }
0x1285   :  { %v5439_v47 = vpop.xlane.xlu0 %5438 }
0x1286   :  { %v5470_v6 = vmul.f32 0.0078125, %v5439_v47 }
0x1288   :  { %v5486_v56 = vadd.f32 1e-05, %v5470_v6 }
0x1289   :  { %v5443_v17 = vpop.xlane.xlu0 %5442 }
0x128a   :  { %v5472_v28 = vmul.f32 0.0078125, %v5443_v17  ;;  %7614 = vrsqrt.f32 %v5486_v56 }
0x128c   :  { %v5488_v59 = vadd.f32 1e-05, %v5472_v28 }
0x128d   :  { %v5441_v32 = vpop.xlane.xlu1 %5440 }
0x128e   :  { %v5471_v27 = vmul.f32 0.0078125, %v5441_v32  ;;  %7616 = vrsqrt.f32 %v5488_v59 }
0x1290   :  { %v5487_v35 = vadd.f32 1e-05, %v5471_v27 }
0x1291   :  { %v5447_v45 = vpop.xlane.xlu0 %5446  ;;  %v5445_v29 = vpop.xlane.xlu1 %5444 }
0x1292   :  { %7618 = vrsqrt.f32 %v5487_v35  ;;  %v5474_v57 = vmul.f32 0.0078125, %v5447_v45  ;;  %v5473_v61 = vmul.f32 0.0078125, %v5445_v29 }
0x1294   :  { %v5490_v31 = vadd.f32 1e-05, %v5474_v57  ;;  %v5489_v51 = vadd.f32 1e-05, %v5473_v61  ;;  %v7615_v44 = vpop.eup %7614 }
0x1295   :  { %v5451_v21 = vpop.xlane.xlu0 %5450  ;;  %v5518_v37 = vmul.f32 %v7615_v44, %v10330_v23  ;;  %v10421_v23 = vld [vmem:[%s10509_s8] ss:$0 sm:$0xff] }
0x1296   :  { %7620 = vrsqrt.f32 %v5490_v31  ;;  %v5476_v38 = vmul.f32 0.0078125, %v5451_v21 }
0x1297   :  { %7622 = vrsqrt.f32 %v5489_v51  ;;  %v5540_v60 = vmul.f32 %v10413_v22, %v5518_v37 }
0x1298   :  { %v5492_v10 = vadd.f32 1e-05, %v5476_v38  ;;  %v7617_v34 = vpop.eup %7616 }
0x1299   :  { %v5449_v5 = vpop.xlane.xlu1 %5448  ;;  %v5520_v30 = vmul.f32 %v7617_v34, %v10333_v7  ;;  %v5562_v28 = vadd.f32 %v10421_v23, %v5540_v60 }
0x129a   :  { %v5475_v13 = vmul.f32 0.0078125, %v5449_v5  ;;  %7624 = vrsqrt.f32 %v5492_v10 }
0x129b   :  { %v5542_v59 = vmul.f32 %v10413_v22, %v5520_v30 }
0x129c   :  { %v7619_v12 = vpop.eup %7618  ;;  %v5491_v20 = vadd.f32 1e-05, %v5475_v13 }
0x129d   :  { %v5453_v24 = vpop.xlane.xlu1 %5452  ;;  %v5519_v42 = vmul.f32 %v7619_v12, %v10340_v18  ;;  %v5564_v51 = vadd.f32 %v10421_v23, %v5542_v59 }
0x129e   :  { %7626 = vrsqrt.f32 %v5491_v20  ;;  %v5477_v54 = vmul.f32 0.0078125, %v5453_v24 }
0x129f   :  { %v5541_v41 = vmul.f32 %v10413_v22, %v5519_v42 }
0x12a0   :  { %v7621_v47 = vpop.eup %7620  ;;  %v5493_v6 = vadd.f32 1e-05, %v5477_v54 }
0x12a1   :  { %v7623_v56 = vpop.eup %7622  ;;  %v5455_v17 = vpop.xlane.xlu0 %5454  ;;  %v5563_v18 = vadd.f32 %v10421_v23, %v5541_v41  ;;  %v5522_v29 = vmul.f32 %v7621_v47, %v10348_v49 }
0x12a2   :  { %v5521_v7 = vmul.f32 %v7623_v56, %v10343_v1  ;;  %7628 = vrsqrt.f32 %v5493_v6  ;;  %v5478_v32 = vmul.f32 0.0078125, %v5455_v17 }
0x12a3   :  { %v5578_v27 = vpack.c.bf16 %v5563_v18, %v5562_v28  ;;  %v5544_v1 = vmul.f32 %v10413_v22, %v5522_v29 }
0x12a4   :  { %v5543_v35 = vmul.f32 %v10413_v22, %v5521_v7  ;;  %v5494_v45 = vadd.f32 1e-05, %v5478_v32  ;;  %v7625_v61 = vpop.eup %7624 }
0x12a5   :  { %v5459_v57 = vpop.xlane.xlu0 %5458  ;;  %6875 = vmatprep.mubr.bf16.mxu0 %v5578_v27  ;;  %v5524_v13 = vmul.f32 %v7625_v61, %v10351_v53  ;;  %v5566_v24 = vadd.f32 %v10421_v23, %v5544_v1 }
0x12a6   :  { %v5480_v31 = vmul.f32 0.0078125, %v5459_v57  ;;  %v5565_v21 = vadd.f32 %v10421_v23, %v5543_v35  ;;  %7630 = vrsqrt.f32 %v5494_v45 }
0x12a7   :  { %v5546_v41 = vmul.f32 %v10413_v22, %v5524_v13 }
0x12a8   :  { %v7627_v44 = vpop.eup %7626  ;;  %v5579_v38 = vpack.c.bf16 %v5565_v21, %v5564_v51  ;;  %v5496_v10 = vadd.f32 1e-05, %v5480_v31 }
0x12a9   :  { %v5457_v5 = vpop.xlane.xlu1 %5456  ;;  %v5523_v37 = vmul.f32 %v7627_v44, %v10360_v26  ;;  %v5568_v59 = vadd.f32 %v10421_v23, %v5546_v41 }
0x12aa   :  { %6876 = vmatmul.mubr.bf16.vlgmr.msra.gmra.mrb[208].mxu0 %v5579_v38  ;;  %v5479_v49 = vmul.f32 0.0078125, %v5457_v5  ;;  %7632 = vrsqrt.f32 %v5496_v10 }
0x12ab   :  { %v5545_v34 = vmul.f32 %v10413_v22, %v5523_v37 }
0x12ac   :  { %v7629_v12 = vpop.eup %7628  ;;  %v5495_v20 = vadd.f32 1e-05, %v5479_v49 }
0x12ad   :  { %v5463_v42 = vpop.xlane.xlu0 %5462  ;;  %v5461_v60 = vpop.xlane.xlu1 %5460  ;;  %v5567_v30 = vadd.f32 %v10421_v23, %v5545_v34  ;;  %v5525_v54 = vmul.f32 %v7629_v12, %v10363_v9 }
0x12ae   :  { %7634 = vrsqrt.f32 %v5495_v20  ;;  %v5482_v26 = vmul.f32 0.0078125, %v5463_v42  ;;  %v5481_v53 = vmul.f32 0.0078125, %v5461_v60 }
0x12af   :  { %v5580_v47 = vpack.c.bf16 %v5567_v30, %v5566_v24  ;;  %v5547_v6 = vmul.f32 %v10413_v22, %v5525_v54 }
0x12b0   :  { %v5498_v56 = vadd.f32 1e-05, %v5482_v26  ;;  %v5497_v17 = vadd.f32 1e-05, %v5481_v53  ;;  %v7631_v32 = vpop.eup %7630 }
0x12b1   :  { %v5467_v28 = vpop.xlane.xlu0 %5466  ;;  %6879 = vmatprep.mubr.bf16.mxu0 %v5580_v47  ;;  %v5465_v18 = vpop.xlane.xlu1 %5464  ;;  %v5569_v7 = vadd.f32 %v10421_v23, %v5547_v6  ;;  %v5526_v61 = vmul.f32 %v7631_v32, %v10370_v25 }
0x12b2   :  { %7636 = vrsqrt.f32 %v5498_v56  ;;  %v5484_v9 = vmul.f32 0.0078125, %v5467_v28  ;;  %v5483_v27 = vmul.f32 0.0078125, %v5465_v18 }
0x12b3   :  { %7638 = vrsqrt.f32 %v5497_v17  ;;  %v5581_v35 = vpack.c.bf16 %v5569_v7, %v5568_v59  ;;  %v5548_v1 = vmul.f32 %v10413_v22, %v5526_v61 }
0x12b4   :  { %v5500_v45 = vadd.f32 1e-05, %v5484_v9  ;;  %v5499_v29 = vadd.f32 1e-05, %v5483_v27  ;;  %v7633_v51 = vpop.eup %7632 }
0x12b5   :  { %6880 = vmatmul.mubr.bf16.gmra.mrb[212].mxu0 %v5581_v35  ;;  %v5469_v57 = vpop.xlane.xlu1 %5468  ;;  %v5528_v10 = vmul.f32 %v7633_v51, %v10373_v19  ;;  %v5570_v49 = vadd.f32 %v10421_v23, %v5548_v1 }
0x12b6   :  { %7640 = vrsqrt.f32 %v5500_v45  ;;  %v5485_v31 = vmul.f32 0.0078125, %v5469_v57 }
0x12b7   :  { %7642 = vrsqrt.f32 %v5499_v29  ;;  %v5550_v12 = vmul.f32 %v10413_v22, %v5528_v10 }
0x12b8   :  { %v7635_v21 = vpop.eup %7634  ;;  %v5501_v44 = vadd.f32 1e-05, %v5485_v31 }
0x12b9   :  { %v5527_v38 = vmul.f32 %v7635_v21, %v10380_v8  ;;  %v5572_v30 = vadd.f32 %v10421_v23, %v5550_v12 }
0x12ba   :  { %7644 = vrsqrt.f32 %v5501_v44 }
0x12bb   :  { %v5549_v5 = vmul.f32 %v10413_v22, %v5527_v38 }
0x12bc   :  { %v7637_v37 = vpop.eup %7636 }
0x12bd   :  { %v7639_v13 = vpop.eup %7638  ;;  %v5571_v25 = vadd.f32 %v10421_v23, %v5549_v5  ;;  %v5530_v20 = vmul.f32 %v7637_v37, %v10388_v3 }
0x12be   :  { %v5529_v34 = vmul.f32 %v7639_v13, %v10383_v63 }
0x12bf   :  { %v5582_v8 = vpack.c.bf16 %v5571_v25, %v5570_v49  ;;  %v5552_v63 = vmul.f32 %v10413_v22, %v5530_v20 }
0x12c0   :  { %v7641_v24 = vpop.eup %7640  ;;  %v5551_v42 = vmul.f32 %v10413_v22, %v5529_v34 }
0x12c1   :  { %v7643_v60 = vpop.eup %7642  ;;  %6883 = vmatprep.mubr.bf16.mxu0 %v5582_v8  ;;  %v5532_v19 = vmul.f32 %v7641_v24, %v10391_v4  ;;  %v5574_v56 = vadd.f32 %v10421_v23, %v5552_v63 }
0x12c2   :  { %v5573_v54 = vadd.f32 %v10421_v23, %v5551_v42  ;;  %v5531_v41 = vmul.f32 %v7643_v60, %v10398_v46 }
0x12c3   :  { %v5554_v6 = vmul.f32 %v10413_v22, %v5532_v19 }
0x12c4   :  { %v7645_v26 = vpop.eup %7644  ;;  %v5583_v53 = vpack.c.bf16 %v5573_v54, %v5572_v30  ;;  %v5553_v3 = vmul.f32 %v10413_v22, %v5531_v41 }
0x12c5   :  { %v5533_v47 = vmul.f32 %v7645_v26, %v10405_v2  ;;  %v5576_v46 = vadd.f32 %v10421_v23, %v5554_v6  ;;  %v5970_v2 = vld [vmem:[%s10511_s10] ss:$0 sm:$0xff]  ;;  %s7798_s10 = smov [#allocation10]  }
0x12c6   :  { %6884 = vmatmul.mubr.bf16.gmra.mrb[216].mxu0 %v5583_v53  ;;  %v5575_v4 = vadd.f32 %v10421_v23, %v5553_v3  ;;  %s5791_s25 = sshll.u32 %s7798_s10, 4  ;;  %s5792_s25 = int_to_ptr.vmem [resolvable:$true] %s5791_s25 }
0x12c7   :  { %v5555_v17 = vmul.f32 %v10413_v22, %v5533_v47  ;;  %s7750_s27 = scalar_lea.vmem %s5792_s25, 2048  ;;  %p7755_p5 = scmp.lt.s32.totalorder %s5792_s25, %s5792_s25 }
0x12c8   :  { %v5584_v28 = vpack.c.bf16 %v5575_v4, %v5574_v56  ;;  %p7751_p4 = scmp.ne.s32.totalorder %s5792_s25, %s7750_s27  ;;  %p7756_p6 = scmp.lt.s32.totalorder %s7750_s27, %s7750_s27 }
0x12c9   :  { %v5577_v18 = vadd.f32 %v10421_v23, %v5555_v17 }
0x12ca   :  { %6887 = vmatprep.mubr.bf16.mxu0 %v5584_v28  ;;  %p7757_p7 = por %p7756_p6, %p7755_p5 }
0x12cb   :  { %v5585_v59 = vpack.c.bf16 %v5577_v18, %v5576_v46 }
0x12cc   :  { %p7758_p8 = pnand %p7757_p7, %p7751_p4 }
0x12ce   :  { %6888 = vmatmul.mubr.bf16.gmra.mrb[220].mxu0 %v5585_v59 }
0x137d   :  { %v6877_v7 = vpop.f32.mrb[208].mxu0 }
0x137e   :  { %v5700_v32 = vadd.f32 %v6877_v7, %v5970_v2  ;;  %v5691_v9 = vpop.f32.mrb[209].mxu0 }
0x137f   :  { %v5692_v27 = vadd.f32 %v5970_v2, %v5691_v9  ;;  %v6878_v35 = vpop.f32.mrb[210].mxu0 }
0x1380   :  { %v5756_v45 = vadd.f32 %v5700_v32, %v10266_v14  ;;  %v5703_v22 = vadd.f32 %v6878_v35, %v5970_v2  ;;  %v5694_v29 = vpop.f32.mrb[211].mxu0 }
0x1381   :  { %v5754_v57 = vadd.f32 %v5692_v27, %v10270_v43  ;;  %v5695_v61 = vadd.f32 %v5970_v2, %v5694_v29 }
0x1382   :  { %5772 = vst [vmem:[#allocation10 + $0x10] sm:$0xff] %v5756_v45  ;;  %v5757_v23 = vadd.f32 %v5703_v22, %v10275_v33 }
0x1383   :  { %5770 = vst [vmem:[#allocation10] sm:$0xff] %v5754_v57  ;;  %v5755_v31 = vadd.f32 %v5695_v61, %v10282_v0 }
0x1384   :  { %5773 = vst [vmem:[#allocation10 + $0x18] sm:$0xff] %v5757_v23 }
0x1385   :  { %5771 = vst [vmem:[#allocation10 + $0x8] sm:$0xff] %v5755_v31 }
0x1388   :  { %v6881_v51 = vpop.f32.mrb[212].mxu0 }
0x1389   :  { %v5716_v21 = vadd.f32 %v6881_v51, %v5970_v2  ;;  %v5707_v44 = vpop.f32.mrb[213].mxu0 }
0x138a   :  { %v5708_v38 = vadd.f32 %v5970_v2, %v5707_v44  ;;  %v6882_v1 = vpop.f32.mrb[214].mxu0 }
0x138b   :  { %v5760_v14 = vadd.f32 %v5716_v21, %v10278_v52  ;;  %v5719_v10 = vadd.f32 %v6882_v1, %v5970_v2  ;;  %v5710_v5 = vpop.f32.mrb[215].mxu0 }
0x138c   :  { %v5758_v43 = vadd.f32 %v5708_v38, %v10286_v55  ;;  %v5711_v37 = vadd.f32 %v5970_v2, %v5710_v5 }
0x138d   :  { %5776 = vst [vmem:[#allocation10 + $0x30] sm:$0xff] %v5760_v14  ;;  %v5761_v33 = vadd.f32 %v5719_v10, %v10290_v16 }
0x138e   :  { %5774 = vst [vmem:[#allocation10 + $0x20] sm:$0xff] %v5758_v43  ;;  %v5759_v0 = vadd.f32 %v5711_v37, %v10295_v40 }
0x138f   :  { %5777 = vst [vmem:[#allocation10 + $0x38] sm:$0xff] %v5761_v33 }
0x1390   :  { %5775 = vst [vmem:[#allocation10 + $0x28] sm:$0xff] %v5759_v0 }
0x1399   :  { %v6885_v13 = vpop.f32.mrb[216].mxu0 }
0x139a   :  { %v5732_v49 = vadd.f32 %v6885_v13, %v5970_v2  ;;  %v5723_v25 = vpop.f32.mrb[217].mxu0 }
0x139b   :  { %v5724_v34 = vadd.f32 %v5970_v2, %v5723_v25  ;;  %v6886_v12 = vpop.f32.mrb[218].mxu0 }
0x139c   :  { %v5764_v52 = vadd.f32 %v5732_v49, %v10302_v50  ;;  %v5735_v20 = vadd.f32 %v6886_v12, %v5970_v2  ;;  %v5726_v8 = vpop.f32.mrb[219].mxu0 }
0x139d   :  { %v5762_v55 = vadd.f32 %v5724_v34, %v10306_v15  ;;  %v5727_v24 = vadd.f32 %v5970_v2, %v5726_v8 }
0x139e   :  { %5780 = vst [vmem:[#allocation10 + $0x50] sm:$0xff] %v5764_v52  ;;  %v5765_v16 = vadd.f32 %v5735_v20, %v10310_v11 }
0x139f   :  { %5778 = vst [vmem:[#allocation10 + $0x40] sm:$0xff] %v5762_v55  ;;  %v5763_v40 = vadd.f32 %v5727_v24, %v10314_v48 }
0x13a0   :  { %5781 = vst [vmem:[#allocation10 + $0x58] sm:$0xff] %v5765_v16 }
0x13a1   :  { %5779 = vst [vmem:[#allocation10 + $0x48] sm:$0xff] %v5763_v40  ;;  %v6889_v42 = vpop.f32.mrb[220].mxu0 }
0x13a2   :  { %v5748_v60 = vadd.f32 %v6889_v42, %v5970_v2  ;;  %v5739_v19 = vpop.f32.mrb[221].mxu0 }
0x13a3   :  { %v5740_v30 = vadd.f32 %v5970_v2, %v5739_v19  ;;  %v6890_v54 = vpop.f32.mrb[222].mxu0 }
0x13a4   :  { %v5768_v50 = vadd.f32 %v5748_v60, %v10298_v62  ;;  %v5751_v41 = vadd.f32 %v6890_v54, %v5970_v2  ;;  %v5742_v63 = vpop.f32.mrb[223].mxu0 }
0x13a5   :  { %v5766_v15 = vadd.f32 %v5740_v30, %v10318_v58  ;;  %v5743_v26 = vadd.f32 %v5970_v2, %v5742_v63 }
0x13a6   :  { %5784 = vst [vmem:[#allocation10 + $0x70] sm:$0xff] %v5768_v50  ;;  %v5769_v11 = vadd.f32 %v5751_v41, %v10326_v36 }
0x13a7   :  { %5782 = vst [vmem:[#allocation10 + $0x60] sm:$0xff] %v5766_v15  ;;  %v5767_v48 = vadd.f32 %v5743_v26, %v10323_v39 }
0x13a8   :  { %5785 = vst [vmem:[#allocation10 + $0x78] sm:$0xff] %v5769_v11 }
0x13a9   :  { %5783 = vst [vmem:[#allocation10 + $0x68] sm:$0xff] %v5767_v48 }
0x13aa   :  { %7761 = shalt.err (!%p7758_p8)
}
0x13ab   :  { %s7762_s30 = scalar_lea.hbm %s10512_s11, 2048 }
0x13ac   :  { %p7763_p9 = scmp.ne.s32.totalorder %s10512_s11, %s7762_s30  ;;  %p7766_p10 = scmp.lt.u32.totalorder %s7762_s30, %s10512_s11 }
0x13ae   :  { %p7768_p11 = pnand %p7766_p10, %p7763_p9 }
0x13b0   :  { %7771 = shalt.err (!%p7768_p11)
}
0x13b1   :  { %5797 = dma.vmem_to_hbm [thread:$0]  %s5792_s25, 2048, %s10512_s11, [#allocation4], %s7784_s3, %s7784_s3, %s7785_s18  }
0x13b2   :  { %7778 = dma.done.wait [#allocation4], 2048  }
0x13b3   :  { %7779 = vsyncadd [#allocation4], 4294965248 }
0x13b4   :  { %5801 = vsyncpa [#allocation3], 1 }
0x13b5   :  { %5802 = vsyncpa [#allocation6], 1 }
0x13b6   :  { %5803 = vsyncpa [#allocation9], 1 }
0x13b7   :  { %5804 = vsyncpa [#allocation4], 1 }

</bundles_post_ra>
